<compile_context>
chip_gen: v6e
topology: v6e:2x2x1
jax: 0.10.0
libtpu: 0.0.40
codegen_flags: <defaults>
</compile_context>

<pallas_src>
import functools

import jax
import jax.numpy as jnp
from jax import lax
from jax.experimental import pallas as pl
from jax.experimental.pallas import tpu as pltpu

TEMPERATURE = 0.1


def _multipos_kernel(fq_ref, fk_ref, labq_ref, labk_ref, out_ref,
                     m_sc, l_sc, s_sc, n_sc, *, inv_temp):
    # fq_ref: (tq, D) query-row tile, fk_ref: (tk, D) key-row tile (same array)
    # labq_ref: (tq, 1) i32, labk_ref: (1, tk) i32
    # out_ref: (tq, 1) f32 per-row loss (written on last key tile)
    # scratch: m_sc/l_sc/s_sc/n_sc each (tq, 1) f32
    qi = pl.program_id(0)
    ki = pl.program_id(1)
    nk = pl.num_programs(1)

    @pl.when(ki == 0)
    def _():
        m_sc[...] = jnp.full_like(m_sc, -jnp.inf)
        l_sc[...] = jnp.zeros_like(l_sc)
        s_sc[...] = jnp.zeros_like(s_sc)
        n_sc[...] = jnp.zeros_like(n_sc)

    # --- F.normalize(feats, dim=-1): row-wise rsqrt (per-row EUP op) ---
    xq = fq_ref[...].astype(jnp.float32)
    xk = fk_ref[...].astype(jnp.float32)
    inv_q = lax.rsqrt(jnp.maximum(jnp.sum(xq * xq, axis=-1, keepdims=True), 1e-24))
    inv_k = lax.rsqrt(jnp.maximum(jnp.sum(xk * xk, axis=-1, keepdims=True), 1e-24))
    xqn = (xq * inv_q).astype(jnp.bfloat16)   # bf16 MXU inputs, f32 accumulate
    xkn = (xk * inv_k).astype(jnp.bfloat16)

    # --- logits tile = (q @ k.T) / temperature  (MXU) ---
    logits = lax.dot_general(
        xqn, xkn, (((1,), (1,)), ((), ())),
        preferred_element_type=jnp.float32) * inv_temp            # (tq, tk) f32

    tq, tk = logits.shape
    row_g = qi * tq + lax.broadcasted_iota(jnp.int32, (tq, tk), 0)
    col_g = ki * tk + lax.broadcasted_iota(jnp.int32, (tq, tk), 1)
    diag = row_g == col_g

    # positives mask (same label, excluding self) -- fused diagonal handling
    eq = labq_ref[...] == labk_ref[...]                            # (tq, tk) bool
    pos = jnp.where(diag, 0.0, eq.astype(jnp.float32))
    # masked logits for the log-sum-exp (self-similarity pushed to ~-1e9)
    lm = jnp.where(diag, logits - 1e9, logits)

    # --- online softmax statistics over key tiles ---
    m_prev = m_sc[...]
    m_new = jnp.maximum(m_prev, jnp.max(lm, axis=-1, keepdims=True))
    alpha = jnp.exp(m_prev - m_new)
    l_sc[...] = alpha * l_sc[...] + jnp.sum(jnp.exp(lm - m_new), axis=-1, keepdims=True)
    m_sc[...] = m_new

    # --- running sum of positive logits and positive counts ---
    s_sc[...] = s_sc[...] + jnp.sum(pos * logits, axis=-1, keepdims=True)
    n_sc[...] = n_sc[...] + jnp.sum(pos, axis=-1, keepdims=True)

    @pl.when(ki == nk - 1)
    def _():
        lse = m_sc[...] + jnp.log(l_sc[...])
        n = n_sc[...]
        c = jnp.maximum(n, 1.0)
        # per-row loss = -(sum_j p*log_q) = (N*lse - S) / max(N, 1)
        out_ref[...] = (n * lse - s_sc[...]) / c


def _pick_tile(n, max_tile=256):
    """Largest power-of-two tile (<= max_tile, >= 8) dividing n, else n itself."""
    t = max_tile
    while t >= 8:
        if n % t == 0:
            return t
        t //= 2
    return n  # full-extent fallback for tiny / awkward batch sizes


def multipos_con_loss(feats, labels, temperature=TEMPERATURE):
    """feats: [B, D] float, labels: [B] int. Returns scalar f32 loss."""
    B, D = feats.shape
    t = _pick_tile(B)
    nq = B // t
    nk = B // t

    x = feats.astype(jnp.float32)
    lab = labels.astype(jnp.int32)
    lab_col = lab.reshape(B, 1)
    lab_row = lab.reshape(1, B)

    row_losses = pl.pallas_call(
        functools.partial(_multipos_kernel, inv_temp=1.0 / temperature),
        out_shape=jax.ShapeDtypeStruct((B, 1), jnp.float32),
        grid_spec=pltpu.PrefetchScalarGridSpec(
            num_scalar_prefetch=0,
            grid=(nq, nk),
            in_specs=[
                pl.BlockSpec((t, D), lambda qi, ki: (qi, 0)),   # query rows
                pl.BlockSpec((t, D), lambda qi, ki: (ki, 0)),   # key rows
                pl.BlockSpec((t, 1), lambda qi, ki: (qi, 0)),   # labels (column view)
                pl.BlockSpec((1, t), lambda qi, ki: (0, ki)),   # labels (row view)
            ],
            out_specs=pl.BlockSpec((t, 1), lambda qi, ki: (qi, 0)),
            scratch_shapes=[pltpu.VMEM((t, 1), jnp.float32)] * 4,  # m, l, S, N
        ),
        compiler_params=pltpu.CompilerParams(
            dimension_semantics=("parallel", "arbitrary")),
    )(x, x, lab_col, lab_row)

    return jnp.sum(row_losses) / jnp.float32(B)


def _reference(feats, labels, temperature=TEMPERATURE, matmul_dtype=jnp.float32):
    # Pure-JAX reference mirroring the PyTorch forward (world_size=1, rank=0).
    x = feats.astype(jnp.float32)
    xn = x / jnp.maximum(jnp.linalg.norm(x, axis=-1, keepdims=True), 1e-12)
    B = x.shape[0]
    eq = (labels.reshape(-1, 1) == labels.reshape(1, -1)).astype(jnp.float32)
    logits_mask = 1.0 - jnp.eye(B, dtype=jnp.float32)
    mask = eq * logits_mask
    xm = xn.astype(matmul_dtype)
    logits = jnp.dot(xm, xm.T, preferred_element_type=jnp.float32) / temperature
    logits = logits - (1.0 - logits_mask) * 1e9
    logits = logits - jnp.max(logits, axis=-1, keepdims=True)
    log_q = jax.nn.log_softmax(logits, axis=-1)
    p = mask / jnp.maximum(jnp.sum(mask, axis=1, keepdims=True), 1.0)
    return -jnp.mean(jnp.sum(p * log_q, axis=-1))


if __name__ == "__main__":
    B, D = 512, 128   # grid (2, 2) with 256x256 logits tiles -> exercises tiling
    key = jax.random.PRNGKey(0)
    kf, kl = jax.random.split(key)
    feats = jax.random.normal(kf, (B, D), dtype=jnp.float32)
    labels = jax.random.randint(kl, (B,), 0, 16, dtype=jnp.int32)

    loss = jax.block_until_ready(multipos_con_loss(feats, labels))
    ref_f32 = jax.block_until_ready(_reference(feats, labels, matmul_dtype=jnp.float32))
    ref_bf16 = jax.block_until_ready(_reference(feats, labels, matmul_dtype=jnp.bfloat16))

    assert jnp.isfinite(loss), "loss is not finite"
    # Tight check against a reference using the same bf16 Gram matrix.
    assert abs(float(loss) - float(ref_bf16)) < 2e-2, (float(loss), float(ref_bf16))
    # Looser check against the full-f32 reference (bf16 MXU rounding).
    assert abs(float(loss) - float(ref_f32)) < 5e-2 * max(1.0, abs(float(ref_f32))), (
        float(loss), float(ref_f32))
    print("KERNEL_OK")
</pallas_src>

<mosaic_0001>
module attributes {stable_mosaic.version = 11 : i64} {
  func.func @_multipos_kernel(%arg0: i32, %arg1: i32, %arg2: memref<256x128xf32, #tpu.memory_space<vmem>>, %arg3: memref<256x128xf32, #tpu.memory_space<vmem>>, %arg4: memref<256x1xi32, #tpu.memory_space<vmem>>, %arg5: memref<1x256xi32, #tpu.memory_space<vmem>>, %arg6: memref<256x1xf32, #tpu.memory_space<vmem>>, %arg7: memref<256x1xf32, #tpu.memory_space<vmem>>, %arg8: memref<256x1xf32, #tpu.memory_space<vmem>>, %arg9: memref<256x1xf32, #tpu.memory_space<vmem>>, %arg10: memref<256x1xf32, #tpu.memory_space<vmem>>) attributes {dimension_semantics = [#tpu.dimension_semantics<parallel>, #tpu.dimension_semantics<arbitrary>], iteration_bounds = array<i64: 2, 2>, scalar_prefetch = 0 : i64, scratch_operands = 4 : i64, tpu.core_type = #tpu.core_type<tc>, window_params = [{transform_indices = @transform_0, window_bounds = array<i64: 256, 128>}, {transform_indices = @transform_1, window_bounds = array<i64: 256, 128>}, {transform_indices = @transform_2, window_bounds = array<i64: 256, 1>}, {transform_indices = @transform_3, window_bounds = array<i64: 1, 256>}, {transform_indices = @transform_4, window_bounds = array<i64: 256, 1>}]} {
    %c0_i32 = arith.constant 0 : i32
    %0 = arith.cmpi eq, %arg1, %c0_i32 : i32
    %1 = arith.extui %0 : i1 to i32
    %c0_i32_0 = arith.constant 0 : i32
    %2 = arith.cmpi ne, %1, %c0_i32_0 : i32
    scf.if %2 {
      %cst_37 = arith.constant 0xFF800000 : f32
      %77 = vector.broadcast %cst_37 : f32 to vector<256x1xf32>
      %c0_38 = arith.constant 0 : index
      %c0_39 = arith.constant 0 : index
      %78 = vector.load %arg7[%c0_38, %c0_39] : memref<256x1xf32, #tpu.memory_space<vmem>>, vector<256x1xf32>
      tpu.vector_store %arg7[%c0_38, %c0_39], %77 {strides = array<i32>} : memref<256x1xf32, #tpu.memory_space<vmem>>, vector<256x1xf32>,
      %cst_40 = arith.constant 0.000000e+00 : f32
      %79 = vector.broadcast %cst_40 : f32 to vector<256x1xf32>
      %c0_41 = arith.constant 0 : index
      %c0_42 = arith.constant 0 : index
      %80 = vector.load %arg8[%c0_41, %c0_42] : memref<256x1xf32, #tpu.memory_space<vmem>>, vector<256x1xf32>
      tpu.vector_store %arg8[%c0_41, %c0_42], %79 {strides = array<i32>} : memref<256x1xf32, #tpu.memory_space<vmem>>, vector<256x1xf32>,
      %cst_43 = arith.constant 0.000000e+00 : f32
      %81 = vector.broadcast %cst_43 : f32 to vector<256x1xf32>
      %c0_44 = arith.constant 0 : index
      %c0_45 = arith.constant 0 : index
      %82 = vector.load %arg9[%c0_44, %c0_45] : memref<256x1xf32, #tpu.memory_space<vmem>>, vector<256x1xf32>
      tpu.vector_store %arg9[%c0_44, %c0_45], %81 {strides = array<i32>} : memref<256x1xf32, #tpu.memory_space<vmem>>, vector<256x1xf32>,
      %cst_46 = arith.constant 0.000000e+00 : f32
      %83 = vector.broadcast %cst_46 : f32 to vector<256x1xf32>
      %c0_47 = arith.constant 0 : index
      %c0_48 = arith.constant 0 : index
      %84 = vector.load %arg10[%c0_47, %c0_48] : memref<256x1xf32, #tpu.memory_space<vmem>>, vector<256x1xf32>
      tpu.vector_store %arg10[%c0_47, %c0_48], %83 {strides = array<i32>} : memref<256x1xf32, #tpu.memory_space<vmem>>, vector<256x1xf32>,
    } else {
    }
    %c0 = arith.constant 0 : index
    %c0_1 = arith.constant 0 : index
    %3 = vector.load %arg2[%c0, %c0_1] : memref<256x128xf32, #tpu.memory_space<vmem>>, vector<256x128xf32>
    %c0_2 = arith.constant 0 : index
    %c0_3 = arith.constant 0 : index
    %4 = vector.load %arg3[%c0_2, %c0_3] : memref<256x128xf32, #tpu.memory_space<vmem>>, vector<256x128xf32>
    %5 = arith.mulf %3, %3 : vector<256x128xf32>
    %cst = arith.constant dense<0.000000e+00> : vector<256xf32>
    %6 = vector.multi_reduction <add>, %5, %cst [1] : vector<256x128xf32> to vector<256xf32>
    %7 = vector.shape_cast %6 : vector<256xf32> to vector<256x1xf32>
    %cst_4 = arith.constant 1.000000e-24 : f32
    %8 = vector.broadcast %cst_4 : f32 to vector<256x1xf32>
    %9 = arith.maximumf %7, %8 : vector<256x1xf32>
    %10 = math.rsqrt %9 : vector<256x1xf32>
    %11 = arith.mulf %4, %4 : vector<256x128xf32>
    %cst_5 = arith.constant dense<0.000000e+00> : vector<256xf32>
    %12 = vector.multi_reduction <add>, %11, %cst_5 [1] : vector<256x128xf32> to vector<256xf32>
    %13 = vector.shape_cast %12 : vector<256xf32> to vector<256x1xf32>
    %cst_6 = arith.constant 1.000000e-24 : f32
    %14 = vector.broadcast %cst_6 : f32 to vector<256x1xf32>
    %15 = arith.maximumf %13, %14 : vector<256x1xf32>
    %16 = math.rsqrt %15 : vector<256x1xf32>
    %17 = vector.broadcast %10 : vector<256x1xf32> to vector<256x128xf32>
    %18 = arith.mulf %3, %17 : vector<256x128xf32>
    %19 = arith.truncf %18 : vector<256x128xf32> to vector<256x128xbf16>
    %20 = vector.broadcast %16 : vector<256x1xf32> to vector<256x128xf32>
    %21 = arith.mulf %4, %20 : vector<256x128xf32>
    %22 = arith.truncf %21 : vector<256x128xf32> to vector<256x128xbf16>
    %cst_7 = arith.constant dense<0.000000e+00> : vector<256x256xf32>
    %23 = tpu.matmul %19, %22, %cst_7 {dimension_numbers = #tpu.dot_dimension_numbers<[1], [1], [0], [0], [0, 0, 1, 0], [], []>} : vector<256x128xbf16>, vector<256x128xbf16>, vector<256x256xf32> -> vector<256x256xf32>
    %cst_8 = arith.constant 1.000000e+01 : f32
    %24 = vector.broadcast %cst_8 : f32 to vector<256x256xf32>
    %25 = arith.mulf %23, %24 : vector<256x256xf32>
    %c256_i32 = arith.constant 256 : i32
    %26 = arith.muli %arg0, %c256_i32 : i32
    %27 = tpu.iota {dimensions = array<i32: 0>} : vector<256x256xi32>
    %28 = vector.broadcast %26 : i32 to vector<256x256xi32>
    %29 = arith.addi %28, %27 : vector<256x256xi32>
    %c256_i32_9 = arith.constant 256 : i32
    %30 = arith.muli %arg1, %c256_i32_9 : i32
    %31 = tpu.iota {dimensions = array<i32: 1>} : vector<256x256xi32>
    %32 = vector.broadcast %30 : i32 to vector<256x256xi32>
    %33 = arith.addi %32, %31 : vector<256x256xi32>
    %34 = arith.cmpi eq, %29, %33 : vector<256x256xi32>
    %c0_10 = arith.constant 0 : index
    %c0_11 = arith.constant 0 : index
    %35 = vector.load %arg4[%c0_10, %c0_11] : memref<256x1xi32, #tpu.memory_space<vmem>>, vector<256x1xi32>
    %c0_12 = arith.constant 0 : index
    %c0_13 = arith.constant 0 : index
    %36 = vector.load %arg5[%c0_12, %c0_13] : memref<1x256xi32, #tpu.memory_space<vmem>>, vector<1x256xi32>
    %37 = vector.broadcast %35 : vector<256x1xi32> to vector<256x256xi32>
    %38 = vector.broadcast %36 : vector<1x256xi32> to vector<256x256xi32>
    %39 = arith.cmpi eq, %37, %38 : vector<256x256xi32>
    %40 = arith.extui %39 : vector<256x256xi1> to vector<256x256xi32>
    %41 = arith.sitofp %40 : vector<256x256xi32> to vector<256x256xf32>
    %cst_14 = arith.constant 0.000000e+00 : f32
    %42 = vector.broadcast %cst_14 : f32 to vector<256x256xf32>
    %43 = arith.select %34, %42, %41 : vector<256x256xi1>, vector<256x256xf32>
    %cst_15 = arith.constant 1.000000e+09 : f32
    %44 = vector.broadcast %cst_15 : f32 to vector<256x256xf32>
    %45 = arith.subf %25, %44 : vector<256x256xf32>
    %46 = arith.select %34, %45, %25 : vector<256x256xi1>, vector<256x256xf32>
    %c0_16 = arith.constant 0 : index
    %c0_17 = arith.constant 0 : index
    %47 = vector.load %arg7[%c0_16, %c0_17] : memref<256x1xf32, #tpu.memory_space<vmem>>, vector<256x1xf32>
    %cst_18 = arith.constant dense<0xFF800000> : vector<256xf32>
    %48 = vector.multi_reduction <maximumf>, %46, %cst_18 [1] : vector<256x256xf32> to vector<256xf32>
    %49 = vector.shape_cast %48 : vector<256xf32> to vector<256x1xf32>
    %50 = arith.maximumf %47, %49 : vector<256x1xf32>
    %51 = arith.subf %47, %50 : vector<256x1xf32>
    %52 = math.exp %51 : vector<256x1xf32>
    %c0_19 = arith.constant 0 : index
    %c0_20 = arith.constant 0 : index
    %53 = vector.load %arg8[%c0_19, %c0_20] : memref<256x1xf32, #tpu.memory_space<vmem>>, vector<256x1xf32>
    %54 = arith.mulf %52, %53 : vector<256x1xf32>
    %55 = vector.broadcast %50 : vector<256x1xf32> to vector<256x256xf32>
    %56 = arith.subf %46, %55 : vector<256x256xf32>
    %57 = math.exp %56 : vector<256x256xf32>
    %cst_21 = arith.constant dense<0.000000e+00> : vector<256xf32>
    %58 = vector.multi_reduction <add>, %57, %cst_21 [1] : vector<256x256xf32> to vector<256xf32>
    %59 = vector.shape_cast %58 : vector<256xf32> to vector<256x1xf32>
    %60 = arith.addf %54, %59 : vector<256x1xf32>
    %c0_22 = arith.constant 0 : index
    %c0_23 = arith.constant 0 : index
    %61 = vector.load %arg8[%c0_22, %c0_23] : memref<256x1xf32, #tpu.memory_space<vmem>>, vector<256x1xf32>
    tpu.vector_store %arg8[%c0_22, %c0_23], %60 {strides = array<i32>} : memref<256x1xf32, #tpu.memory_space<vmem>>, vector<256x1xf32>,
    %c0_24 = arith.constant 0 : index
    %c0_25 = arith.constant 0 : index
    %62 = vector.load %arg7[%c0_24, %c0_25] : memref<256x1xf32, #tpu.memory_space<vmem>>, vector<256x1xf32>
    tpu.vector_store %arg7[%c0_24, %c0_25], %50 {strides = array<i32>} : memref<256x1xf32, #tpu.memory_space<vmem>>, vector<256x1xf32>,
    %c0_26 = arith.constant 0 : index
    %c0_27 = arith.constant 0 : index
    %63 = vector.load %arg9[%c0_26, %c0_27] : memref<256x1xf32, #tpu.memory_space<vmem>>, vector<256x1xf32>
    %64 = arith.mulf %43, %25 : vector<256x256xf32>
    %cst_28 = arith.constant dense<0.000000e+00> : vector<256xf32>
    %65 = vector.multi_reduction <add>, %64, %cst_28 [1] : vector<256x256xf32> to vector<256xf32>
    %66 = vector.shape_cast %65 : vector<256xf32> to vector<256x1xf32>
    %67 = arith.addf %63, %66 : vector<256x1xf32>
    %c0_29 = arith.constant 0 : index
    %c0_30 = arith.constant 0 : index
    %68 = vector.load %arg9[%c0_29, %c0_30] : memref<256x1xf32, #tpu.memory_space<vmem>>, vector<256x1xf32>
    tpu.vector_store %arg9[%c0_29, %c0_30], %67 {strides = array<i32>} : memref<256x1xf32, #tpu.memory_space<vmem>>, vector<256x1xf32>,
    %c0_31 = arith.constant 0 : index
    %c0_32 = arith.constant 0 : index
    %69 = vector.load %arg10[%c0_31, %c0_32] : memref<256x1xf32, #tpu.memory_space<vmem>>, vector<256x1xf32>
    %cst_33 = arith.constant dense<0.000000e+00> : vector<256xf32>
    %70 = vector.multi_reduction <add>, %43, %cst_33 [1] : vector<256x256xf32> to vector<256xf32>
    %71 = vector.shape_cast %70 : vector<256xf32> to vector<256x1xf32>
    %72 = arith.addf %69, %71 : vector<256x1xf32>
    %c0_34 = arith.constant 0 : index
    %c0_35 = arith.constant 0 : index
    %73 = vector.load %arg10[%c0_34, %c0_35] : memref<256x1xf32, #tpu.memory_space<vmem>>, vector<256x1xf32>
    tpu.vector_store %arg10[%c0_34, %c0_35], %72 {strides = array<i32>} : memref<256x1xf32, #tpu.memory_space<vmem>>, vector<256x1xf32>,
    %c1_i32 = arith.constant 1 : i32
    %74 = arith.cmpi eq, %arg1, %c1_i32 : i32
    %75 = arith.extui %74 : i1 to i32
    %c0_i32_36 = arith.constant 0 : i32
    %76 = arith.cmpi ne, %75, %c0_i32_36 : i32
    scf.if %76 {
      %c0_37 = arith.constant 0 : index
      %c0_38 = arith.constant 0 : index
      %77 = vector.load %arg7[%c0_37, %c0_38] : memref<256x1xf32, #tpu.memory_space<vmem>>, vector<256x1xf32>
      %c0_39 = arith.constant 0 : index
      %c0_40 = arith.constant 0 : index
      %78 = vector.load %arg8[%c0_39, %c0_40] : memref<256x1xf32, #tpu.memory_space<vmem>>, vector<256x1xf32>
      %79 = math.log %78 : vector<256x1xf32>
      %80 = arith.addf %77, %79 : vector<256x1xf32>
      %c0_41 = arith.constant 0 : index
      %c0_42 = arith.constant 0 : index
      %81 = vector.load %arg10[%c0_41, %c0_42] : memref<256x1xf32, #tpu.memory_space<vmem>>, vector<256x1xf32>
      %cst_43 = arith.constant 1.000000e+00 : f32
      %82 = vector.broadcast %cst_43 : f32 to vector<256x1xf32>
      %83 = arith.maximumf %81, %82 : vector<256x1xf32>
      %84 = arith.mulf %81, %80 : vector<256x1xf32>
      %c0_44 = arith.constant 0 : index
      %c0_45 = arith.constant 0 : index
      %85 = vector.load %arg9[%c0_44, %c0_45] : memref<256x1xf32, #tpu.memory_space<vmem>>, vector<256x1xf32>
      %86 = arith.subf %84, %85 : vector<256x1xf32>
      %87 = arith.divf %86, %83 : vector<256x1xf32>
      %c0_46 = arith.constant 0 : index
      %c0_47 = arith.constant 0 : index
      %88 = vector.load %arg6[%c0_46, %c0_47] : memref<256x1xf32, #tpu.memory_space<vmem>>, vector<256x1xf32>
      tpu.vector_store %arg6[%c0_46, %c0_47], %87 {strides = array<i32>} : memref<256x1xf32, #tpu.memory_space<vmem>>, vector<256x1xf32>,
    } else {
    }
    return
  }
  func.func @transform_0(%arg0: i32, %arg1: i32) -> (i32, i32) {
    %c0_i32 = arith.constant 0 : i32
    %c0_i32_0 = arith.constant 0 : i32
    return %arg0, %c0_i32 : i32, i32
  }
  func.func @transform_1(%arg0: i32, %arg1: i32) -> (i32, i32) {
    %c0_i32 = arith.constant 0 : i32
    %c0_i32_0 = arith.constant 0 : i32
    return %arg1, %c0_i32 : i32, i32
  }
  func.func @transform_2(%arg0: i32, %arg1: i32) -> (i32, i32) {
    %c0_i32 = arith.constant 0 : i32
    %c0_i32_0 = arith.constant 0 : i32
    return %arg0, %c0_i32 : i32, i32
  }
  func.func @transform_3(%arg0: i32, %arg1: i32) -> (i32, i32) {
    %c0_i32 = arith.constant 0 : i32
    %c0_i32_0 = arith.constant 0 : i32
    return %c0_i32, %arg1 : i32, i32
  }
  func.func @transform_4(%arg0: i32, %arg1: i32) -> (i32, i32) {
    %c0_i32 = arith.constant 0 : i32
    %c0_i32_0 = arith.constant 0 : i32
    return %arg0, %c0_i32 : i32, i32
  }
}

</mosaic_0001>

<bundles_post_ra>
// kernel: tpu_custom_call.1
= control target key start
LH: loop header
LB: loop body
LE: loop exit
PB: predicated region body
PF: predicated region fallthrough
CT: control target
= control target key end

     0   :  { %9 = vsyncpa [#allocation7], 0  ;;  %s7600_s0 = inlined_call_operand.vmem [shape: f32[512,128], index: 0, kind: input, shape index: {}]   ;;  %s7601_s1 = inlined_call_operand.hbm [shape: f32[512,128], index: 1, kind: input, shape index: {}]   ;;  %s7602_s2 = inlined_call_operand.vmem [shape: s32[512,1], index: 2, kind: input, shape index: {}]   ;;  %s7603_s3 = inlined_call_operand.vmem [shape: s32[1,512], index: 3, kind: input, shape index: {}]   ;;  %s7604_s4 = inlined_call_operand.vmem [shape: f32[512,1], index: 4, kind: output, shape index: {}]  }
   0x1   :  { %11 = vsyncpa [#allocation7 + $0x1], 0  ;;  %s4548_s15 = smov 0   ;;  %s4550_s16 = smov 0  }
   0x2   :  { %s4552_s17 = smov 0   ;;  %s4554_s18 = smov 0  }
   0x3   :  { %s4556_s19 = smov 0   ;;  %s4558_s20 = smov 0  }
   0x4   :  { %s4560_s21 = smov 0   ;;  %s4562_s22 = smov 0  }
   0x5 LB: > { %s3670_s23 = sadd.s32 4294967295, %s4514_s22   ;;  %s26_s24 = sadd.s32 1, %s4506_s20  ;;  %s4514_s22 = sphi %s4562_s22, %s17_s22   ;;  %s4510_s21 = sphi %s4560_s21, %s8384_s21   ;;  %s4506_s20 = sphi %s4558_s20, %s8383_s20   ;;  %s4502_s19 = sphi %s4556_s19, %s8382_s19   ;;  %s4498_s18 = sphi %s4554_s18, %s8381_s18   ;;  %s4494_s17 = sphi %s4552_s17, %s8380_s17   ;;  %s4490_s16 = sphi %s4550_s16, %s8379_s16   ;;  %s4486_s15 = sphi %s4548_s15, %s8378_s15  }
   0x6   : > { %p27_p0 = scmp.ge.s32.totalorder %s26_s24, 2  ;;  %s29_s25 = sadd.s32 1, %s4510_s21 }
   0x7   : > { %s62_s26 = sadd.s32 1, %s4494_s17  ;;  %p69_p1 = scmp.ne.s32.totalorder %s4494_s17, %s4490_s16 }
   0x8   : > { %s8386_s24 = smov (%p27_p0, %s26_s24), 0  ;;  %s8388_s25 = smov (!%p27_p0, %s29_s25), %s4510_s21 }
   0x9   : > { %s59_s27 = ssub.s32 %s4506_s20, %s8386_s24  ;;  %p70_p2 = scmp.eq.s32.totalorder %s4514_s22, 0 }
   0xa   : > { %p31_p3 = scmp.ge.s32.totalorder %s8388_s25, 2  ;;  %p60_p4 = scmp.eq.s32.totalorder %s59_s27, 0 }
   0xb   : > { %p4598_p5 = por %p70_p2, %p69_p1  ;;  %p75_p6 = scmp.ne.s32.totalorder %s4490_s16, %s4486_s15 }
   0xc   : > { %s8390_s25 = smov (%p31_p3, %s8388_s25), 0  ;;  %p76_p7 = scmp.eq.s32.totalorder %s3670_s23, 0 }
   0xd   : > { %s4606_s29 = scalar_select %p60_p4, %s4494_s17, %s62_s26  }
   0xe   : > { %p3891_p8 = scmp.lt.s32.totalorder %s4514_s22, 4  ;;  %s186_s30 = sand.u32 1, %s4494_s17  }
   0xf   : > { %p4610_p9 = por %p76_p7, %p75_p6  ;;  %s3674_s6 = sshll.u32 %s186_s30, 8 }
  0x10   : > { %s3820_s7 = sshll.u32 %s4506_s20, 12  ;;  %s190_s11 = scalar_lea.vmem [#allocation6], %s3674_s6 }
  0x11   : > { %s196_s10 = scalar_lea.hbm %s7601_s1, %s3820_s7  ;;  %s197_s12 = sshll.u32 %s190_s11, 4  ;;  %s198_s12 = int_to_ptr.vmem [resolvable:$true] %s197_s12 }
  0x12   : > { %p4620_p10 = pnand %p3891_p8, %p4598_p5  ;;  %s187_s14 = scalar_lea.sflag [#allocation7], %s186_s30 }
  0x13   : > { %s4433_s15 = scalar_lea.vmem %s198_s12, 4096  ;;  %s4516_s23 = smov [#allocation6]  }
  0x14   : > { %p4422_p11 = pneg %p4620_p10  ;;  %p4434_p12 = scmp.ne.s32.totalorder %s198_s12, %s4433_s15 }
  0x15   : > { %s4438_s26 = sshll.u32 %s4516_s23, 4  ;;  %s4439_s26 = int_to_ptr.vmem [resolvable:$false] %s4438_s26 }
  0x16   : > { %p4436_p13 = pnand %p4434_p12, %p4422_p11  ;;  %s4440_s27 = scalar_lea.vmem %s4439_s26, 8192 }
  0x17   : > { %p4441_p1 = scmp.lt.s32.totalorder %s198_s12, %s4439_s26  ;;  %p4442_p2 = scmp.lt.s32.totalorder %s4440_s27, %s4433_s15 }
  0x18   : > { %p4437_p0 = pneg %p4436_p13 }
  0x19   : > { %p4443_p3 = por %p4442_p2, %p4441_p1 }
  0x1b   : > { %p4444_p4 = pnand %p4443_p3, %p4437_p0 }
  0x1d   : > { %4447 = shalt.err (!%p4444_p4)
}
  0x1e   : > { %s4517_s28 = smov 128   ;;  %s4518_s30 = smov 8  }
  0x1f   : > { %3890 = dma.hbm_to_vmem [thread:$0]  (!%p4620_p10), %s196_s10, 4096, %s198_s12, %s187_s14, %s4517_s28, %s4517_s28, %s4518_s30  }
  0x20   : > { %p3677_p5 = scmp.ge.s32.totalorder %s4514_s22, 1  ;;  %p222_p6 = scmp.lt.s32.totalorder %s4514_s22, 5 }
  0x22   : > { %p223_p7 = pnand %p3677_p5, %p222_p6 }
  0x24   : > { %226 = sbr.rel (%p223_p7) target bundleno = 1273 (0x4f9), region = 36 }
  0x29   : > { %s228_s6 = sand.u32 1, %s4490_s16  }
  0x2a   : > { %s3678_s7 = sshll.u32 %s228_s6, 8  ;;  %s229_s8 = scalar_lea.sflag [#allocation7], %s228_s6 }
  0x2b   : > { %s4631_s9 = scalar_lea.vmem [#allocation6], %s3678_s7 }
  0x2c   : > { %4481 = dma.done.wait (%p4610_p9), %s229_s8, 4096  }
  0x2d   : > { %4483 = vsyncadd (%p4610_p9), %s229_s8, 4294963200  ;;  %s3679_s11 = sshll.u32 %s4502_s19, 5  ;;  %s3683_s10 = sshll.u32 %s4498_s18, 1 }
  0x2e   : > { %p272_p8 = scmp.lt.s32.totalorder %s3679_s11, 63  ;;  %p285_p10 = scmp.lt.s32.totalorder %s3683_s10, 3 }
  0x2f   : > { %p3686_p9 = scmp.ne.s32.totalorder %s4498_s18, 0 }
  0x30   : > { %s8392_s11 = smov (!%p272_p8, %s3679_s11), 63  ;;  %s8394_s10 = smov (!%p285_p10, %s3683_s10), 3 }
  0x31   : > { %s3680_s12 = sshll.u32 %s8392_s11, 3  ;;  %s287_s30 = scalar_lea.vmem %s7603_s3, %s8394_s10 }
  0x32   : > { %s4644_s15 = scalar_lea.vmem %s7600_s0, %s3680_s12  ;;  %s4649_s5 = scalar_lea.vmem %s7602_s2, %s3680_s12 }
  0x33   : > { %s4658_s8 = scalar_lea.vmem %s7604_s4, %s3680_s12  ;;  %299 = sbr.rel (%p3686_p9) target bundleno = 121 (0x79), region = 44 }
  0x38   : > { %vm300_vm0 = vcmask 7168   ;;  %v4519_v0 = vmov -inf   ;;  %v4520_v1 = vmov 0.0  }
  0x39   : > { %301 = vst.msk [vmem:[#allocation2] sm:$0xff] %vm300_vm0, %v4519_v0  ;;  %302 = vst.msk [vmem:[#allocation2 + $0x8] sm:$0xff] %vm300_vm0, %v4519_v0 }
  0x3a   : > { %303 = vst.msk [vmem:[#allocation2 + $0x10] sm:$0xff] %vm300_vm0, %v4519_v0  ;;  %304 = vst.msk [vmem:[#allocation2 + $0x18] sm:$0xff] %vm300_vm0, %v4519_v0 }
  0x3b   : > { %305 = vst.msk [vmem:[#allocation2 + $0x20] sm:$0xff] %vm300_vm0, %v4519_v0  ;;  %306 = vst.msk [vmem:[#allocation2 + $0x28] sm:$0xff] %vm300_vm0, %v4519_v0 }
  0x3c   : > { %307 = vst.msk [vmem:[#allocation2 + $0x30] sm:$0xff] %vm300_vm0, %v4519_v0  ;;  %308 = vst.msk [vmem:[#allocation2 + $0x38] sm:$0xff] %vm300_vm0, %v4519_v0 }
  0x3d   : > { %309 = vst.msk [vmem:[#allocation2 + $0x40] sm:$0xff] %vm300_vm0, %v4519_v0  ;;  %310 = vst.msk [vmem:[#allocation2 + $0x48] sm:$0xff] %vm300_vm0, %v4519_v0 }
  0x3e   : > { %311 = vst.msk [vmem:[#allocation2 + $0x50] sm:$0xff] %vm300_vm0, %v4519_v0  ;;  %312 = vst.msk [vmem:[#allocation2 + $0x58] sm:$0xff] %vm300_vm0, %v4519_v0 }
  0x3f   : > { %313 = vst.msk [vmem:[#allocation2 + $0x60] sm:$0xff] %vm300_vm0, %v4519_v0  ;;  %314 = vst.msk [vmem:[#allocation2 + $0x68] sm:$0xff] %vm300_vm0, %v4519_v0 }
  0x40   : > { %315 = vst.msk [vmem:[#allocation2 + $0x70] sm:$0xff] %vm300_vm0, %v4519_v0  ;;  %316 = vst.msk [vmem:[#allocation2 + $0x78] sm:$0xff] %vm300_vm0, %v4519_v0 }
  0x41   : > { %317 = vst.msk [vmem:[#allocation2 + $0x80] sm:$0xff] %vm300_vm0, %v4519_v0  ;;  %318 = vst.msk [vmem:[#allocation2 + $0x88] sm:$0xff] %vm300_vm0, %v4519_v0 }
  0x42   : > { %319 = vst.msk [vmem:[#allocation2 + $0x90] sm:$0xff] %vm300_vm0, %v4519_v0  ;;  %320 = vst.msk [vmem:[#allocation2 + $0x98] sm:$0xff] %vm300_vm0, %v4519_v0 }
  0x43   : > { %321 = vst.msk [vmem:[#allocation2 + $0xa0] sm:$0xff] %vm300_vm0, %v4519_v0  ;;  %322 = vst.msk [vmem:[#allocation2 + $0xa8] sm:$0xff] %vm300_vm0, %v4519_v0 }
  0x44   : > { %323 = vst.msk [vmem:[#allocation2 + $0xb0] sm:$0xff] %vm300_vm0, %v4519_v0  ;;  %324 = vst.msk [vmem:[#allocation2 + $0xb8] sm:$0xff] %vm300_vm0, %v4519_v0 }
  0x45   : > { %325 = vst.msk [vmem:[#allocation2 + $0xc0] sm:$0xff] %vm300_vm0, %v4519_v0  ;;  %326 = vst.msk [vmem:[#allocation2 + $0xc8] sm:$0xff] %vm300_vm0, %v4519_v0 }
  0x46   : > { %327 = vst.msk [vmem:[#allocation2 + $0xd0] sm:$0xff] %vm300_vm0, %v4519_v0  ;;  %328 = vst.msk [vmem:[#allocation2 + $0xd8] sm:$0xff] %vm300_vm0, %v4519_v0 }
  0x47   : > { %329 = vst.msk [vmem:[#allocation2 + $0xe0] sm:$0xff] %vm300_vm0, %v4519_v0  ;;  %330 = vst.msk [vmem:[#allocation2 + $0xe8] sm:$0xff] %vm300_vm0, %v4519_v0 }
  0x48   : > { %331 = vst.msk [vmem:[#allocation2 + $0xf0] sm:$0xff] %vm300_vm0, %v4519_v0  ;;  %332 = vst.msk [vmem:[#allocation2 + $0xf8] sm:$0xff] %vm300_vm0, %v4519_v0 }
  0x49   : > { %333 = vst.msk [vmem:[#allocation3] sm:$0xff] %vm300_vm0, %v4520_v1  ;;  %334 = vst.msk [vmem:[#allocation3 + $0x8] sm:$0xff] %vm300_vm0, %v4520_v1 }
  0x4a   : > { %335 = vst.msk [vmem:[#allocation3 + $0x10] sm:$0xff] %vm300_vm0, %v4520_v1  ;;  %336 = vst.msk [vmem:[#allocation3 + $0x18] sm:$0xff] %vm300_vm0, %v4520_v1 }
  0x4b   : > { %337 = vst.msk [vmem:[#allocation3 + $0x20] sm:$0xff] %vm300_vm0, %v4520_v1  ;;  %338 = vst.msk [vmem:[#allocation3 + $0x28] sm:$0xff] %vm300_vm0, %v4520_v1 }
  0x4c   : > { %339 = vst.msk [vmem:[#allocation3 + $0x30] sm:$0xff] %vm300_vm0, %v4520_v1  ;;  %340 = vst.msk [vmem:[#allocation3 + $0x38] sm:$0xff] %vm300_vm0, %v4520_v1 }
  0x4d   : > { %341 = vst.msk [vmem:[#allocation3 + $0x40] sm:$0xff] %vm300_vm0, %v4520_v1  ;;  %342 = vst.msk [vmem:[#allocation3 + $0x48] sm:$0xff] %vm300_vm0, %v4520_v1 }
  0x4e   : > { %343 = vst.msk [vmem:[#allocation3 + $0x50] sm:$0xff] %vm300_vm0, %v4520_v1  ;;  %344 = vst.msk [vmem:[#allocation3 + $0x58] sm:$0xff] %vm300_vm0, %v4520_v1 }
  0x4f   : > { %345 = vst.msk [vmem:[#allocation3 + $0x60] sm:$0xff] %vm300_vm0, %v4520_v1  ;;  %346 = vst.msk [vmem:[#allocation3 + $0x68] sm:$0xff] %vm300_vm0, %v4520_v1 }
  0x50   : > { %347 = vst.msk [vmem:[#allocation3 + $0x70] sm:$0xff] %vm300_vm0, %v4520_v1  ;;  %348 = vst.msk [vmem:[#allocation3 + $0x78] sm:$0xff] %vm300_vm0, %v4520_v1 }
  0x51   : > { %349 = vst.msk [vmem:[#allocation3 + $0x80] sm:$0xff] %vm300_vm0, %v4520_v1  ;;  %350 = vst.msk [vmem:[#allocation3 + $0x88] sm:$0xff] %vm300_vm0, %v4520_v1 }
  0x52   : > { %351 = vst.msk [vmem:[#allocation3 + $0x90] sm:$0xff] %vm300_vm0, %v4520_v1  ;;  %352 = vst.msk [vmem:[#allocation3 + $0x98] sm:$0xff] %vm300_vm0, %v4520_v1 }
  0x53   : > { %353 = vst.msk [vmem:[#allocation3 + $0xa0] sm:$0xff] %vm300_vm0, %v4520_v1  ;;  %354 = vst.msk [vmem:[#allocation3 + $0xa8] sm:$0xff] %vm300_vm0, %v4520_v1 }
  0x54   : > { %355 = vst.msk [vmem:[#allocation3 + $0xb0] sm:$0xff] %vm300_vm0, %v4520_v1  ;;  %356 = vst.msk [vmem:[#allocation3 + $0xb8] sm:$0xff] %vm300_vm0, %v4520_v1 }
  0x55   : > { %357 = vst.msk [vmem:[#allocation3 + $0xc0] sm:$0xff] %vm300_vm0, %v4520_v1  ;;  %358 = vst.msk [vmem:[#allocation3 + $0xc8] sm:$0xff] %vm300_vm0, %v4520_v1 }
  0x56   : > { %359 = vst.msk [vmem:[#allocation3 + $0xd0] sm:$0xff] %vm300_vm0, %v4520_v1  ;;  %360 = vst.msk [vmem:[#allocation3 + $0xd8] sm:$0xff] %vm300_vm0, %v4520_v1 }
  0x57   : > { %361 = vst.msk [vmem:[#allocation3 + $0xe0] sm:$0xff] %vm300_vm0, %v4520_v1  ;;  %362 = vst.msk [vmem:[#allocation3 + $0xe8] sm:$0xff] %vm300_vm0, %v4520_v1 }
  0x58   : > { %363 = vst.msk [vmem:[#allocation3 + $0xf0] sm:$0xff] %vm300_vm0, %v4520_v1  ;;  %364 = vst.msk [vmem:[#allocation3 + $0xf8] sm:$0xff] %vm300_vm0, %v4520_v1 }
  0x59   : > { %365 = vst.msk [vmem:[#allocation4] sm:$0xff] %vm300_vm0, %v4520_v1  ;;  %366 = vst.msk [vmem:[#allocation4 + $0x8] sm:$0xff] %vm300_vm0, %v4520_v1 }
  0x5a   : > { %367 = vst.msk [vmem:[#allocation4 + $0x10] sm:$0xff] %vm300_vm0, %v4520_v1  ;;  %368 = vst.msk [vmem:[#allocation4 + $0x18] sm:$0xff] %vm300_vm0, %v4520_v1 }
  0x5b   : > { %369 = vst.msk [vmem:[#allocation4 + $0x20] sm:$0xff] %vm300_vm0, %v4520_v1  ;;  %370 = vst.msk [vmem:[#allocation4 + $0x28] sm:$0xff] %vm300_vm0, %v4520_v1 }
  0x5c   : > { %371 = vst.msk [vmem:[#allocation4 + $0x30] sm:$0xff] %vm300_vm0, %v4520_v1  ;;  %372 = vst.msk [vmem:[#allocation4 + $0x38] sm:$0xff] %vm300_vm0, %v4520_v1 }
  0x5d   : > { %373 = vst.msk [vmem:[#allocation4 + $0x40] sm:$0xff] %vm300_vm0, %v4520_v1  ;;  %374 = vst.msk [vmem:[#allocation4 + $0x48] sm:$0xff] %vm300_vm0, %v4520_v1 }
  0x5e   : > { %375 = vst.msk [vmem:[#allocation4 + $0x50] sm:$0xff] %vm300_vm0, %v4520_v1  ;;  %376 = vst.msk [vmem:[#allocation4 + $0x58] sm:$0xff] %vm300_vm0, %v4520_v1 }
  0x5f   : > { %377 = vst.msk [vmem:[#allocation4 + $0x60] sm:$0xff] %vm300_vm0, %v4520_v1  ;;  %378 = vst.msk [vmem:[#allocation4 + $0x68] sm:$0xff] %vm300_vm0, %v4520_v1 }
  0x60   : > { %379 = vst.msk [vmem:[#allocation4 + $0x70] sm:$0xff] %vm300_vm0, %v4520_v1  ;;  %380 = vst.msk [vmem:[#allocation4 + $0x78] sm:$0xff] %vm300_vm0, %v4520_v1 }
  0x61   : > { %381 = vst.msk [vmem:[#allocation4 + $0x80] sm:$0xff] %vm300_vm0, %v4520_v1  ;;  %382 = vst.msk [vmem:[#allocation4 + $0x88] sm:$0xff] %vm300_vm0, %v4520_v1 }
  0x62   : > { %383 = vst.msk [vmem:[#allocation4 + $0x90] sm:$0xff] %vm300_vm0, %v4520_v1  ;;  %384 = vst.msk [vmem:[#allocation4 + $0x98] sm:$0xff] %vm300_vm0, %v4520_v1 }
  0x63   : > { %385 = vst.msk [vmem:[#allocation4 + $0xa0] sm:$0xff] %vm300_vm0, %v4520_v1  ;;  %386 = vst.msk [vmem:[#allocation4 + $0xa8] sm:$0xff] %vm300_vm0, %v4520_v1 }
  0x64   : > { %387 = vst.msk [vmem:[#allocation4 + $0xb0] sm:$0xff] %vm300_vm0, %v4520_v1  ;;  %388 = vst.msk [vmem:[#allocation4 + $0xb8] sm:$0xff] %vm300_vm0, %v4520_v1 }
  0x65   : > { %389 = vst.msk [vmem:[#allocation4 + $0xc0] sm:$0xff] %vm300_vm0, %v4520_v1  ;;  %390 = vst.msk [vmem:[#allocation4 + $0xc8] sm:$0xff] %vm300_vm0, %v4520_v1 }
  0x66   : > { %391 = vst.msk [vmem:[#allocation4 + $0xd0] sm:$0xff] %vm300_vm0, %v4520_v1  ;;  %392 = vst.msk [vmem:[#allocation4 + $0xd8] sm:$0xff] %vm300_vm0, %v4520_v1 }
  0x67   : > { %393 = vst.msk [vmem:[#allocation4 + $0xe0] sm:$0xff] %vm300_vm0, %v4520_v1  ;;  %394 = vst.msk [vmem:[#allocation4 + $0xe8] sm:$0xff] %vm300_vm0, %v4520_v1 }
  0x68   : > { %395 = vst.msk [vmem:[#allocation4 + $0xf0] sm:$0xff] %vm300_vm0, %v4520_v1  ;;  %396 = vst.msk [vmem:[#allocation4 + $0xf8] sm:$0xff] %vm300_vm0, %v4520_v1 }
  0x69   : > { %397 = vst.msk [vmem:[#allocation5] sm:$0xff] %vm300_vm0, %v4520_v1  ;;  %398 = vst.msk [vmem:[#allocation5 + $0x8] sm:$0xff] %vm300_vm0, %v4520_v1 }
  0x6a   : > { %399 = vst.msk [vmem:[#allocation5 + $0x10] sm:$0xff] %vm300_vm0, %v4520_v1  ;;  %400 = vst.msk [vmem:[#allocation5 + $0x18] sm:$0xff] %vm300_vm0, %v4520_v1 }
  0x6b   : > { %401 = vst.msk [vmem:[#allocation5 + $0x20] sm:$0xff] %vm300_vm0, %v4520_v1  ;;  %402 = vst.msk [vmem:[#allocation5 + $0x28] sm:$0xff] %vm300_vm0, %v4520_v1 }
  0x6c   : > { %403 = vst.msk [vmem:[#allocation5 + $0x30] sm:$0xff] %vm300_vm0, %v4520_v1  ;;  %404 = vst.msk [vmem:[#allocation5 + $0x38] sm:$0xff] %vm300_vm0, %v4520_v1 }
  0x6d   : > { %405 = vst.msk [vmem:[#allocation5 + $0x40] sm:$0xff] %vm300_vm0, %v4520_v1  ;;  %406 = vst.msk [vmem:[#allocation5 + $0x48] sm:$0xff] %vm300_vm0, %v4520_v1 }
  0x6e   : > { %407 = vst.msk [vmem:[#allocation5 + $0x50] sm:$0xff] %vm300_vm0, %v4520_v1  ;;  %408 = vst.msk [vmem:[#allocation5 + $0x58] sm:$0xff] %vm300_vm0, %v4520_v1 }
  0x6f   : > { %409 = vst.msk [vmem:[#allocation5 + $0x60] sm:$0xff] %vm300_vm0, %v4520_v1  ;;  %410 = vst.msk [vmem:[#allocation5 + $0x68] sm:$0xff] %vm300_vm0, %v4520_v1 }
  0x70   : > { %411 = vst.msk [vmem:[#allocation5 + $0x70] sm:$0xff] %vm300_vm0, %v4520_v1  ;;  %412 = vst.msk [vmem:[#allocation5 + $0x78] sm:$0xff] %vm300_vm0, %v4520_v1 }
  0x71   : > { %413 = vst.msk [vmem:[#allocation5 + $0x80] sm:$0xff] %vm300_vm0, %v4520_v1  ;;  %414 = vst.msk [vmem:[#allocation5 + $0x88] sm:$0xff] %vm300_vm0, %v4520_v1 }
  0x72   : > { %415 = vst.msk [vmem:[#allocation5 + $0x90] sm:$0xff] %vm300_vm0, %v4520_v1  ;;  %416 = vst.msk [vmem:[#allocation5 + $0x98] sm:$0xff] %vm300_vm0, %v4520_v1 }
  0x73   : > { %417 = vst.msk [vmem:[#allocation5 + $0xa0] sm:$0xff] %vm300_vm0, %v4520_v1  ;;  %418 = vst.msk [vmem:[#allocation5 + $0xa8] sm:$0xff] %vm300_vm0, %v4520_v1 }
  0x74   : > { %419 = vst.msk [vmem:[#allocation5 + $0xb0] sm:$0xff] %vm300_vm0, %v4520_v1  ;;  %420 = vst.msk [vmem:[#allocation5 + $0xb8] sm:$0xff] %vm300_vm0, %v4520_v1 }
  0x75   : > { %421 = vst.msk [vmem:[#allocation5 + $0xc0] sm:$0xff] %vm300_vm0, %v4520_v1  ;;  %422 = vst.msk [vmem:[#allocation5 + $0xc8] sm:$0xff] %vm300_vm0, %v4520_v1 }
  0x76   : > { %423 = vst.msk [vmem:[#allocation5 + $0xd0] sm:$0xff] %vm300_vm0, %v4520_v1  ;;  %424 = vst.msk [vmem:[#allocation5 + $0xd8] sm:$0xff] %vm300_vm0, %v4520_v1 }
  0x77   : > { %425 = vst.msk [vmem:[#allocation5 + $0xe0] sm:$0xff] %vm300_vm0, %v4520_v1  ;;  %426 = vst.msk [vmem:[#allocation5 + $0xe8] sm:$0xff] %vm300_vm0, %v4520_v1 }
  0x78   : > { %427 = vst.msk [vmem:[#allocation5 + $0xf0] sm:$0xff] %vm300_vm0, %v4520_v1  ;;  %428 = vst.msk [vmem:[#allocation5 + $0xf8] sm:$0xff] %vm300_vm0, %v4520_v1 }
  0x79 PF: > { %v4886_v2 = vld [vmem:[%s4644_s15 + $0x10] sm:$0xff]  ;;  %v4889_v3 = vld [vmem:[%s4644_s15] sm:$0xff]  ;;  %v4892_v4 = vld [vmem:[%s4644_s15 + $0x18] sm:$0xff]  ;;  %s3687_s11 = sshll.u32 %s4502_s19, 8  ;;  %s3688_s12 = sshll.u32 %s4498_s18, 8 }
  0x7a   : > { %v495_v5 = vmul.f32 %v4886_v2, %v4886_v2  ;;  %v493_v6 = vmul.f32 %v4889_v3, %v4889_v3  ;;  %v4899_v7 = vld [vmem:[%s4644_s15 + $0x8] sm:$0xff]  ;;  %v496_v8 = vmul.f32 %v4892_v4, %v4892_v4  ;;  %v4909_v11 = vld [vmem:[%s4644_s15 + $0x20] sm:$0xff]  ;;  %v4916_v14 = vld [vmem:[%s4644_s15 + $0x38] sm:$0xff]  ;;  %p3817_p11 = scmp.ne.s32.totalorder %s4498_s18, 1 }
  0x7b   : > { %v494_v9 = vmul.f32 %v4899_v7, %v4899_v7  ;;  %v4906_v10 = vld [vmem:[%s4644_s15 + $0x28] sm:$0xff]  ;;  %v497_v13 = vmul.f32 %v4909_v11, %v4909_v11  ;;  %v4919_v15 = vld [vmem:[%s4644_s15 + $0x30] sm:$0xff]  ;;  %v500_v16 = vmul.f32 %v4916_v14, %v4916_v14  ;;  %v4929_v19 = vld [vmem:[%s4644_s15 + $0x40] sm:$0xff] }
  0x7c   : > { %529 = vadd.xlane.f32.xlu1 %v495_v5  ;;  %525 = vadd.xlane.f32.xlu0 %v493_v6  ;;  %v498_v12 = vmul.f32 %v4906_v10, %v4906_v10  ;;  %v499_v17 = vmul.f32 %v4919_v15, %v4919_v15  ;;  %v4926_v18 = vld [vmem:[%s4644_s15 + $0x48] sm:$0xff]  ;;  %v501_v21 = vmul.f32 %v4929_v19, %v4929_v19  ;;  %v4936_v22 = vld [vmem:[%s4644_s15 + $0x58] sm:$0xff]  ;;  %v4939_v23 = vld [vmem:[%s4644_s15 + $0x50] sm:$0xff] }
  0x7d   : > { %v502_v20 = vmul.f32 %v4926_v18, %v4926_v18  ;;  %v504_v24 = vmul.f32 %v4936_v22, %v4936_v22  ;;  %v503_v25 = vmul.f32 %v4939_v23, %v4939_v23  ;;  %v4946_v26 = vld [vmem:[%s4644_s15 + $0x68] sm:$0xff]  ;;  %v4949_v27 = vld [vmem:[%s4644_s15 + $0x60] sm:$0xff]  ;;  %v444_v30 = vld [vmem:[%s4644_s15 + $0x78] sm:$0xff] }
  0x7e   : > { %v506_v28 = vmul.f32 %v4946_v26, %v4946_v26  ;;  %v505_v29 = vmul.f32 %v4949_v27, %v4949_v27  ;;  %v443_v31 = vld [vmem:[%s4644_s15 + $0x70] sm:$0xff]  ;;  %v508_v32 = vmul.f32 %v444_v30, %v444_v30  ;;  %v4958_v34 = vld [vmem:[%s4644_s15 + $0x88] sm:$0xff]  ;;  %v4961_v35 = vld [vmem:[%s4644_s15 + $0x80] sm:$0xff] }
  0x7f   : > { %v507_v33 = vmul.f32 %v443_v31, %v443_v31  ;;  %v510_v36 = vmul.f32 %v4958_v34, %v4958_v34  ;;  %v509_v37 = vmul.f32 %v4961_v35, %v4961_v35  ;;  %v4968_v38 = vld [vmem:[%s4644_s15 + $0x98] sm:$0xff]  ;;  %v4971_v39 = vld [vmem:[%s4644_s15 + $0x90] sm:$0xff]  ;;  %v4978_v42 = vld [vmem:[%s4644_s15 + $0xa8] sm:$0xff] }
  0x80   : > { %531 = vadd.xlane.f32.xlu1 %v496_v8  ;;  %527 = vadd.xlane.f32.xlu0 %v494_v9  ;;  %v512_v40 = vmul.f32 %v4968_v38, %v4968_v38  ;;  %v511_v41 = vmul.f32 %v4971_v39, %v4971_v39  ;;  %7840 = vst [vmem:[#allocation9_spill] sm:$0xff] %v4978_v42  ;;  %v4981_v43 = vld [vmem:[%s4644_s15 + $0xa0] sm:$0xff]  ;;  %v4988_v46 = vld [vmem:[%s4644_s15 + $0xb8] sm:$0xff]  ;;  %v4991_v47 = vld [vmem:[%s4644_s15 + $0xb0] sm:$0xff] }
  0x81   : > { %7841 = vst [vmem:[#allocation10_spill] sm:$0xff] %v4981_v43  ;;  %v514_v44 = vmul.f32 %v4978_v42, %v4978_v42  ;;  %v513_v45 = vmul.f32 %v4981_v43, %v4981_v43  ;;  %7842 = vst [vmem:[#allocation11_spill] sm:$0xff] %v4988_v46  ;;  %v516_v48 = vmul.f32 %v4988_v46, %v4988_v46  ;;  %v4998_v50 = vld [vmem:[%s4644_s15 + $0xc8] sm:$0xff]  ;;  %v5001_v51 = vld [vmem:[%s4644_s15 + $0xc0] sm:$0xff] }
  0x82   : > { %7843 = vst [vmem:[#allocation12_spill] sm:$0xff] %v4991_v47  ;;  %v515_v49 = vmul.f32 %v4991_v47, %v4991_v47  ;;  %7844 = vst [vmem:[#allocation13_spill] sm:$0xff] %v4998_v50  ;;  %v518_v52 = vmul.f32 %v4998_v50, %v4998_v50  ;;  %v517_v53 = vmul.f32 %v5001_v51, %v5001_v51  ;;  %v5008_v54 = vld [vmem:[%s4644_s15 + $0xd8] sm:$0xff]  ;;  %v5011_v55 = vld [vmem:[%s4644_s15 + $0xd0] sm:$0xff] }
  0x83   : > { %7845 = vst [vmem:[#allocation14_spill] sm:$0xff] %v5001_v51  ;;  %7846 = vst [vmem:[#allocation15_spill] sm:$0xff] %v5008_v54  ;;  %v520_v56 = vmul.f32 %v5008_v54, %v5008_v54  ;;  %v519_v57 = vmul.f32 %v5011_v55, %v5011_v55  ;;  %v5018_v58 = vld [vmem:[%s4644_s15 + $0xe8] sm:$0xff]  ;;  %v457_v59 = vld [vmem:[%s4644_s15 + $0xe0] sm:$0xff] }
  0x84   : > { %535 = vadd.xlane.f32.xlu1 %v498_v12  ;;  %533 = vadd.xlane.f32.xlu0 %v497_v13  ;;  %7847 = vst [vmem:[#allocation16_spill] sm:$0xff] %v5011_v55  ;;  %7848 = vst [vmem:[#allocation17_spill] sm:$0xff] %v5018_v58  ;;  %v522_v60 = vmul.f32 %v5018_v58, %v5018_v58  ;;  %v521_v61 = vmul.f32 %v457_v59, %v457_v59  ;;  %v5024_v62 = vld [vmem:[%s4631_s9 + $0xf0] sm:$0xff]  ;;  %v5033_v6 = vld [vmem:[%s4631_s9 + $0xf8] sm:$0xff] }
  0x85   : > { %v459_v63 = vld [vmem:[%s4644_s15 + $0xf0] sm:$0xff]  ;;  %v683_v0 = vmul.f32 %v5024_v62, %v5024_v62  ;;  %v684_v9 = vmul.f32 %v5033_v6, %v5033_v6  ;;  %v5040_v12 = vld [vmem:[%s4631_s9 + $0xe0] sm:$0xff]  ;;  %v5043_v13 = vld [vmem:[%s4631_s9 + $0x78] sm:$0xff] }
  0x86   : > { %v523_v1 = vmul.f32 %v459_v63, %v459_v63  ;;  %v5030_v5 = vld [vmem:[%s4631_s9 + $0x70] sm:$0xff]  ;;  %v5113_v63 = vld [vmem:[%s4631_s9 + $0xb8] sm:$0xff]  ;;  %v1320_v50 = vld [vmem:[%s4649_s5 + $0x80] sm:$0xff] }
  0x87   : > { %v667_v8 = vmul.f32 %v5030_v5, %v5030_v5  ;;  %7853 = vst [vmem:[#allocation22_spill] sm:$0xff] %v5113_v63  ;;  %v1319_v58 = vld [vmem:[%s4649_s5 + $0x78] sm:$0xff]  ;;  %v1322_v47 = vld [vmem:[%s4649_s5 + $0x90] sm:$0xff]  ;;  %v1324_v43 = vld [vmem:[%s4649_s5 + $0xa0] sm:$0xff] }
  0x88   : > { %539 = vadd.xlane.f32.xlu1 %v500_v16  ;;  %537 = vadd.xlane.f32.xlu0 %v499_v17  ;;  %v681_v16 = vmul.f32 %v5040_v12, %v5040_v12  ;;  %v668_v17 = vmul.f32 %v5043_v13, %v5043_v13  ;;  %v1327_v55 = vld [vmem:[%s4649_s5 + $0xb8] sm:$0xff] }
  0x8c   : > { %543 = vadd.xlane.f32.xlu1 %v502_v20  ;;  %541 = vadd.xlane.f32.xlu0 %v501_v21  ;;  %v5050_v20 = vld [vmem:[%s4631_s9 + $0x60] sm:$0xff]  ;;  %v5053_v21 = vld [vmem:[%s4631_s9 + $0xe8] sm:$0xff] }
  0x90   : > { %547 = vadd.xlane.f32.xlu1 %v504_v24  ;;  %545 = vadd.xlane.f32.xlu0 %v503_v25  ;;  %v665_v24 = vmul.f32 %v5050_v20, %v5050_v20  ;;  %v682_v25 = vmul.f32 %v5053_v21, %v5053_v21 }
  0x94   : > { %551 = vadd.xlane.f32.xlu1 %v506_v28  ;;  %549 = vadd.xlane.f32.xlu0 %v505_v29  ;;  %v5060_v28 = vld [vmem:[%s4631_s9 + $0xd0] sm:$0xff]  ;;  %v5063_v29 = vld [vmem:[%s4631_s9 + $0x68] sm:$0xff] }
  0x95   : > { %v679_v30 = vmul.f32 %v5060_v28, %v5060_v28  ;;  %v666_v31 = vmul.f32 %v5063_v29, %v5063_v29 }
  0x98   : > { %555 = vadd.xlane.f32.xlu1 %v508_v32  ;;  %553 = vadd.xlane.f32.xlu0 %v507_v33  ;;  %v5070_v32 = vld [vmem:[%s4631_s9 + $0x50] sm:$0xff]  ;;  %v5073_v33 = vld [vmem:[%s4631_s9 + $0xd8] sm:$0xff] }
  0x9c   : > { %559 = vadd.xlane.f32.xlu1 %v510_v36  ;;  %557 = vadd.xlane.f32.xlu0 %v509_v37  ;;  %v663_v36 = vmul.f32 %v5070_v32, %v5070_v32  ;;  %v680_v37 = vmul.f32 %v5073_v33, %v5073_v33 }
  0xa0   : > { %563 = vadd.xlane.f32.xlu1 %v512_v40  ;;  %561 = vadd.xlane.f32.xlu0 %v511_v41  ;;  %v5080_v40 = vld [vmem:[%s4631_s9 + $0xc0] sm:$0xff]  ;;  %v5083_v41 = vld [vmem:[%s4631_s9 + $0x58] sm:$0xff] }
  0xa4   : > { %567 = vadd.xlane.f32.xlu1 %v514_v44  ;;  %565 = vadd.xlane.f32.xlu0 %v513_v45  ;;  %v677_v44 = vmul.f32 %v5080_v40, %v5080_v40  ;;  %v664_v45 = vmul.f32 %v5083_v41, %v5083_v41 }
  0xa8   : > { %571 = vadd.xlane.f32.xlu1 %v516_v48  ;;  %569 = vadd.xlane.f32.xlu0 %v515_v49  ;;  %v5090_v48 = vld [vmem:[%s4631_s9 + $0x40] sm:$0xff]  ;;  %v5093_v49 = vld [vmem:[%s4631_s9 + $0xc8] sm:$0xff] }
  0xa9   : > { %7849 = vst [vmem:[#allocation18_spill] sm:$0xff] %v5090_v48 }
  0xac   : > { %575 = vadd.xlane.f32.xlu1 %v518_v52  ;;  %573 = vadd.xlane.f32.xlu0 %v517_v53  ;;  %v661_v52 = vmul.f32 %v5090_v48, %v5090_v48  ;;  %v678_v53 = vmul.f32 %v5093_v49, %v5093_v49  ;;  %v1333_v48 = vld [vmem:[%s4649_s5 + $0xe8] sm:$0xff] }
  0xb0   : > { %579 = vadd.xlane.f32.xlu1 %v520_v56  ;;  %577 = vadd.xlane.f32.xlu0 %v519_v57  ;;  %v5100_v56 = vld [vmem:[%s4631_s9 + $0xb0] sm:$0xff]  ;;  %v5103_v57 = vld [vmem:[%s4631_s9 + $0x48] sm:$0xff] }
  0xb1   : > { %7850 = vst [vmem:[#allocation19_spill] sm:$0xff] %v5100_v56  ;;  %7851 = vst [vmem:[#allocation20_spill] sm:$0xff] %v5103_v57  ;;  %v675_v59 = vmul.f32 %v5100_v56, %v5100_v56  ;;  %v1311_v56 = vld [vmem:[%s4649_s5 + $0x38] sm:$0xff] }
  0xb4   : > { %583 = vadd.xlane.f32.xlu1 %v522_v60  ;;  %581 = vadd.xlane.f32.xlu0 %v521_v61  ;;  %v662_v60 = vmul.f32 %v5103_v57, %v5103_v57  ;;  %v5110_v61 = vld [vmem:[%s4631_s9 + $0x30] sm:$0xff] }
  0xb5   : > { %7852 = vst [vmem:[#allocation21_spill] sm:$0xff] %v5110_v61 }
  0xb8   : > { %745 = vadd.xlane.f32.xlu1 %v683_v0  ;;  %585 = vadd.xlane.f32.xlu0 %v523_v1  ;;  %v4521_v0 = vmov 0   ;;  %v659_v1 = vmul.f32 %v5110_v61, %v5110_v61 }
  0xb9   : > { %3963 = vset.pattern.permute.xlu1 %v4521_v0  ;;  %3962 = vset.pattern.permute.xlu0 %v4521_v0 }
  0xbc   : > { %713 = vadd.xlane.f32.xlu1 %v667_v8  ;;  %747 = vadd.xlane.f32.xlu0 %v684_v9  ;;  %v676_v8 = vmul.f32 %v5113_v63, %v5113_v63  ;;  %v5120_v9 = vld [vmem:[%s4631_s9 + $0xa0] sm:$0xff] }
  0xbd   : > { %7854 = vst [vmem:[#allocation23_spill] sm:$0xff] %v5120_v9 }
  0xc0   : > { %741 = vadd.xlane.f32.xlu1 %v681_v16  ;;  %715 = vadd.xlane.f32.xlu0 %v668_v17  ;;  %v5123_v16 = vld [vmem:[%s4631_s9 + $0x38] sm:$0xff]  ;;  %v673_v17 = vmul.f32 %v5120_v9, %v5120_v9 }
  0xc1   : > { %7855 = vst [vmem:[#allocation24_spill] sm:$0xff] %v5123_v16 }
  0xc4   : > { %709 = vadd.xlane.f32.xlu1 %v665_v24  ;;  %743 = vadd.xlane.f32.xlu0 %v682_v25  ;;  %v660_v24 = vmul.f32 %v5123_v16, %v5123_v16  ;;  %v5130_v25 = vld [vmem:[%s4631_s9 + $0x20] sm:$0xff] }
  0xc5   : > { %7856 = vst [vmem:[#allocation25_spill] sm:$0xff] %v5130_v25 }
  0xc8   : > { %737 = vadd.xlane.f32.xlu1 %v679_v30  ;;  %711 = vadd.xlane.f32.xlu0 %v666_v31  ;;  %v5133_v30 = vld [vmem:[%s4631_s9 + $0xa8] sm:$0xff]  ;;  %v657_v31 = vmul.f32 %v5130_v25, %v5130_v25 }
  0xc9   : > { %7857 = vst [vmem:[#allocation26_spill] sm:$0xff] %v5133_v30  ;;  %v1309_v25 = vld [vmem:[%s4649_s5 + $0x28] sm:$0xff] }
  0xcc   : > { %705 = vadd.xlane.f32.xlu1 %v663_v36  ;;  %739 = vadd.xlane.f32.xlu0 %v680_v37  ;;  %v674_v36 = vmul.f32 %v5133_v30, %v5133_v30  ;;  %v5140_v37 = vld [vmem:[%s4631_s9 + $0x90] sm:$0xff] }
  0xcd   : > { %7858 = vst [vmem:[#allocation27_spill] sm:$0xff] %v5140_v37 }
  0xd0   : > { %733 = vadd.xlane.f32.xlu1 %v677_v44  ;;  %707 = vadd.xlane.f32.xlu0 %v664_v45  ;;  %v5143_v44 = vld [vmem:[%s4631_s9 + $0x28] sm:$0xff]  ;;  %v671_v45 = vmul.f32 %v5140_v37, %v5140_v37 }
  0xd1   : > { %7859 = vst [vmem:[#allocation28_spill] sm:$0xff] %v5143_v44  ;;  %v1305_v37 = vld [vmem:[%s4649_s5 + $0x8] sm:$0xff] }
  0xd4   : > { %701 = vadd.xlane.f32.xlu1 %v661_v52  ;;  %735 = vadd.xlane.f32.xlu0 %v678_v53  ;;  %v658_v52 = vmul.f32 %v5143_v44, %v5143_v44  ;;  %v5150_v53 = vld [vmem:[%s4631_s9 + $0x10] sm:$0xff] }
  0xd5   : > { %7860 = vst [vmem:[#allocation29_spill] sm:$0xff] %v5150_v53 }
  0xd8   : > { %729 = vadd.xlane.f32.xlu1 %v675_v59  ;;  %703 = vadd.xlane.f32.xlu0 %v662_v60  ;;  %v5153_v59 = vld [vmem:[%s4631_s9 + $0x98] sm:$0xff]  ;;  %v655_v60 = vmul.f32 %v5150_v53, %v5150_v53 }
  0xd9   : > { %7861 = vst [vmem:[#allocation30_spill] sm:$0xff] %v5153_v59  ;;  %v672_v0 = vmul.f32 %v5153_v59, %v5153_v59  ;;  %v460_v53 = vld [vmem:[%s4644_s15 + $0xf8] sm:$0xff]  ;;  %v462_v59 = vld [vmem:[%s4631_s9 + $0x8] sm:$0xff] }
  0xdc   : > { %697 = vadd.xlane.f32.xlu1 %v659_v1  ;;  %731 = vadd.xlane.f32.xlu0 %v676_v8  ;;  %v5160_v1 = vld [vmem:[%s4631_s9 + $0x80] sm:$0xff]  ;;  %v5163_v8 = vld [vmem:[%s4631_s9 + $0x18] sm:$0xff] }
  0xdd   : > { %7862 = vst [vmem:[#allocation31_spill] sm:$0xff] %v5160_v1  ;;  %7863 = vst [vmem:[#allocation32_spill] sm:$0xff] %v5163_v8 }
  0xe0   : > { %725 = vadd.xlane.f32.xlu1 %v673_v17  ;;  %699 = vadd.xlane.f32.xlu0 %v660_v24  ;;  %v669_v17 = vmul.f32 %v5160_v1, %v5160_v1  ;;  %v656_v24 = vmul.f32 %v5163_v8, %v5163_v8 }
  0xe4   : > { %693 = vadd.xlane.f32.xlu1 %v657_v31  ;;  %727 = vadd.xlane.f32.xlu0 %v674_v36  ;;  %v461_v31 = vld [vmem:[%s4631_s9] sm:$0xff]  ;;  %v478_v36 = vld [vmem:[%s4631_s9 + $0x88] sm:$0xff] }
  0xe8   : > { %721 = vadd.xlane.f32.xlu1 %v671_v45  ;;  %695 = vadd.xlane.f32.xlu0 %v658_v52  ;;  %v653_v45 = vmul.f32 %v461_v31, %v461_v31  ;;  %v670_v52 = vmul.f32 %v478_v36, %v478_v36 }
  0xec   : > { %689 = vadd.xlane.f32.xlu1 %v655_v60  ;;  %723 = vadd.xlane.f32.xlu0 %v672_v0  ;;  %v524_v60 = vmul.f32 %v460_v53, %v460_v53  ;;  %v654_v0 = vmul.f32 %v462_v59, %v462_v59  ;;  %v1304_v53 = vld [vmem:[%s4649_s5] sm:$0xff] }
  0xf0   : > { %717 = vadd.xlane.f32.xlu1 %v669_v17  ;;  %691 = vadd.xlane.f32.xlu0 %v656_v24 }
  0xf4   : > { %685 = vadd.xlane.f32.xlu1 %v653_v45  ;;  %719 = vadd.xlane.f32.xlu0 %v670_v52  ;;  %v1306_v45 = vld [vmem:[%s4649_s5 + $0x10] sm:$0xff] }
  0xf8   : > { %587 = vadd.xlane.f32.xlu1 %v524_v60  ;;  %687 = vadd.xlane.f32.xlu0 %v654_v0  ;;  %v1307_v60 = vld [vmem:[%s4649_s5 + $0x18] sm:$0xff] }
 0x105   : > { %v5173_v1 = vpop.xlane.xlu1 %529  ;;  %v526_v8 = vpop.xlane.xlu0 %525 }
 0x106   : > { %v589_v17 = vmax.f32 %v526_v8, 1e-24  ;;  %v1313_v8 = vld [vmem:[%s4649_s5 + $0x48] sm:$0xff] }
 0x108   : > { %3964 = vrsqrt.f32 %v589_v17  ;;  %v1315_v17 = vld [vmem:[%s4649_s5 + $0x58] sm:$0xff] }
 0x109   : > { %v5176_v24 = vpop.xlane.xlu1 %531  ;;  %v528_v31 = vpop.xlane.xlu0 %527  ;;  %1341 = vperm.xlu1 %3963, %v1305_v37   ;;  %v1308_v37 = vld [vmem:[%s4649_s5 + $0x20] sm:$0xff] }
 0x10a   : > { %v590_v36 = vmax.f32 %v528_v31, 1e-24 }
 0x10c   : > { %3966 = vrsqrt.f32 %v590_v36 }
 0x10d   : > { %v5180_v59 = vpop.xlane.xlu1 %535  ;;  %v5182_v52 = vpop.xlane.xlu0 %533  ;;  %1344 = vperm.xlu1 %3963, %v1306_v45   ;;  %v1317_v45 = vld [vmem:[%s4649_s5 + $0x68] sm:$0xff] }
 0x10e   : > { %1338 = vperm.xlu0 %3962, %v1304_v53  }
 0x111   : > { %v5186_v0 = vpop.xlane.xlu1 %539  ;;  %v5188_v44 = vpop.xlane.xlu0 %537  ;;  %1347 = vperm.xlu1 %3963, %v1307_v60  }
 0x112   : > { %1365 = vperm.xlu0 %3962, %v1313_v8   ;;  %v1310_v8 = vld [vmem:[%s4649_s5 + $0x30] sm:$0xff] }
 0x115   : > { %v5192_v31 = vpop.xlane.xlu1 %543  ;;  %v5194_v36 = vpop.xlane.xlu0 %541  ;;  %1350 = vperm.xlu1 %3963, %v1308_v37  }
 0x116   : > { %1371 = vperm.xlu0 %3962, %v1315_v17   ;;  %v3965_v53 = vpop.eup %3964 }
 0x117   : > { %v813_v16 = vmul.f32 %v3965_v53, %v4889_v3  ;;  %v1323_v53 = vld [vmem:[%s4649_s5 + $0x98] sm:$0xff] }
 0x119   : > { %v5198_v30 = vpop.xlane.xlu1 %547  ;;  %v5200_v9 = vpop.xlane.xlu0 %545  ;;  %1353 = vperm.xlu1 %3963, %v1309_v25   ;;  %v1321_v25 = vld [vmem:[%s4649_s5 + $0x88] sm:$0xff] }
 0x11a   : > { %v3967_v60 = vpop.eup %3966  ;;  %1377 = vperm.xlu0 %3962, %v1317_v45  }
 0x11b   : > { %v814_v37 = vmul.f32 %v3967_v60, %v4899_v7  ;;  %v1312_v7 = vld [vmem:[%s4649_s5 + $0x40] sm:$0xff] }
 0x11d   : > { %v5206_v17 = vpop.xlane.xlu1 %551  ;;  %v5208_v61 = vpop.xlane.xlu0 %549  ;;  %v5210_v63 = vpack.c.bf16 %v814_v37, %v813_v16  ;;  %1356 = vperm.xlu1 %3963, %v1310_v8   ;;  %v1314_v37 = vld [vmem:[%s4649_s5 + $0x50] sm:$0xff] }
 0x11e   : > { %1383 = vperm.xlu0 %3962, %v1319_v58  }
 0x11f   : > { %7864 = vst [vmem:[#allocation33_spill] sm:$0xff] %v5210_v63  ;;  %3837 = vmatprep.mubr.bf16.mxu0 %v5210_v63  ;;  %v1325_v63 = vld [vmem:[%s4649_s5 + $0xa8] sm:$0xff] }
 0x121   : > { %v5215_v45 = vpop.xlane.xlu1 %555  ;;  %v5217_v3 = vpop.xlane.xlu0 %553  ;;  %1359 = vperm.xlu1 %3963, %v1311_v56  }
 0x122   : > { %1389 = vperm.xlu0 %3962, %v1321_v25   ;;  %v1316_v25 = vld [vmem:[%s4649_s5 + $0x60] sm:$0xff] }
 0x125   : > { %v560_v16 = vpop.xlane.xlu1 %559  ;;  %v558_v60 = vpop.xlane.xlu0 %557  ;;  %1362 = vperm.xlu1 %3963, %v1312_v7  }
 0x126   : > { %v606_v8 = vmax.f32 %v560_v16, 1e-24  ;;  %v605_v58 = vmax.f32 %v558_v60, 1e-24  ;;  %1395 = vperm.xlu0 %3962, %v1323_v53   ;;  %v1318_v53 = vld [vmem:[%s4649_s5 + $0x70] sm:$0xff]  ;;  %v1329_v60 = vld [vmem:[%s4649_s5 + $0xc8] sm:$0xff] }
 0x128   : > { %3968 = vrsqrt.f32 %v606_v8 }
 0x129   : > { %3970 = vrsqrt.f32 %v605_v58  ;;  %v5223_v54 = vpop.xlane.xlu1 %563  ;;  %v5225_v56 = vpop.xlane.xlu0 %561  ;;  %1368 = vperm.xlu1 %3963, %v1314_v37  }
 0x12a   : > { %1401 = vperm.xlu0 %3962, %v1325_v63   ;;  %v1331_v63 = vld [vmem:[%s4649_s5 + $0xd8] sm:$0xff] }
 0x12d   : > { %v5229_v7 = vpop.xlane.xlu1 %567  ;;  %v5231_v16 = vpop.xlane.xlu0 %565  ;;  %1374 = vperm.xlu1 %3963, %v1316_v25  }
 0x12e   : > { %1407 = vperm.xlu0 %3962, %v1327_v55  }
 0x131   : > { %v5235_v8 = vpop.xlane.xlu1 %571  ;;  %v5237_v58 = vpop.xlane.xlu0 %569  ;;  %1380 = vperm.xlu1 %3963, %v1318_v53  }
 0x132   : > { %1413 = vperm.xlu0 %3962, %v1329_v60  }
 0x135   : > { %v3969_v37 = vpop.eup %3968  ;;  %v5241_v51 = vpop.xlane.xlu1 %575  ;;  %1386 = vperm.xlu1 %3963, %v1320_v50   ;;  %v591_v50 = vmax.f32 %v5173_v1, 1e-24  ;;  %v595_v1 = vmax.f32 %v5188_v44, 1e-24  ;;  %v1330_v44 = vld [vmem:[%s4649_s5 + $0xd0] sm:$0xff] }
 0x136   : > { %v5243_v57 = vpop.xlane.xlu0 %573  ;;  %v3971_v25 = vpop.eup %3970  ;;  %v830_v55 = vmul.f32 %v3969_v37, %v4958_v34  ;;  %1419 = vperm.xlu0 %3962, %v1331_v63   ;;  %v1335_v34 = vld [vmem:[%s4649_s5 + $0xf8] sm:$0xff]  ;;  %v592_v63 = vmax.f32 %v5176_v24, 1e-24 }
 0x137   : > { %v829_v46 = vmul.f32 %v3971_v25, %v4961_v35  ;;  %v594_v35 = vmax.f32 %v5180_v59, 1e-24  ;;  %3972 = vrsqrt.f32 %v591_v50 }
 0x138   : > { %3974 = vrsqrt.f32 %v592_v63 }
 0x139   : > { %v5249_v53 = vpop.xlane.xlu1 %579  ;;  %v5253_v42 = vpack.c.bf16 %v830_v55, %v829_v46  ;;  %1392 = vperm.xlu1 %3963, %v1322_v47   ;;  %v593_v46 = vmax.f32 %v5182_v52, 1e-24  ;;  %v1326_v47 = vld [vmem:[%s4649_s5 + $0xb0] sm:$0xff]  ;;  %3976 = vrsqrt.f32 %v594_v35  ;;  %v598_v55 = vmax.f32 %v5192_v31, 1e-24 }
 0x13a   : > { %v5251_v60 = vpop.xlane.xlu0 %577  ;;  %1425 = vperm.xlu0 %3962, %v1333_v48   ;;  %v596_v48 = vmax.f32 %v5186_v0, 1e-24  ;;  %v597_v52 = vmax.f32 %v5194_v36, 1e-24  ;;  %v599_v31 = vmax.f32 %v5200_v9, 1e-24 }
 0x13b   : > { %7865 = vst [vmem:[#allocation34_spill] sm:$0xff] %v5253_v42  ;;  %3853 = vmatprep.mubr.bf16.mxu1 %v5253_v42  ;;  %3978 = vrsqrt.f32 %v593_v46  ;;  %v1328_v42 = vld [vmem:[%s4649_s5 + $0xc0] sm:$0xff] }
 0x13c   : > { %3980 = vrsqrt.f32 %v596_v48  ;;  %v1332_v36 = vld [vmem:[%s4649_s5 + $0xe0] sm:$0xff]  ;;  %v602_v48 = vmax.f32 %v5206_v17, 1e-24  ;;  %v608_v17 = vmax.f32 %v5223_v54, 1e-24 }
 0x13d   : > { %v5261_v37 = vpop.xlane.xlu1 %583  ;;  %1398 = vperm.xlu1 %3963, %v1324_v43   ;;  %3982 = vrsqrt.f32 %v595_v1  ;;  %v610_v54 = vmax.f32 %v5229_v7, 1e-24  ;;  %v612_v7 = vmax.f32 %v5235_v8, 1e-24 }
 0x13e   : > { %v5263_v25 = vpop.xlane.xlu0 %581  ;;  %1431 = vperm.xlu0 %3962, %v1335_v34   ;;  %v600_v34 = vmax.f32 %v5198_v30, 1e-24  ;;  %v601_v30 = vmax.f32 %v5208_v61, 1e-24  ;;  %v607_v61 = vmax.f32 %v5225_v56, 1e-24 }
 0x13f   : > { %v609_v56 = vmax.f32 %v5231_v16, 1e-24  ;;  %v611_v16 = vmax.f32 %v5237_v58, 1e-24 }
 0x141   : > { %v746_v24 = vpop.xlane.xlu1 %745  ;;  %1404 = vperm.xlu1 %3963, %v1326_v47  }
 0x142   : > { %v5269_v59 = vpop.xlane.xlu0 %585  ;;  %v779_v43 = vmax.f32 %v746_v24, 1e-24 }
 0x143   : > { %7866 = vst [vmem:[#allocation35_spill] sm:$0xff] %v5269_v59 }
 0x144   : > { %3984 = vrsqrt.f32 %v779_v43  ;;  %v5280_v24 = vpop.eup %3972 }
 0x145   : > { %v714_v0 = vpop.xlane.xlu1 %713  ;;  %1410 = vperm.xlu1 %3963, %v1328_v42   ;;  %3986 = vrsqrt.f32 %v598_v55  ;;  %v5282_v55 = vpop.eup %3974 }
 0x146   : > { %v748_v50 = vpop.xlane.xlu0 %747  ;;  %v763_v63 = vmax.f32 %v714_v0, 1e-24  ;;  %3988 = vrsqrt.f32 %v597_v52  ;;  %v1334_v52 = vld [vmem:[%s4649_s5 + $0xf0] sm:$0xff]  ;;  %v5285_v0 = vpop.eup %3976 }
 0x147   : > { %v780_v35 = vmax.f32 %v748_v50, 1e-24 }
 0x148   : > { %3990 = vrsqrt.f32 %v763_v63 }
 0x149   : > { %3992 = vrsqrt.f32 %v780_v35  ;;  %v742_v46 = vpop.xlane.xlu1 %741  ;;  %1416 = vperm.xlu1 %3963, %v1330_v44  }
 0x14a   : > { %v716_v47 = vpop.xlane.xlu0 %715  ;;  %3994 = vrsqrt.f32 %v600_v34  ;;  %v777_v42 = vmax.f32 %v742_v46, 1e-24  ;;  %v5288_v34 = vpop.eup %3978 }
 0x14b   : > { %v764_v1 = vmax.f32 %v716_v47, 1e-24  ;;  %3996 = vrsqrt.f32 %v599_v31  ;;  %v5291_v63 = vpop.eup %3980 }
 0x14c   : > { %3998 = vrsqrt.f32 %v777_v42  ;;  %v5293_v35 = vpop.eup %3982 }
 0x14d   : > { %4000 = vrsqrt.f32 %v764_v1  ;;  %v710_v9 = vpop.xlane.xlu1 %709  ;;  %1422 = vperm.xlu1 %3963, %v1332_v36  }
 0x14e   : > { %v744_v43 = vpop.xlane.xlu0 %743  ;;  %4002 = vrsqrt.f32 %v602_v48  ;;  %v761_v50 = vmax.f32 %v710_v9, 1e-24 }
 0x14f   : > { %v778_v44 = vmax.f32 %v744_v43, 1e-24  ;;  %4004 = vrsqrt.f32 %v601_v30 }
 0x150   : > { %4006 = vrsqrt.f32 %v761_v50 }
 0x151   : > { %4008 = vrsqrt.f32 %v778_v44  ;;  %v738_v31 = vpop.xlane.xlu1 %737  ;;  %1428 = vperm.xlu1 %3963, %v1334_v52   ;;  %v3985_v47 = vpop.eup %3984 }
 0x152   : > { %v712_v46 = vpop.xlane.xlu0 %711  ;;  %4010 = vrsqrt.f32 %v608_v17  ;;  %v775_v36 = vmax.f32 %v738_v31, 1e-24  ;;  %v5296_v42 = vpop.eup %3986  ;;  %v891_v52 = vmul.f32 %v3985_v47, %v5024_v62 }
 0x153   : > { %v762_v48 = vmax.f32 %v712_v46, 1e-24  ;;  %4012 = vrsqrt.f32 %v607_v61  ;;  %v5299_v1 = vpop.eup %3988 }
 0x154   : > { %4014 = vrsqrt.f32 %v775_v36 }
 0x155   : > { %v3991_v30 = vpop.eup %3990  ;;  %4016 = vrsqrt.f32 %v762_v48  ;;  %v706_v9 = vpop.xlane.xlu1 %705 }
 0x156   : > { %v740_v43 = vpop.xlane.xlu0 %739  ;;  %v3993_v50 = vpop.eup %3992  ;;  %4018 = vrsqrt.f32 %v610_v54  ;;  %v759_v17 = vmax.f32 %v706_v9, 1e-24  ;;  %v875_v54 = vmul.f32 %v3991_v30, %v5030_v5  ;;  %v614_v9 = vmax.f32 %v5241_v51, 1e-24 }
 0x157   : > { %v776_v44 = vmax.f32 %v740_v43, 1e-24  ;;  %v5303_v31 = vpop.eup %3994  ;;  %4020 = vrsqrt.f32 %v609_v56  ;;  %v892_v61 = vmul.f32 %v3993_v50, %v5033_v6  ;;  %v613_v6 = vmax.f32 %v5243_v57, 1e-24 }
 0x158   : > { %v5307_v46 = vpop.eup %3996  ;;  %4022 = vrsqrt.f32 %v759_v17 }
 0x159   : > { %v3999_v36 = vpop.eup %3998  ;;  %4024 = vrsqrt.f32 %v776_v44  ;;  %v734_v48 = vpop.xlane.xlu1 %733  ;;  %v908_v47 = vpack.c.bf16 %v892_v61, %v891_v52  ;;  %v616_v44 = vmax.f32 %v5249_v53, 1e-24 }
 0x15a   : > { %v708_v62 = vpop.xlane.xlu0 %707  ;;  %v4001_v8 = vpop.eup %4000  ;;  %4026 = vrsqrt.f32 %v612_v7  ;;  %v773_v43 = vmax.f32 %v734_v48, 1e-24  ;;  %v889_v51 = vmul.f32 %v3999_v36, %v5040_v12 }
 0x15b   : > { %v760_v56 = vmax.f32 %v708_v62, 1e-24  ;;  %v5311_v59 = vpop.eup %4002  ;;  %4028 = vrsqrt.f32 %v611_v16  ;;  %3821 = vmatprep.subr.bf16.mxu0 %v908_v47  ;;  %3869 = vmatprep.subr.bf16.mxu1 %v908_v47  ;;  %v876_v58 = vmul.f32 %v4001_v8, %v5043_v13  ;;  %v615_v13 = vmax.f32 %v5251_v60, 1e-24 }
 0x15c   : > { %v5315_v50 = vpop.eup %4004  ;;  %4030 = vrsqrt.f32 %v773_v43 }
 0x15d   : > { %v4007_v52 = vpop.eup %4006  ;;  %4032 = vrsqrt.f32 %v760_v56  ;;  %v702_v5 = vpop.xlane.xlu1 %701  ;;  %v900_v7 = vpack.c.bf16 %v876_v58, %v875_v54  ;;  %v818_v58 = vmul.f32 %v5285_v0, %v4906_v10  ;;  %v604_v10 = vmax.f32 %v5215_v45, 1e-24 }
 0x15e   : > { %v736_v30 = vpop.xlane.xlu0 %735  ;;  %v4009_v17 = vpop.eup %4008  ;;  %4034 = vrsqrt.f32 %v614_v9  ;;  %v757_v16 = vmax.f32 %v702_v5, 1e-24  ;;  %v873_v53 = vmul.f32 %v4007_v52, %v5050_v20  ;;  %v816_v20 = vmul.f32 %v5282_v55, %v4892_v4 }
 0x15f   : > { %v774_v57 = vmax.f32 %v736_v30, 1e-24  ;;  %v5319_v61 = vpop.eup %4010  ;;  %4036 = vrsqrt.f32 %v613_v6  ;;  %3822 = vmatpush3.bf16.xpose.msra.mxu0 %v900_v7  ;;  %3877 = vmatpush3.bf16.xpose.msra.mxu1 %v900_v7  ;;  %v890_v48 = vmul.f32 %v4009_v17, %v5053_v21  ;;  %v815_v6 = vmul.f32 %v5280_v24, %v4886_v2 }
 0x160   : > { %v5323_v62 = vpop.eup %4012  ;;  %4038 = vrsqrt.f32 %v757_v16  ;;  %v820_v4 = vmul.f32 %v5291_v63, %v4916_v14  ;;  %v821_v14 = vmul.f32 %v5299_v1, %v4929_v19  ;;  %v824_v45 = vmul.f32 %v5303_v31, %v4936_v22 }
 0x161   : > { %v4015_v47 = vpop.eup %4014  ;;  %4040 = vrsqrt.f32 %v774_v57  ;;  %v730_v12 = vpop.xlane.xlu1 %729  ;;  %v907_v54 = vpack.c.bf16 %v890_v48, %v889_v51  ;;  %v617_v22 = vmax.f32 %v5263_v25, 1e-24 }
 0x162   : > { %v704_v36 = vpop.xlane.xlu0 %703  ;;  %v4017_v8 = vpop.eup %4016  ;;  %4042 = vrsqrt.f32 %v616_v44  ;;  %v771_v9 = vmax.f32 %v730_v12, 1e-24  ;;  %v887_v51 = vmul.f32 %v4015_v47, %v5060_v28  ;;  %v618_v44 = vmax.f32 %v5261_v37, 1e-24 }
 0x163   : > { %v758_v43 = vmax.f32 %v704_v36, 1e-24  ;;  %v5326_v56 = vpop.eup %4018  ;;  %4044 = vrsqrt.f32 %v615_v13  ;;  %3823 = vmatprep.subr.bf16.mxu0 %v907_v54  ;;  %3870 = vmatprep.subr.bf16.mxu1 %v907_v54  ;;  %v874_v21 = vmul.f32 %v4017_v8, %v5063_v29  ;;  %v817_v29 = vmul.f32 %v5288_v34, %v4909_v11 }
 0x164   : > { %v5329_v60 = vpop.eup %4020  ;;  %4046 = vrsqrt.f32 %v771_v9  ;;  %v819_v28 = vmul.f32 %v5293_v35, %v4919_v15  ;;  %v822_v11 = vmul.f32 %v5296_v42, %v4926_v18  ;;  %v823_v34 = vmul.f32 %v5307_v46, %v4939_v23 }
 0x165   : > { %v4023_v52 = vpop.eup %4022  ;;  %4048 = vrsqrt.f32 %v758_v43  ;;  %v698_v5 = vpop.xlane.xlu1 %697  ;;  %v899_v7 = vpack.c.bf16 %v874_v21, %v873_v53  ;;  %v826_v18 = vmul.f32 %v5311_v59, %v4946_v26  ;;  %v825_v23 = vmul.f32 %v5315_v50, %v4949_v27 }
 0x166   : > { %v732_v30 = vpop.xlane.xlu0 %731  ;;  %v4025_v17 = vpop.eup %4024  ;;  %v755_v2 = vmax.f32 %v698_v5, 1e-24  ;;  %v871_v35 = vmul.f32 %v4023_v52, %v5070_v32  ;;  %v5366_v46 = vpack.c.bf16 %v816_v20, %v815_v6  ;;  %v603_v26 = vmax.f32 %v5217_v3, 1e-24  ;;  %v7867_v6 = vld [vmem:[#allocation35_spill] sm:$0xff]  ;;  %v7869_v5 = vld [vmem:[#allocation9_spill] sm:$0xff] }
 0x167   : > { %v772_v24 = vmax.f32 %v732_v30, 1e-24  ;;  %v5343_v55 = vpop.eup %4026  ;;  %3824 = vmatpush3.bf16.xpose.msra.mxu0 %v899_v7  ;;  %3878 = vmatpush3.bf16.xpose.msra.mxu1 %v899_v7  ;;  %v888_v0 = vmul.f32 %v4025_v17, %v5073_v33  ;;  %v5369_v59 = vpack.c.bf16 %v818_v58, %v817_v29  ;;  %v5371_v13 = vpack.c.bf16 %v820_v4, %v819_v28  ;;  %v7868_v58 = vld [vmem:[#allocation10_spill] sm:$0xff] }
 0x168   : > { %v5351_v37 = vpop.eup %4028  ;;  %4050 = vrsqrt.f32 %v755_v2  ;;  %v5374_v12 = vpack.c.bf16 %v822_v11, %v821_v14  ;;  %v5376_v53 = vpack.c.bf16 %v824_v45, %v823_v34  ;;  %v5378_v3 = vpack.c.bf16 %v826_v18, %v825_v23  ;;  %v7870_v17 = vld [vmem:[#allocation18_spill] sm:$0xff]  ;;  %v7875_v11 = vld [vmem:[#allocation13_spill] sm:$0xff]  ;;  %v7876_v34 = vld [vmem:[#allocation16_spill] sm:$0xff] }
 0x169   : > { %v4031_v63 = vpop.eup %4030  ;;  %4052 = vrsqrt.f32 %v772_v24  ;;  %v726_v33 = vpop.xlane.xlu1 %725  ;;  %v906_v15 = vpack.c.bf16 %v888_v0, %v887_v51  ;;  %v831_v43 = vmul.f32 %v5323_v62, %v4971_v39  ;;  %v619_v20 = vmax.f32 %v7867_v6, 1e-24  ;;  %v7871_v62 = vld [vmem:[#allocation11_spill] sm:$0xff]  ;;  %v7872_v24 = vld [vmem:[#allocation12_spill] sm:$0xff]  ;;  %v7874_v0 = vld [vmem:[#allocation14_spill] sm:$0xff] }
 0x16a   : > { %v700_v16 = vpop.xlane.xlu0 %699  ;;  %v4033_v42 = vpop.eup %4032  ;;  %4054 = vrsqrt.f32 %v618_v44  ;;  %v769_v57 = vmax.f32 %v726_v33, 1e-24  ;;  %v885_v25 = vmul.f32 %v4031_v63, %v5080_v40  ;;  %v832_v40 = vmul.f32 %v5319_v61, %v4968_v38  ;;  %v7877_v63 = vld [vmem:[#allocation15_spill] sm:$0xff] }
 0x16b   : > { %v756_v19 = vmax.f32 %v700_v16, 1e-24  ;;  %v4035_v1 = vpop.eup %4034  ;;  %4056 = vrsqrt.f32 %v604_v10  ;;  %3825 = vmatprep.subr.bf16.mxu0 %v906_v15  ;;  %3871 = vmatprep.subr.bf16.mxu1 %v906_v15  ;;  %v872_v31 = vmul.f32 %v4033_v42, %v5083_v41  ;;  %v833_v52 = vmul.f32 %v5329_v60, %v7868_v58  ;;  %v7878_v18 = vld [vmem:[#allocation19_spill] sm:$0xff] }
 0x16c   : > { %v4037_v32 = vpop.eup %4036  ;;  %4058 = vrsqrt.f32 %v769_v57  ;;  %v834_v30 = vmul.f32 %v5326_v56, %v7869_v5  ;;  %v836_v38 = vmul.f32 %v5343_v55, %v7871_v62  ;;  %v835_v4 = vmul.f32 %v5351_v37, %v7872_v24  ;;  %v7873_v56 = vld [vmem:[#allocation20_spill] sm:$0xff]  ;;  %v7883_v5 = vld [vmem:[#allocation17_spill] sm:$0xff] }
 0x16d   : > { %v4039_v48 = vpop.eup %4038  ;;  %4060 = vrsqrt.f32 %v756_v19  ;;  %v694_v27 = vpop.xlane.xlu1 %693  ;;  %v898_v47 = vpack.c.bf16 %v872_v31, %v871_v35  ;;  %v1167_v60 = vlaneseq  ;;  %v837_v28 = vmul.f32 %v4037_v32, %v7874_v0  ;;  %v7879_v32 = vld [vmem:[#allocation22_spill] sm:$0xff]  ;;  %v1336_v0 = vld [vmem:[%s287_s30] sm:$0x3] }
 0x16e   : > { %v728_v50 = vpop.xlane.xlu0 %727  ;;  %v4041_v41 = vpop.eup %4040  ;;  %v753_v36 = vmax.f32 %v694_v27, 1e-24  ;;  %4062 = vrsqrt.f32 %v617_v22  ;;  %v869_v39 = vmul.f32 %v4039_v48, %v7870_v17  ;;  %v838_v14 = vmul.f32 %v4035_v1, %v7875_v11 }
 0x16f   : > { %v770_v54 = vmax.f32 %v728_v50, 1e-24  ;;  %v4043_v8 = vpop.eup %4042  ;;  %3826 = vmatpush3.bf16.xpose.msra.mxu0 %v898_v47  ;;  %3879 = vmatpush3.bf16.xpose.msra.mxu1 %v898_v47  ;;  %v886_v9 = vmul.f32 %v4041_v41, %v5093_v49  ;;  %v5398_v55 = vpack.c.bf16 %v832_v40, %v831_v43  ;;  %v5403_v57 = vpack.c.bf16 %v834_v30, %v833_v52  ;;  %v7882_v40 = vld [vmem:[#allocation21_spill] sm:$0xff] }
 0x170   : > { %v4045_v21 = vpop.eup %4044  ;;  %4064 = vrsqrt.f32 %v753_v36  ;;  %v840_v33 = vmul.f32 %v4043_v8, %v7877_v63  ;;  %v1235_v22 = vand.u32 127, %v1167_v60  ;;  %v5408_v48 = vpack.c.bf16 %v836_v38, %v835_v4 }
 0x171   : > { %v4047_v7 = vpop.eup %4046  ;;  %4066 = vrsqrt.f32 %v770_v54  ;;  %v722_v51 = vpop.xlane.xlu1 %721  ;;  %v905_v29 = vpack.c.bf16 %v886_v9, %v885_v25  ;;  %v839_v45 = vmul.f32 %v4045_v21, %v7876_v34  ;;  %v5410_v27 = vpack.c.bf16 %v838_v14, %v837_v28 }
 0x172   : > { %v696_v49 = vpop.xlane.xlu0 %695  ;;  %v4049_v61 = vpop.eup %4048  ;;  %v767_v44 = vmax.f32 %v722_v51, 1e-24  ;;  %4068 = vrsqrt.f32 %v603_v26  ;;  %v883_v42 = vmul.f32 %v4047_v7, %v7878_v18  ;;  %v5412_v50 = vshrl.u32 %v1167_v60, 7  ;;  %v7884_v51 = vld [vmem:[#allocation24_spill] sm:$0xff] }
 0x173   : > { %v754_v2 = vmax.f32 %v696_v49, 1e-24  ;;  %3827 = vmatprep.subr.bf16.mxu0 %v905_v29  ;;  %3872 = vmatprep.subr.bf16.mxu1 %v905_v29  ;;  %v870_v10 = vmul.f32 %v4049_v61, %v7873_v56  ;;  %v5416_v25 = vpack.c.bf16 %v840_v33, %v839_v45  ;;  %v5418_v41 = vstv %s3687_s11  ;;  %v7885_v56 = vld [vmem:[#allocation23_spill] sm:$0xff]  ;;  %v7887_v33 = vld [vmem:[#allocation26_spill] sm:$0xff] }
 0x174   : > { %4070 = vrsqrt.f32 %v767_v44  ;;  %7880 = vst [vmem:[#allocation35_spill] sm:$0xff] %v5412_v50  ;;  %7881 = vst [vmem:[#allocation10_spill] sm:$0xff] %v5418_v41  ;;  %v1237_v36 = vstv %s3688_s12  ;;  %v1170_v6 = vadd.s32 16, %v5412_v50  ;;  %v1236_v7 = vadd.s32 128, %v1235_v22 }
 0x175   : > { %v4051_v37 = vpop.eup %4050  ;;  %4072 = vrsqrt.f32 %v754_v2  ;;  %v690_v16 = vpop.xlane.xlu1 %689  ;;  %v897_v35 = vpack.c.bf16 %v870_v10, %v869_v39  ;;  %v1435_v29 = vsub.s32 0, %v5412_v50  ;;  %v1439_v17 = vsub.s32 1, %v5412_v50 }
 0x176   : > { %v724_v15 = vpop.xlane.xlu0 %723  ;;  %v4053_v19 = vpop.eup %4052  ;;  %4074 = vrsqrt.f32 %v619_v20  ;;  %v751_v23 = vmax.f32 %v690_v16, 1e-24  ;;  %v867_v21 = vmul.f32 %v4051_v37, %v7882_v40  ;;  %v1169_v39 = vadd.s32 8, %v5412_v50  ;;  %v4284_v16 = vld [vmem:[%s4644_s15 + $0xe0] sm:$0xff] }
 0x177   : > { %v768_v1 = vmax.f32 %v724_v15, 1e-24  ;;  %v4055_v31 = vpop.eup %4054  ;;  %3828 = vmatpush3.bf16.xpose.msra.mxu0 %v897_v35  ;;  %3880 = vmatpush3.bf16.xpose.msra.mxu1 %v897_v35  ;;  %v884_v26 = vmul.f32 %v4053_v19, %v7879_v32  ;;  %v5431_v38 = vadd.s32 %v5418_v41, %v5412_v50  ;;  %v5433_v61 = vadd.s32 %v1237_v36, %v1235_v22 }
 0x178   : > { %v5414_v47 = vpop.eup %4056  ;;  %4076 = vrsqrt.f32 %v751_v23  ;;  %v5423_v30 = vmul.f32 %v4055_v31, %v7883_v5  ;;  %v1172_v44 = vadd.s32 32, %v5412_v50  ;;  %v5443_v28 = vadd.s32 %v5418_v41, %v1170_v6 }
 0x179   : > { %v4059_v54 = vpop.eup %4058  ;;  %4078 = vrsqrt.f32 %v768_v1  ;;  %v718_v8 = vpop.xlane.xlu1 %717  ;;  %v904_v43 = vpack.c.bf16 %v884_v26, %v883_v42  ;;  %v5445_v45 = vadd.s32 %v1237_v36, %v1236_v7  ;;  %v1171_v63 = vadd.s32 24, %v5412_v50  ;;  %v7890_v36 = vld [vmem:[#allocation25_spill] sm:$0xff] }
 0x17a   : > { %v692_v9 = vpop.xlane.xlu0 %691  ;;  %v4061_v20 = vpop.eup %4060  ;;  %v765_v58 = vmax.f32 %v718_v8, 1e-24  ;;  %v881_v10 = vmul.f32 %v4059_v54, %v7885_v56  ;;  %7886 = vst [vmem:[#allocation9_spill] sm:$0xff] %v5443_v28  ;;  %v1174_v35 = vadd.s32 48, %v5412_v50  ;;  %v5454_v18 = vadd.s32 %v5418_v41, %v1169_v39 }
 0x17b   : > { %v752_v52 = vmax.f32 %v692_v9, 1e-24  ;;  %3829 = vmatprep.subr.bf16.mxu0 %v904_v43  ;;  %3873 = vmatprep.subr.bf16.mxu1 %v904_v43  ;;  %v868_v49 = vmul.f32 %v4061_v20, %v7884_v51  ;;  %v4063_v62 = vpop.eup %4062  ;;  %v5458_v19 = vrot.slane %v1336_v0, %v1435_v29  ;;  %v5460_v23 = vrot.slane %v1336_v0, %v1439_v17  ;;  %v7893_v20 = vld [vmem:[#allocation28_spill] sm:$0xff]  ;;  %v7896_v17 = vld [vmem:[#allocation27_spill] sm:$0xff] }
 0x17c   : > { %4080 = vrsqrt.f32 %v765_v58  ;;  %v5450_v15 = vmul.f32 %v4284_v16, %v4063_v62  ;;  %v1176_v1 = vadd.s32 64, %v5412_v50  ;;  %vm7657_vm1 = vcmp.eq.s32.totalorder %v5431_v38, %v5433_v61  ;;  %v7901_v16 = vld [vmem:[#allocation29_spill] sm:$0xff] }
 0x17d   : > { %v4065_v2 = vpop.eup %4064  ;;  %4082 = vrsqrt.f32 %v752_v52  ;;  %v686_v24 = vpop.xlane.xlu1 %685  ;;  %v896_v60 = vpack.c.bf16 %v868_v49, %v867_v21  ;;  %7888 = vst [vmem:[#allocation18_spill] sm:$0xff] %v5458_v19  ;;  %7889 = vst [vmem:[#allocation11_spill] sm:$0xff] %v5460_v23  ;;  %v5469_v8 = vadd.s32 %v5418_v41, %v1172_v44  ;;  %vm7656_vm2 = vcmp.eq.s32.totalorder %v5431_v38, %v5445_v45 }
 0x17e   : > { %v720_v4 = vpop.xlane.xlu0 %719  ;;  %v4067_v11 = vpop.eup %4066  ;;  %v749_v14 = vmax.f32 %v686_v24, 1e-24  ;;  %v865_v54 = vmul.f32 %v4065_v2, %v7890_v36  ;;  %vm7634_vm3 = vcmp.eq.s32.totalorder %v5443_v28, %v5433_v61  ;;  %vm7642_vm4 = vcmp.eq.s32.totalorder %v5443_v28, %v5445_v45 }
 0x17f   : > { %v766_v34 = vmax.f32 %v720_v4, 1e-24  ;;  %3830 = vmatpush3.bf16.xpose.msra.mxu0 %v896_v60  ;;  %3881 = vmatpush3.bf16.xpose.msra.mxu1 %v896_v60  ;;  %v882_v37 = vmul.f32 %v4067_v11, %v7887_v33  ;;  %v5456_v42 = vpop.eup %4068  ;;  %7891 = vst [vmem:[#allocation12_spill] sm:$0xff] %v5469_v8  ;;  %v5478_v40 = vadd.s32 %v5418_v41, %v1171_v63  ;;  %v1178_v21 = vadd.s32 80, %v5412_v50  ;;  %v7898_v4 = vld [vmem:[#allocation30_spill] sm:$0xff] }
 0x180   : > { %4084 = vrsqrt.f32 %v749_v14  ;;  %v5485_v52 = vadd.s32 %v5418_v41, %v1174_v35  ;;  %vm7647_vm5 = vcmp.eq.s32.totalorder %v5454_v18, %v5433_v61  ;;  %vm7648_vm6 = vcmp.eq.s32.totalorder %v5454_v18, %v5445_v45 }
 0x181   : > { %v4071_v22 = vpop.eup %4070  ;;  %4086 = vrsqrt.f32 %v766_v34  ;;  %v5463_v31 = vpop.xlane.xlu1 %587  ;;  %v903_v26 = vpack.c.bf16 %v882_v37, %v881_v10  ;;  %7892 = vst [vmem:[#allocation20_spill] sm:$0xff] %v5478_v40  ;;  %v5492_v5 = vadd.s32 %v5418_v41, %v1176_v1  ;;  %v1173_v7 = vadd.s32 40, %v5412_v50 }
 0x182   : > { %v688_v32 = vpop.xlane.xlu0 %687  ;;  %v4073_v9 = vpop.eup %4072  ;;  %7894 = vst [vmem:[#allocation14_spill] sm:$0xff] %v5485_v52  ;;  %v1180_v51 = vadd.s32 96, %v5412_v50  ;;  %v879_v39 = vmul.f32 %v4071_v22, %v7896_v17  ;;  %v1175_v44 = vadd.s32 56, %v5412_v50  ;;  %vm7633_vm9 = vcmp.eq.s32.totalorder %v5478_v40, %v5433_v61 }
 0x183   : > { %v750_v43 = vmax.f32 %v688_v32, 1e-24  ;;  %v5481_v6 = vpop.eup %4074  ;;  %3831 = vmatprep.subr.bf16.mxu0 %v903_v26  ;;  %3874 = vmatprep.subr.bf16.mxu1 %v903_v26  ;;  %v866_v58 = vmul.f32 %v4073_v9, %v7893_v20  ;;  %7895 = vst [vmem:[#allocation13_spill] sm:$0xff] %v5492_v5  ;;  %v5503_v24 = vadd.s32 %v5418_v41, %v1178_v21  ;;  %v7635_v56 = vmov 0.0   ;;  %v7903_v9 = vld [vmem:[#allocation32_spill] sm:$0xff] }
 0x184   : > { %vm7641_vm10 = vcmp.eq.s32.totalorder %v5478_v40, %v5445_v45  ;;  %v5521_v34 = vadd.s32 %v5418_v41, %v1173_v7  ;;  %v5524_v63 = vadd.s32 %v5418_v41, %v1180_v51  ;;  %vm7631_vm11 = vcmp.eq.s32.totalorder %v5469_v8, %v5433_v61 }
 0x185   : > { %v4077_v49 = vpop.eup %4076  ;;  %4088 = vrsqrt.f32 %v750_v43  ;;  %v895_v29 = vpack.c.bf16 %v866_v58, %v865_v54  ;;  %v1342_v62 = vpop.permute.xlu1 %1341  ;;  %7897 = vst [vmem:[#allocation16_spill] sm:$0xff] %v5503_v24  ;;  %vm7632_vm12 = vcmp.eq.s32.totalorder %v5469_v8, %v5445_v45  ;;  %v5534_v26 = vadd.s32 %v5418_v41, %v1175_v44  ;;  %v7904_v58 = vld [vmem:[#allocation31_spill] sm:$0xff] }
 0x186   : > { %v4079_v2 = vpop.eup %4078  ;;  %vm1443_vm7 = vcmp.eq.s32.totalorder %v1342_v62, %v5458_v19  ;;  %vm1444_vm8 = vcmp.eq.s32.totalorder %v1342_v62, %v5460_v23  ;;  %7899 = vst [vmem:[#allocation15_spill] sm:$0xff] %v5521_v34  ;;  %7900 = vst [vmem:[#allocation19_spill] sm:$0xff] %v5524_v63  ;;  %v863_v35 = vmul.f32 %v4077_v49, %v7901_v16  ;;  %v1182_v54 = vadd.s32 112, %v5412_v50 }
 0x187   : > { %3832 = vmatpush3.bf16.xpose.msra.mxu0 %v895_v29  ;;  %3882 = vmatpush3.bf16.xpose.msra.mxu1 %v895_v29  ;;  %v880_v60 = vmul.f32 %v4079_v2, %v7898_v4  ;;  %v3691_v10 = vsel %vm1443_vm7, 1.0, %v7635_v56  ;;  %v3692_v0 = vsel %vm1444_vm8, 1.0, %v7635_v56  ;;  %7902 = vst [vmem:[#allocation22_spill] sm:$0xff] %v5534_v26  ;;  %vm7639_vm7 = vcmp.eq.s32.totalorder %v5521_v34, %v5433_v61 }
 0x188   : > { %v5513_v11 = vsel %vm7647_vm5, 0.0, %v3691_v10  ;;  %v5518_v14 = vsel %vm7648_vm6, 0.0, %v3692_v0  ;;  %vm7640_vm8 = vcmp.eq.s32.totalorder %v5521_v34, %v5445_v45  ;;  %v1189_v40 = vadd.s32 168, %v5412_v50 }
 0x189   : > { %v4081_v33 = vpop.eup %4080  ;;  %v902_v37 = vpack.c.bf16 %v880_v60, %v879_v39  ;;  %v1345_v1 = vpop.permute.xlu1 %1344  ;;  %v2981_v32 = vadd.f32 %v5518_v14, %v5513_v11 }
 0x18a   : > { %v1339_v22 = vpop.permute.xlu0 %1338  ;;  %v4083_v36 = vpop.eup %4082  ;;  %vm1445_vm13 = vcmp.eq.s32.totalorder %v1345_v1, %v5458_v19  ;;  %vm1446_vm14 = vcmp.eq.s32.totalorder %v1345_v1, %v5460_v23  ;;  %v877_v7 = vmul.f32 %v4081_v33, %v7904_v58  ;;  %v1184_v33 = vadd.s32 128, %v5412_v50 }
 0x18b   : > { %vm1441_vm15 = vcmp.eq.s32.totalorder %v1339_v22, %v5458_v19  ;;  %3833 = vmatprep.subr.bf16.mxu0 %v902_v37  ;;  %3875 = vmatprep.subr.bf16.mxu1 %v902_v37  ;;  %v864_v43 = vmul.f32 %v4083_v36, %v7903_v9  ;;  %vm1442_vm0 = vcmp.eq.s32.totalorder %v1339_v22, %v5460_v23  ;;  %v3693_v20 = vsel %vm1445_vm13, 1.0, %v7635_v56  ;;  %v4285_v37 = vld [vmem:[%s4631_s9 + $0x88] sm:$0xff] }
 0x18c   : > { %v3689_v21 = vsel %vm1441_vm15, 1.0, %v7635_v56  ;;  %v3690_v51 = vsel %vm1442_vm0, 1.0, %v7635_v56  ;;  %v3694_v29 = vsel %vm1446_vm14, 1.0, %v7635_v56  ;;  %2982 = vadd.xlane.f32.xlu1 %v2981_v32  ;;  %v5560_v2 = vsel %vm7634_vm3, 0.0, %v3693_v20  ;;  %v4286_v20 = vld [vmem:[%s4631_s9] sm:$0xff] }
 0x18d   : > { %v5549_v49 = vsel %vm7657_vm1, 0.0, %v3689_v21  ;;  %v4085_v17 = vpop.eup %4084  ;;  %v894_v39 = vpack.c.bf16 %v864_v43, %v863_v35  ;;  %v1348_v62 = vpop.permute.xlu1 %1347  ;;  %v5555_v44 = vsel %vm7656_vm2, 0.0, %v3690_v51  ;;  %v5565_v4 = vsel %vm7642_vm4, 0.0, %v3694_v29 }
 0x18e   : > { %v5567_v60 = vpop.permute.xlu0 %1365  ;;  %v4087_v10 = vpop.eup %4086  ;;  %vm1447_vm13 = vcmp.eq.s32.totalorder %v1348_v62, %v5458_v19  ;;  %vm1448_vm14 = vcmp.eq.s32.totalorder %v1348_v62, %v5460_v23  ;;  %v2978_v0 = vadd.f32 %v5555_v44, %v5549_v49  ;;  %v1177_v22 = vadd.s32 72, %v5412_v50 }
 0x18f   : > { %3834 = vmatpush3.bf16.xpose.msra.mxu0 %v894_v39  ;;  %3883 = vmatpush3.bf16.xpose.msra.mxu1 %v894_v39  ;;  %v878_v16 = vmul.f32 %v4285_v37, %v4087_v10  ;;  %v3695_v35 = vsel %vm1447_vm13, 1.0, %v7635_v56  ;;  %v3696_v1 = vsel %vm1448_vm14, 1.0, %v7635_v56  ;;  %v2984_v32 = vadd.f32 %v5565_v4, %v5560_v2 }
 0x190   : > { %2979 = vadd.xlane.f32.xlu0 %v2978_v0  ;;  %v5587_v36 = vsel %vm7633_vm9, 0.0, %v3695_v35  ;;  %v5592_v9 = vsel %vm7641_vm10, 0.0, %v3696_v1  ;;  %v1186_v43 = vadd.s32 144, %v5412_v50  ;;  %v861_v58 = vmul.f32 %v4286_v20, %v4085_v17  ;;  %v4287_v0 = vld [vmem:[%s4631_s9 + $0x8] sm:$0xff] }
 0x191   : > { %7905 = vst [vmem:[#allocation21_spill] sm:$0xff] %v5587_v36  ;;  %v901_v21 = vpack.c.bf16 %v878_v16, %v877_v7  ;;  %v1351_v51 = vpop.permute.xlu1 %1350  ;;  %vm7653_vm15 = vcmp.eq.s32.totalorder %v5485_v52, %v5433_v61  ;;  %vm7654_vm0 = vcmp.eq.s32.totalorder %v5485_v52, %v5445_v45  ;;  %v2987_v29 = vadd.f32 %v5592_v9, %v5587_v36  ;;  %v7919_v52 = vld [vmem:[#allocation33_spill] sm:$0xff] }
 0x192   : > { %v5602_v39 = vpop.permute.xlu0 %1371  ;;  %v1179_v62 = vadd.s32 88, %v5412_v50  ;;  %v4089_v10 = vpop.eup %4088  ;;  %vm1449_vm13 = vcmp.eq.s32.totalorder %v1351_v51, %v5458_v19  ;;  %vm1450_vm14 = vcmp.eq.s32.totalorder %v1351_v51, %v5460_v23  ;;  %v5608_v7 = vadd.s32 %v5418_v41, %v1182_v54 }
 0x193   : > { %v5611_v17 = vadd.s32 %v5418_v41, %v1184_v33  ;;  %3835 = vmatprep.subr.bf16.mxu0 %v901_v21  ;;  %3876 = vmatprep.subr.bf16.mxu1 %v901_v21  ;;  %v862_v37 = vmul.f32 %v4287_v0, %v4089_v10  ;;  %v3697_v16 = vsel %vm1449_vm13, 1.0, %v7635_v56  ;;  %v3698_v35 = vsel %vm1450_vm14, 1.0, %v7635_v56 }
 0x194   : > { %7906 = vst [vmem:[#allocation17_spill] sm:$0xff] %v5608_v7  ;;  %v5617_v1 = vadd.s32 %v5418_v41, %v1177_v22  ;;  %2985 = vadd.xlane.f32.xlu0 %v2984_v32  ;;  %v5622_v54 = vsel %vm7631_vm11, 0.0, %v3697_v16  ;;  %v5627_v33 = vsel %vm7632_vm12, 0.0, %v3698_v35  ;;  %2988 = vadd.xlane.f32.xlu1 %v2987_v29  ;;  %v5630_v21 = vadd.s32 %v5418_v41, %v1186_v43 }
 0x195   : > { %7908 = vst [vmem:[#allocation23_spill] sm:$0xff] %v5622_v54  ;;  %7909 = vst [vmem:[#allocation26_spill] sm:$0xff] %v5627_v33  ;;  %v1188_v20 = vadd.s32 160, %v5412_v50  ;;  %v893_v51 = vpack.c.bf16 %v862_v37, %v861_v58  ;;  %v1354_v22 = vpop.permute.xlu1 %1353  ;;  %v2990_v32 = vadd.f32 %v5627_v33, %v5622_v54  ;;  %vm7663_vm13 = vcmp.eq.s32.totalorder %v5534_v26, %v5433_v61 }
 0x196   : > { %7907 = vst [vmem:[#allocation24_spill] sm:$0xff] %v5617_v1  ;;  %v5635_v10 = vpop.permute.xlu0 %1377  ;;  %vm7664_vm14 = vcmp.eq.s32.totalorder %v5534_v26, %v5445_v45  ;;  %v5642_v29 = vadd.s32 %v5418_v41, %v1179_v62  ;;  %v1181_v43 = vadd.s32 104, %v5412_v50  ;;  %vm1451_vm11 = vcmp.eq.s32.totalorder %v1354_v22, %v5458_v19 }
 0x197   : > { %vm1452_vm12 = vcmp.eq.s32.totalorder %v1354_v22, %v5460_v23  ;;  %v1190_v58 = vadd.s32 176, %v5412_v50  ;;  %v1183_v0 = vadd.s32 120, %v5412_v50  ;;  %3836 = vmatpush3.bf16.xpose.msra.mxu0 %v893_v51  ;;  %3884 = vmatpush3.bf16.xpose.msra.mxu1 %v893_v51  ;;  %v3699_v37 = vsel %vm1451_vm11, 1.0, %v7635_v56 }
 0x198   : > { %7910 = vst [vmem:[#allocation25_spill] sm:$0xff] %v5642_v29  ;;  %v3700_v16 = vsel %vm1452_vm12, 1.0, %v7635_v56  ;;  %vm7669_vm9 = vcmp.eq.s32.totalorder %v5617_v1, %v5433_v61  ;;  %vm7670_vm3 = vcmp.eq.s32.totalorder %v5617_v1, %v5445_v45  ;;  %2991 = vadd.xlane.f32.xlu0 %v2990_v32  ;;  %v5658_v62 = vsel %vm7639_vm7, 0.0, %v3699_v37 }
 0x199   : > { %7911 = vst [vmem:[#allocation28_spill] sm:$0xff] %v5658_v62  ;;  %v5663_v35 = vsel %vm7640_vm8, 0.0, %v3700_v16  ;;  %v5666_v51 = vadd.s32 %v5418_v41, %v1188_v20  ;;  %v1192_v22 = vadd.s32 192, %v5412_v50  ;;  %v620_v56 = vmax.f32 %v5463_v31, 1e-24  ;;  %v1357_v8 = vpop.permute.xlu1 %1356 }
 0x19a   : > { %7912 = vst [vmem:[#allocation27_spill] sm:$0xff] %v5663_v35  ;;  %vm7674_vm11 = vcmp.eq.s32.totalorder %v5492_v5, %v5433_v61  ;;  %vm7686_vm12 = vcmp.eq.s32.totalorder %v5492_v5, %v5445_v45  ;;  %v2993_v32 = vadd.f32 %v5663_v35, %v5658_v62  ;;  %v5676_v37 = vpop.permute.xlu0 %1383  ;;  %v5679_v16 = vadd.s32 %v5418_v41, %v1181_v43 }
 0x19b   : > { %v1185_v20 = vadd.s32 136, %v5412_v50  ;;  %vm1453_vm7 = vcmp.eq.s32.totalorder %v1357_v8, %v5458_v19  ;;  %vm1454_vm8 = vcmp.eq.s32.totalorder %v1357_v8, %v5460_v23  ;;  %vm7675_vm10 = vcmp.eq.s32.totalorder %v5642_v29, %v5433_v61 }
 0x19c   : > { %7913 = vst [vmem:[#allocation30_spill] sm:$0xff] %v5679_v16  ;;  %vm7676_vm4 = vcmp.eq.s32.totalorder %v5642_v29, %v5445_v45  ;;  %v5689_v31 = vadd.s32 %v5418_v41, %v1190_v58  ;;  %v5692_v34 = vadd.s32 %v5418_v41, %v1183_v0  ;;  %v7915_v43 = vmov 0.0   ;;  %2994 = vadd.xlane.f32.xlu1 %v2993_v32 }
 0x19d   : > { %v3701_v62 = vsel %vm1453_vm7, 1.0, %v7915_v43  ;;  %v3702_v54 = vsel %vm1454_vm8, 1.0, %v7915_v43  ;;  %vm1459_vm5 = vcmp.eq.s32.totalorder %v5567_v60, %v5458_v19  ;;  %vm1460_vm6 = vcmp.eq.s32.totalorder %v5567_v60, %v5460_v23  ;;  %v1360_v33 = vpop.permute.xlu1 %1359 }
 0x19e   : > { %7914 = vst [vmem:[#allocation29_spill] sm:$0xff] %v5692_v34  ;;  %v5703_v8 = vsel %vm7653_vm15, 0.0, %v3701_v62  ;;  %v5708_v58 = vsel %vm7654_vm0, 0.0, %v3702_v54  ;;  %v5711_v0 = vadd.s32 %v5418_v41, %v1192_v22  ;;  %v1187_v35 = vadd.s32 152, %v5412_v50  ;;  %v5720_v62 = vpop.permute.xlu0 %1389  ;;  %3838 = vmatmul.mubr.bf16.vlgmr.msra.gmra.mxu0 %v7919_v52 }
 0x19f   : > { %7916 = vst [vmem:[#allocation32_spill] sm:$0xff] %v5703_v8  ;;  %7917 = vst [vmem:[#allocation31_spill] sm:$0xff] %v5708_v58  ;;  %4090 = vrsqrt.f32 %v620_v56  ;;  %v2996_v32 = vadd.f32 %v5708_v58, %v5703_v8  ;;  %vm7684_vm7 = vcmp.eq.s32.totalorder %v5503_v24, %v5433_v61  ;;  %v5723_v54 = vadd.s32 %v5418_v41, %v1185_v20  ;;  %v7920_v56 = vld [vmem:[#allocation34_spill] sm:$0xff] }
 0x1a0   : > { %7918 = vst [vmem:[#allocation36_spill] sm:$0xff] %v5711_v0  ;;  %v5726_v22 = vadd.s32 208, %v5412_v50  ;;  %3854 = vmatmul.mubr.bf16.vlgmr.msra.gmra.mxu1 %v7920_v56  ;;  %vm1455_vm15 = vcmp.eq.s32.totalorder %v1360_v33, %v5458_v19  ;;  %vm1456_vm0 = vcmp.eq.s32.totalorder %v1360_v33, %v5460_v23  ;;  %v3707_v8 = vsel %vm1459_vm5, 1.0, %v7915_v43  ;;  %3839 = vmatprep.mubr.bf16.mxu0 %v5366_v46 }
 0x1a1   : > { %v3708_v20 = vsel %vm1460_vm6, 1.0, %v7915_v43  ;;  %vm7685_vm2 = vcmp.eq.s32.totalorder %v5679_v16, %v5433_v61  ;;  %vm7687_vm1 = vcmp.eq.s32.totalorder %v5679_v16, %v5445_v45  ;;  %3855 = vmatprep.mubr.bf16.mxu1 %v5398_v55  ;;  %v3703_v52 = vsel %vm1455_vm15, 1.0, %v7915_v43  ;;  %2997 = vadd.xlane.f32.xlu0 %v2996_v32  ;;  %v1363_v28 = vpop.permute.xlu1 %1362 }
 0x1a2   : > { %v3704_v33 = vsel %vm1456_vm0, 1.0, %v7915_v43  ;;  %vm1463_vm5 = vcmp.eq.s32.totalorder %v5602_v39, %v5458_v19  ;;  %vm1464_vm6 = vcmp.eq.s32.totalorder %v5602_v39, %v5460_v23  ;;  %v5757_v60 = vsel %vm7663_vm13, 0.0, %v3703_v52 }
 0x1a3   : > { %7921 = vst [vmem:[#allocation33_spill] sm:$0xff] %v5757_v60  ;;  %v5762_v56 = vsel %vm7664_vm14, 0.0, %v3704_v33  ;;  %vm7692_vm15 = vcmp.eq.s32.totalorder %v5692_v34, %v5445_v45  ;;  %v5767_v58 = vadd.s32 %v5418_v41, %v1187_v35  ;;  %vm7693_vm0 = vcmp.eq.s32.totalorder %v5524_v63, %v5433_v61 }
 0x1a4   : > { %7922 = vst [vmem:[#allocation34_spill] sm:$0xff] %v5762_v56  ;;  %vm1467_vm8 = vcmp.eq.s32.totalorder %v5635_v10, %v5458_v19  ;;  %v2999_v32 = vadd.f32 %v5762_v56, %v5757_v60  ;;  %v5781_v35 = vsel %vm7669_vm9, 0.0, %v3707_v8  ;;  %v5786_v52 = vsel %vm7670_vm3, 0.0, %v3708_v20 }
 0x1a5   : > { %7923 = vst [vmem:[#allocation37_spill] sm:$0xff] %v5781_v35  ;;  %7924 = vst [vmem:[#allocation38_spill] sm:$0xff] %v5786_v52  ;;  %vm1457_vm14 = vcmp.eq.s32.totalorder %v1363_v28, %v5458_v19  ;;  %vm1458_vm13 = vcmp.eq.s32.totalorder %v1363_v28, %v5460_v23  ;;  %v3711_v33 = vsel %vm1463_vm5, 1.0, %v7915_v43  ;;  %v3712_v8 = vsel %vm1464_vm6, 1.0, %v7915_v43  ;;  %v5804_v28 = vpop.permute.xlu0 %1395  ;;  %v1369_v56 = vpop.permute.xlu1 %1368 }
 0x1a6   : > { %v3705_v26 = vsel %vm1457_vm14, 1.0, %v7915_v43  ;;  %v3706_v1 = vsel %vm1458_vm13, 1.0, %v7915_v43  ;;  %vm1468_vm9 = vcmp.eq.s32.totalorder %v5635_v10, %v5460_v23  ;;  %3000 = vadd.xlane.f32.xlu1 %v2999_v32  ;;  %vm1471_vm3 = vcmp.eq.s32.totalorder %v5676_v37, %v5458_v19  ;;  %3840 = vmatmul.mubr.bf16.gmra.mxu0 %v5366_v46 }
 0x1a7   : > { %v5809_v20 = vsel %vm7674_vm11, 0.0, %v3705_v26  ;;  %v5814_v39 = vsel %vm7686_vm12, 0.0, %v3706_v1  ;;  %v3715_v32 = vsel %vm1467_vm8, 1.0, %v7915_v43  ;;  %v3005_v60 = vadd.f32 %v5786_v52, %v5781_v35  ;;  %3841 = vmatprep.mubr.bf16.mxu0 %v5369_v59 }
 0x1a8   : > { %7925 = vst [vmem:[#allocation39_spill] sm:$0xff] %v5809_v20  ;;  %7926 = vst [vmem:[#allocation40_spill] sm:$0xff] %v5814_v39  ;;  %v3002_v36 = vadd.f32 %v5814_v39, %v5809_v20  ;;  %vm7700_vm13 = vcmp.eq.s32.totalorder %v5608_v7, %v5433_v61  ;;  %vm7705_vm14 = vcmp.eq.s32.totalorder %v5608_v7, %v5445_v45  ;;  %v5833_v26 = vsel %vm7675_vm10, 0.0, %v3711_v33 }
 0x1a9   : > { %vm1472_vm5 = vcmp.eq.s32.totalorder %v5676_v37, %v5460_v23  ;;  %7927 = vst [vmem:[#allocation41_spill] sm:$0xff] %v5833_v26  ;;  %v5838_v1 = vsel %vm7676_vm4, 0.0, %v3712_v8  ;;  %vm1274_vm8 = vcmp.eq.s32.totalorder %v5723_v54, %v5433_v61  ;;  %3856 = vmatmul.mubr.bf16.gmra.mxu1 %v5398_v55  ;;  %vm1461_vm6 = vcmp.eq.s32.totalorder %v1369_v56, %v5458_v19 }
 0x1aa   : > { %7928 = vst [vmem:[#allocation42_spill] sm:$0xff] %v5838_v1  ;;  %vm1462_vm11 = vcmp.eq.s32.totalorder %v1369_v56, %v5460_v23  ;;  %v3716_v33 = vsel %vm1468_vm9, 1.0, %v7915_v43  ;;  %v3719_v8 = vsel %vm1471_vm3, 1.0, %v7915_v43  ;;  %vm1275_vm10 = vcmp.eq.s32.totalorder %v5723_v54, %v5445_v45  ;;  %3857 = vmatprep.mubr.bf16.mxu1 %v5403_v57  ;;  %3003 = vadd.xlane.f32.xlu0 %v3002_v36  ;;  %v1375_v36 = vpop.permute.xlu1 %1374 }
 0x1ab   : > { %vm7707_vm4 = vcmp.eq.s32.totalorder %v5767_v58, %v5433_v61  ;;  %v3709_v46 = vsel %vm1461_vm6, 1.0, %v7915_v43  ;;  %v3710_v55 = vsel %vm1462_vm11, 1.0, %v7915_v43  ;;  %vm7706_vm9 = vcmp.eq.s32.totalorder %v5767_v58, %v5445_v45  ;;  %3006 = vadd.xlane.f32.xlu1 %v3005_v60  ;;  %v1402_v60 = vpop.permute.xlu0 %1401 }
 0x1ac   : > { %v5865_v10 = vadd.s32 %v5418_v41, %v1189_v40  ;;  %v5870_v56 = vsel %vm7684_vm7, 0.0, %v3709_v46  ;;  %vm7930_vm3 = vcmp.eq.s32.totalorder %v5503_v24, %v5445_v45  ;;  %v3720_v5 = vsel %vm1472_vm5, 1.0, %v7915_v43  ;;  %v5904_v24 = vpop.eup %4090 }
 0x1ad   : > { %7929 = vst [vmem:[#allocation43_spill] sm:$0xff] %v5870_v56  ;;  %v5875_v29 = vsel %vm7930_vm3, 0.0, %v3710_v55  ;;  %v3011_v40 = vadd.f32 %v5838_v1, %v5833_v26  ;;  %vm1272_vm11 = vcmp.eq.s32.totalorder %v5611_v17, %v5433_v61  ;;  %vm1273_vm6 = vcmp.eq.s32.totalorder %v5611_v17, %v5445_v45 }
 0x1ae   : > { %7931 = vst [vmem:[#allocation44_spill] sm:$0xff] %v5875_v29  ;;  %v3008_v35 = vadd.f32 %v5875_v29, %v5870_v56  ;;  %v5892_v46 = vsel %vm7685_vm2, 0.0, %v3715_v32  ;;  %v5897_v37 = vsel %vm7687_vm1, 0.0, %v3716_v33  ;;  %vm7934_vm5 = vcmp.eq.s32.totalorder %v5692_v34, %v5433_v61  ;;  %v1381_v34 = vpop.permute.xlu1 %1380  ;;  %3842 = vmatmul.mubr.bf16.gmra.mxu0 %v5369_v59 }
 0x1af   : > { %7932 = vst [vmem:[#allocation45_spill] sm:$0xff] %v5892_v46  ;;  %7933 = vst [vmem:[#allocation46_spill] sm:$0xff] %v5897_v37  ;;  %v5902_v55 = vsel %vm7934_vm5, 0.0, %v3719_v8  ;;  %vm1465_vm3 = vcmp.eq.s32.totalorder %v1375_v36, %v5458_v19  ;;  %vm1466_vm7 = vcmp.eq.s32.totalorder %v1375_v36, %v5460_v23  ;;  %vm1475_vm2 = vcmp.eq.s32.totalorder %v5720_v62, %v5458_v19 }
 0x1b0   : > { %7935 = vst [vmem:[#allocation47_spill] sm:$0xff] %v5902_v55  ;;  %vm1476_vm12 = vcmp.eq.s32.totalorder %v5720_v62, %v5460_v23  ;;  %v3713_v32 = vsel %vm1465_vm3, 1.0, %v7915_v43  ;;  %v3714_v33 = vsel %vm1466_vm7, 1.0, %v7915_v43  ;;  %vm1479_vm5 = vcmp.eq.s32.totalorder %v5804_v28, %v5458_v19  ;;  %3009 = vadd.xlane.f32.xlu0 %v3008_v35  ;;  %3012 = vadd.xlane.f32.xlu1 %v3011_v40 }
 0x1b1   : > { %v5919_v8 = vsel %vm7692_vm15, 0.0, %v3720_v5  ;;  %v5926_v62 = vsel %vm7693_vm0, 0.0, %v3713_v32  ;;  %vm7938_vm7 = vcmp.eq.s32.totalorder %v5524_v63, %v5445_v45  ;;  %vm1480_vm3 = vcmp.eq.s32.totalorder %v5804_v28, %v5460_v23  ;;  %3858 = vmatmul.mubr.bf16.gmra.mxu1 %v5403_v57  ;;  %3843 = vmatprep.mubr.bf16.mxu0 %v5371_v13 }
 0x1b2   : > { %7936 = vst [vmem:[#allocation48_spill] sm:$0xff] %v5919_v8  ;;  %7937 = vst [vmem:[#allocation49_spill] sm:$0xff] %v5926_v62  ;;  %v5931_v36 = vsel %vm7938_vm7, 0.0, %v3714_v33  ;;  %v3017_v5 = vadd.f32 %v5897_v37, %v5892_v46  ;;  %v3723_v16 = vsel %vm1475_vm2, 1.0, %v7915_v43  ;;  %v3724_v32 = vsel %vm1476_vm12, 1.0, %v7915_v43  ;;  %3859 = vmatprep.mubr.bf16.mxu1 %v5408_v48  ;;  %v1408_v46 = vpop.permute.xlu0 %1407 }
 0x1b3   : > { %7939 = vst [vmem:[#allocation50_spill] sm:$0xff] %v5931_v36  ;;  %v3014_v35 = vadd.f32 %v5931_v36, %v5926_v62  ;;  %vm7712_vm15 = vcmp.eq.s32.totalorder %v5630_v21, %v5433_v61  ;;  %vm7715_vm7 = vcmp.eq.s32.totalorder %v5630_v21, %v5445_v45  ;;  %v1191_v40 = vadd.s32 184, %v5412_v50  ;;  %v1387_v62 = vpop.permute.xlu1 %1386 }
 0x1b4   : > { %vm1469_vm0 = vcmp.eq.s32.totalorder %v1381_v34, %v5458_v19  ;;  %vm1470_vm1 = vcmp.eq.s32.totalorder %v1381_v34, %v5460_v23  ;;  %v3727_v33 = vsel %vm1479_vm5, 1.0, %v7915_v43  ;;  %v3023_v63 = vadd.f32 %v5919_v8, %v5902_v55  ;;  %3018 = vadd.xlane.f32.xlu1 %v3017_v5 }
 0x1b5   : > { %v3717_v59 = vsel %vm1469_vm0, 1.0, %v7915_v43  ;;  %v3718_v57 = vsel %vm1470_vm1, 1.0, %v7915_v43  ;;  %v3728_v34 = vsel %vm1480_vm3, 1.0, %v7915_v43  ;;  %vm1483_vm2 = vcmp.eq.s32.totalorder %v1402_v60, %v5458_v19  ;;  %3015 = vadd.xlane.f32.xlu0 %v3014_v35 }
 0x1b6   : > { %v5968_v55 = vsel %vm7700_vm13, 0.0, %v3717_v59  ;;  %v5973_v8 = vsel %vm7705_vm14, 0.0, %v3718_v57  ;;  %vm1484_vm1 = vcmp.eq.s32.totalorder %v1402_v60, %v5460_v23  ;;  %v5979_v28 = vsel %vm1274_vm8, 0.0, %v3723_v16  ;;  %3844 = vmatmul.mubr.bf16.gmra.mxu0 %v5371_v13 }
 0x1b7   : > { %7940 = vst [vmem:[#allocation51_spill] sm:$0xff] %v5968_v55  ;;  %7941 = vst [vmem:[#allocation52_spill] sm:$0xff] %v5973_v8  ;;  %v3020_v35 = vadd.f32 %v5973_v8, %v5968_v55  ;;  %vm7721_vm12 = vcmp.eq.s32.totalorder %v5666_v51, %v5433_v61  ;;  %vm1281_vm0 = vcmp.eq.s32.totalorder %v5666_v51, %v5445_v45  ;;  %v5990_v5 = vsel %vm1275_vm10, 0.0, %v3724_v32  ;;  %v1393_v8 = vpop.permute.xlu1 %1392 }
 0x1b8   : > { %v5995_v16 = vsel %vm7707_vm4, 0.0, %v3727_v33  ;;  %vm7711_vm5 = vcmp.eq.s32.totalorder %v5865_v10, %v5445_v45  ;;  %vm1473_vm3 = vcmp.eq.s32.totalorder %v1387_v62, %v5458_v19  ;;  %vm1474_vm13 = vcmp.eq.s32.totalorder %v1387_v62, %v5460_v23  ;;  %3024 = vadd.xlane.f32.xlu1 %v3023_v63  ;;  %3845 = vmatprep.mubr.bf16.mxu0 %v5374_v12 }
 0x1b9   : > { %v3731_v59 = vsel %vm1483_vm2, 1.0, %v7915_v43  ;;  %v6007_v32 = vsel %vm7706_vm9, 0.0, %v3728_v34  ;;  %v3721_v57 = vsel %vm1473_vm3, 1.0, %v7915_v43  ;;  %v3722_v33 = vsel %vm1474_vm13, 1.0, %v7915_v43  ;;  %3021 = vadd.xlane.f32.xlu0 %v3020_v35  ;;  %v1414_v35 = vpop.permute.xlu0 %1413  ;;  %3860 = vmatmul.mubr.bf16.gmra.mxu1 %v5408_v48 }
 0x1ba   : > { %v3732_v7 = vsel %vm1484_vm1, 1.0, %v7915_v43  ;;  %v6013_v55 = vadd.s32 %v5418_v41, %v1191_v40  ;;  %v6018_v60 = vsel %vm1272_vm11, 0.0, %v3721_v57  ;;  %v6023_v62 = vsel %vm1273_vm6, 0.0, %v3722_v33  ;;  %3861 = vmatprep.mubr.bf16.mxu1 %v5410_v27 }
 0x1bb   : > { %vm1487_vm2 = vcmp.eq.s32.totalorder %v1408_v46, %v5458_v19  ;;  %v3029_v34 = vadd.f32 %v5990_v5, %v5979_v28  ;;  %v3026_v40 = vadd.f32 %v6023_v62, %v6018_v60  ;;  %vm1284_vm13 = vcmp.eq.s32.totalorder %v5689_v31, %v5433_v61  ;;  %v1399_v26 = vpop.permute.xlu1 %1398 }
 0x1bc   : > { %vm1285_vm1 = vcmp.eq.s32.totalorder %v5689_v31, %v5445_v45  ;;  %vm1488_vm3 = vcmp.eq.s32.totalorder %v1408_v46, %v5460_v23  ;;  %v3035_v63 = vadd.f32 %v6007_v32, %v5995_v16  ;;  %v1193_v57 = vadd.s32 200, %v5412_v50  ;;  %v8006_v31 = vld [vmem:[#allocation39_spill] sm:$0xff] }
 0x1bd   : > { %vm1477_vm14 = vcmp.eq.s32.totalorder %v1393_v8, %v5458_v19  ;;  %vm1478_vm9 = vcmp.eq.s32.totalorder %v1393_v8, %v5460_v23  ;;  %vm7942_vm4 = vcmp.eq.s32.totalorder %v5865_v10, %v5433_v61  ;;  %v6050_v37 = vsel %vm7711_vm5, 0.0, %v3732_v7  ;;  %3027 = vadd.xlane.f32.xlu0 %v3026_v40  ;;  %3030 = vadd.xlane.f32.xlu1 %v3029_v34 }
 0x1be   : > { %v6045_v33 = vsel %vm7942_vm4, 0.0, %v3731_v59  ;;  %v3725_v13 = vsel %vm1477_vm14, 1.0, %v7915_v43  ;;  %v3726_v48 = vsel %vm1478_vm9, 1.0, %v7915_v43  ;;  %v3735_v8 = vsel %vm1487_vm2, 1.0, %v7915_v43  ;;  %3846 = vmatmul.mubr.bf16.gmra.mxu0 %v5374_v12 }
 0x1bf   : > { %vm7719_vm4 = vcmp.eq.s32.totalorder %v6013_v55, %v5433_v61  ;;  %v6064_v7 = vsel %vm7712_vm15, 0.0, %v3725_v13  ;;  %v6069_v59 = vsel %vm7715_vm7, 0.0, %v3726_v48  ;;  %v3736_v36 = vsel %vm1488_vm3, 1.0, %v7915_v43  ;;  %v1405_v52 = vpop.permute.xlu1 %1404  ;;  %3847 = vmatprep.mubr.bf16.mxu0 %v5376_v53 }
 0x1c0   : > { %vm7720_vm14 = vcmp.eq.s32.totalorder %v6013_v55, %v5445_v45  ;;  %v3032_v40 = vadd.f32 %v6069_v59, %v6064_v7  ;;  %vm1288_vm9 = vcmp.eq.s32.totalorder %v5711_v0, %v5433_v61  ;;  %vm1289_vm2 = vcmp.eq.s32.totalorder %v5711_v0, %v5445_v45 }
 0x1c1   : > { %vm1491_vm5 = vcmp.eq.s32.totalorder %v1414_v35, %v5458_v19  ;;  %v6084_v13 = vadd.s32 %v5418_v41, %v1193_v57  ;;  %v1195_v46 = vadd.s32 216, %v5412_v50  ;;  %vm1481_vm3 = vcmp.eq.s32.totalorder %v1399_v26, %v5458_v19  ;;  %v1420_v57 = vpop.permute.xlu0 %1419  ;;  %3036 = vadd.xlane.f32.xlu1 %v3035_v63  ;;  %3862 = vmatmul.mubr.bf16.gmra.mxu1 %v5410_v27 }
 0x1c2   : > { %vm1482_vm15 = vcmp.eq.s32.totalorder %v1399_v26, %v5460_v23  ;;  %v3041_v34 = vadd.f32 %v6050_v37, %v6045_v33  ;;  %v6094_v48 = vsel %vm7719_vm4, 0.0, %v3735_v8  ;;  %v3729_v56 = vsel %vm1481_vm3, 1.0, %v7915_v43  ;;  %3033 = vadd.xlane.f32.xlu0 %v3032_v40  ;;  %3863 = vmatprep.mubr.bf16.mxu1 %v5416_v25 }
 0x1c3   : > { %7943 = vst [vmem:[#allocation53_spill] sm:$0xff] %v6084_v13  ;;  %v3730_v1 = vsel %vm1482_vm15, 1.0, %v7915_v43  ;;  %vm1492_vm7 = vcmp.eq.s32.totalorder %v1414_v35, %v5460_v23  ;;  %v6102_v29 = vsel %vm7720_vm14, 0.0, %v3736_v36  ;;  %v6107_v26 = vsel %vm7721_vm12, 0.0, %v3729_v56 }
 0x1c4   : > { %v6112_v8 = vsel %vm1281_vm0, 0.0, %v3730_v1  ;;  %v3739_v20 = vsel %vm1491_vm5, 1.0, %v7915_v43  ;;  %vm1495_vm15 = vcmp.eq.s32.totalorder %v1420_v57, %v5458_v19  ;;  %vm1496_vm3 = vcmp.eq.s32.totalorder %v1420_v57, %v5460_v23 }
 0x1c5   : > { %v3038_v36 = vadd.f32 %v6112_v8, %v6107_v26  ;;  %vm7725_vm4 = vcmp.eq.s32.totalorder %v6084_v13, %v5433_v61  ;;  %v6122_v56 = vadd.s32 %v5418_v41, %v1195_v46  ;;  %vm1485_vm5 = vcmp.eq.s32.totalorder %v1405_v52, %v5458_v19  ;;  %3042 = vadd.xlane.f32.xlu1 %v3041_v34 }
 0x1c6   : > { %vm1486_vm14 = vcmp.eq.s32.totalorder %v1405_v52, %v5460_v23  ;;  %v3740_v1 = vsel %vm1492_vm7, 1.0, %v7915_v43  ;;  %vm1291_vm12 = vcmp.eq.s32.totalorder %v6084_v13, %v5445_v45  ;;  %v3733_v63 = vsel %vm1485_vm5, 1.0, %v7915_v43  ;;  %3848 = vmatmul.mubr.bf16.gmra.mxu0 %v5376_v53 }
 0x1c7   : > { %7944 = vst [vmem:[#allocation54_spill] sm:$0xff] %v6122_v56  ;;  %v3734_v12 = vsel %vm1486_vm14, 1.0, %v7915_v43  ;;  %v6139_v27 = vadd.s32 %v5418_v41, %v5726_v22  ;;  %v1196_v52 = vadd.s32 224, %v5412_v50  ;;  %3039 = vadd.xlane.f32.xlu0 %v3038_v36  ;;  %v6145_v35 = vsel %vm1284_vm13, 0.0, %v3733_v63  ;;  %v1411_v50 = vpop.permute.xlu1 %1410  ;;  %3849 = vmatprep.mubr.bf16.mxu0 %v5378_v3 }
 0x1c8   : > { %v6150_v40 = vsel %vm1285_vm1, 0.0, %v3734_v12  ;;  %v3743_v46 = vsel %vm1495_vm15, 1.0, %v7915_v43  ;;  %v3047_v22 = vadd.f32 %v6102_v29, %v6094_v48  ;;  %v3744_v63 = vsel %vm1496_vm3, 1.0, %v7915_v43 }
 0x1c9   : > { %7945 = vst [vmem:[#allocation55_spill] sm:$0xff] %v6139_v27  ;;  %v3044_v36 = vadd.f32 %v6150_v40, %v6145_v35  ;;  %v6165_v12 = vsel %vm7725_vm4, 0.0, %v3739_v20  ;;  %v6170_v34 = vsel %vm1291_vm12, 0.0, %v3740_v1  ;;  %vm1489_vm7 = vcmp.eq.s32.totalorder %v1411_v50, %v5458_v19  ;;  %3864 = vmatmul.mubr.bf16.gmra.mxu1 %v5416_v25 }
 0x1ca   : > { %vm1490_vm14 = vcmp.eq.s32.totalorder %v1411_v50, %v5460_v23  ;;  %vm7734_vm15 = vcmp.eq.s32.totalorder %v6122_v56, %v5433_v61  ;;  %vm1295_vm3 = vcmp.eq.s32.totalorder %v6122_v56, %v5445_v45  ;;  %v859_v57 = vpack.c.bf16 %v5423_v30, %v5450_v15  ;;  %3048 = vadd.xlane.f32.xlu1 %v3047_v22  ;;  %v4289_v56 = vld [vmem:[%s4644_s15 + $0x70] sm:$0xff] }
 0x1cb   : > { %v3737_v20 = vsel %vm1489_vm7, 1.0, %v7915_v43  ;;  %v3738_v39 = vsel %vm1490_vm14, 1.0, %v7915_v43  ;;  %vm7735_vm5 = vcmp.eq.s32.totalorder %v6139_v27, %v5433_v61  ;;  %3045 = vadd.xlane.f32.xlu0 %v3044_v36  ;;  %vm1293_vm7 = vcmp.eq.s32.totalorder %v6139_v27, %v5445_v45  ;;  %v1417_v15 = vpop.permute.xlu1 %1416 }
 0x1cc   : > { %v6187_v50 = vsel %vm1288_vm9, 0.0, %v3737_v20  ;;  %v6192_v1 = vsel %vm1289_vm2, 0.0, %v3738_v39  ;;  %v3053_v30 = vadd.f32 %v6170_v34, %v6165_v12  ;;  %v6201_v20 = vadd.s32 %v5418_v41, %v1196_v52  ;;  %3865 = vmatprep.mubr.bf16.mxu1 %v859_v57  ;;  %v4288_v52 = vld [vmem:[%s4644_s15 + $0x78] sm:$0xff] }
 0x1cd   : > { %v3050_v36 = vadd.f32 %v6192_v1, %v6187_v50  ;;  %v6206_v39 = vsel %vm7734_vm15, 0.0, %v3743_v46  ;;  %v6211_v22 = vsel %vm1295_vm3, 0.0, %v3744_v63  ;;  %vm1493_vm14 = vcmp.eq.s32.totalorder %v1417_v15, %v5458_v19 }
 0x1ce   : > { %7946 = vst [vmem:[#allocation56_spill] sm:$0xff] %v6201_v20  ;;  %7947 = vst [vmem:[#allocation57_spill] sm:$0xff] %v6206_v39  ;;  %vm1494_vm4 = vcmp.eq.s32.totalorder %v1417_v15, %v5460_v23  ;;  %v828_v46 = vmul.f32 %v4288_v52, %v5414_v47  ;;  %v3741_v41 = vsel %vm1493_vm14, 1.0, %v7915_v43  ;;  %v827_v53 = vmul.f32 %v4289_v56, %v5456_v42  ;;  %v4290_v52 = vld [vmem:[%s4644_s15 + $0xf8] sm:$0xff] }
 0x1cf   : > { %v3742_v63 = vsel %vm1494_vm4, 1.0, %v7915_v43  ;;  %3051 = vadd.xlane.f32.xlu0 %v3050_v36  ;;  %v6227_v25 = vsel %vm7735_vm5, 0.0, %v3741_v41  ;;  %3054 = vadd.xlane.f32.xlu1 %v3053_v30  ;;  %v3059_v47 = vadd.f32 %v6211_v22, %v6206_v39  ;;  %v844_v13 = vmul.f32 %v4290_v52, %v5904_v24  ;;  %v1423_v0 = vpop.permute.xlu1 %1422  ;;  %v4291_v41 = vld [vmem:[%s4644_s15 + $0xf0] sm:$0xff] }
 0x1d0   : > { %v6232_v15 = vsel %vm1293_vm7, 0.0, %v3742_v63  ;;  %vm1296_vm4 = vcmp.eq.s32.totalorder %v6201_v20, %v5433_v61  ;;  %vm1297_vm14 = vcmp.eq.s32.totalorder %v6201_v20, %v5445_v45  ;;  %vm1497_vm15 = vcmp.eq.s32.totalorder %v1423_v0, %v5458_v19  ;;  %3850 = vmatmul.mubr.bf16.gmra.mxu0 %v5378_v3 }
 0x1d1   : > { %v3056_v42 = vadd.f32 %v6232_v15, %v6227_v25  ;;  %vm1498_vm5 = vcmp.eq.s32.totalorder %v1423_v0, %v5460_v23  ;;  %v843_v56 = vmul.f32 %v4291_v41, %v5481_v6  ;;  %v3745_v30 = vsel %vm1497_vm15, 1.0, %v7915_v43  ;;  %3866 = vmatmul.mubr.bf16.gmra.mxu1 %v859_v57 }
 0x1d2   : > { %v3746_v24 = vsel %vm1498_vm5, 1.0, %v7915_v43  ;;  %v6253_v36 = vsel %vm1296_vm4, 0.0, %v3745_v30  ;;  %v852_v0 = vpack.c.bf16 %v828_v46, %v827_v53  ;;  %v2947_v30 = vld [vmem:[#allocation5 + $0x8] sm:$0xff]  ;;  %vm7748_vm15 = vcmask 7168   ;;  %v2946_v53 = vld [vmem:[#allocation5] sm:$0xff] }
 0x1d3   : > { %3057 = vadd.xlane.f32.xlu0 %v3056_v42  ;;  %7948 = vst [vmem:[#allocation58_spill] sm:$0xff] %v6253_v36  ;;  %v6258_v63 = vsel %vm1297_vm14, 0.0, %v3746_v24  ;;  %3060 = vadd.xlane.f32.xlu1 %v3059_v47  ;;  %v860_v52 = vpack.c.bf16 %v844_v13, %v843_v56  ;;  %v6263_v42 = vpop.permute.xlu0 %1425  ;;  %v6265_v41 = vpop.permute.xlu1 %1428  ;;  %v2948_v47 = vld [vmem:[#allocation5 + $0x10] sm:$0xff]  ;;  %v2949_v56 = vld [vmem:[#allocation5 + $0x18] sm:$0xff]  ;;  %vm7953_vm5 = vcmp.eq.s32.totalorder %v5431_v38, %v5433_v61 }
 0x1d4   : > { %7949 = vst [vmem:[#allocation59_spill] sm:$0xff] %v6258_v63  ;;  %v3062_v6 = vadd.f32 %v6258_v63, %v6253_v36  ;;  %3851 = vmatprep.mubr.bf16.mxu0 %v852_v0  ;;  %7950 = vst [vmem:[#allocation60_spill] sm:$0xff] %v6263_v42  ;;  %v2953_v63 = vld [vmem:[#allocation5 + $0x38] sm:$0xff] }
 0x1d5   : > { %3867 = vmatprep.mubr.bf16.mxu1 %v860_v52  ;;  %7951 = vst [vmem:[#allocation61_spill] sm:$0xff] %v6265_v41  ;;  %v2950_v41 = vld [vmem:[#allocation5 + $0x20] sm:$0xff] }
 0x1d7   : > { %3063 = vadd.xlane.f32.xlu0 %v3062_v6  ;;  %v6267_v24 = vpop.permute.xlu0 %1431 }
 0x1d8   : > { %3852 = vmatmul.mubr.bf16.gmra.mxu0 %v852_v0  ;;  %7952 = vst [vmem:[#allocation62_spill] sm:$0xff] %v6267_v24 }
 0x1d9   : > { %3868 = vmatmul.mubr.bf16.gmra.mxu1 %v860_v52 }
 0x215   : > { %v2983_v13 = vpop.xlane.xlu1 %2982 }
 0x216   : > { %v3075_v46 = vadd.f32 %v2983_v13, %v2947_v30  ;;  %v2951_v13 = vld [vmem:[#allocation5 + $0x28] sm:$0xff] }
 0x218   : > { %3107 = vst.msk [vmem:[#allocation5 + $0x8] sm:$0xff] %vm7748_vm15, %v3075_v46 }
 0x219   : > { %v2980_v3 = vpop.xlane.xlu0 %2979 }
 0x21a   : > { %v3074_v57 = vadd.f32 %v2980_v3, %v2946_v53  ;;  %v2952_v3 = vld [vmem:[#allocation5 + $0x30] sm:$0xff] }
 0x21c   : > { %3106 = vst.msk [vmem:[#allocation5] sm:$0xff] %vm7748_vm15, %v3074_v57 }
 0x21d   : > { %v2986_v0 = vpop.xlane.xlu0 %2985  ;;  %v2989_v52 = vpop.xlane.xlu1 %2988 }
 0x21e   : > { %v3076_v6 = vadd.f32 %v2986_v0, %v2948_v47  ;;  %v3077_v20 = vadd.f32 %v2989_v52, %v2949_v56  ;;  %v2954_v0 = vld [vmem:[#allocation5 + $0x40] sm:$0xff] }
 0x220   : > { %3108 = vst.msk [vmem:[#allocation5 + $0x10] sm:$0xff] %vm7748_vm15, %v3076_v6  ;;  %3109 = vst.msk [vmem:[#allocation5 + $0x18] sm:$0xff] %vm7748_vm15, %v3077_v20  ;;  %v2955_v20 = vld [vmem:[#allocation5 + $0x48] sm:$0xff] }
 0x221   : > { %v2992_v24 = vpop.xlane.xlu0 %2991 }
 0x222   : > { %v3078_v30 = vadd.f32 %v2992_v24, %v2950_v41 }
 0x224   : > { %3110 = vst.msk [vmem:[#allocation5 + $0x20] sm:$0xff] %vm7748_vm15, %v3078_v30  ;;  %v2956_v30 = vld [vmem:[#allocation5 + $0x50] sm:$0xff] }
 0x225   : > { %v2995_v46 = vpop.xlane.xlu1 %2994 }
 0x226   : > { %v3079_v53 = vadd.f32 %v2995_v46, %v2951_v13  ;;  %v2957_v13 = vld [vmem:[#allocation5 + $0x58] sm:$0xff] }
 0x228   : > { %3111 = vst.msk [vmem:[#allocation5 + $0x28] sm:$0xff] %vm7748_vm15, %v3079_v53 }
 0x22a   : > { %v2998_v57 = vpop.xlane.xlu0 %2997 }
 0x22b   : > { %v3080_v36 = vadd.f32 %v2998_v57, %v2952_v3  ;;  %v2958_v57 = vld [vmem:[#allocation5 + $0x60] sm:$0xff] }
 0x22d   : > { %3112 = vst.msk [vmem:[#allocation5 + $0x30] sm:$0xff] %vm7748_vm15, %v3080_v36 }
 0x22f   : > { %v3001_v47 = vpop.xlane.xlu1 %3000 }
 0x230   : > { %v3081_v56 = vadd.f32 %v3001_v47, %v2953_v63  ;;  %v2959_v63 = vld [vmem:[#allocation5 + $0x68] sm:$0xff] }
 0x232   : > { %3113 = vst.msk [vmem:[#allocation5 + $0x38] sm:$0xff] %vm7748_vm15, %v3081_v56 }
 0x233   : > { %v3004_v41 = vpop.xlane.xlu0 %3003 }
 0x234   : > { %v3007_v24 = vpop.xlane.xlu1 %3006  ;;  %v3082_v52 = vadd.f32 %v3004_v41, %v2954_v0  ;;  %v2960_v41 = vld [vmem:[#allocation5 + $0x70] sm:$0xff] }
 0x235   : > { %v3083_v6 = vadd.f32 %v3007_v24, %v2955_v20  ;;  %v2961_v24 = vld [vmem:[#allocation5 + $0x78] sm:$0xff] }
 0x236   : > { %3114 = vst.msk [vmem:[#allocation5 + $0x40] sm:$0xff] %vm7748_vm15, %v3082_v52 }
 0x237   : > { %3115 = vst.msk [vmem:[#allocation5 + $0x48] sm:$0xff] %vm7748_vm15, %v3083_v6 }
 0x239   : > { %v3010_v46 = vpop.xlane.xlu0 %3009  ;;  %v3013_v53 = vpop.xlane.xlu1 %3012 }
 0x23a   : > { %v3084_v3 = vadd.f32 %v3010_v46, %v2956_v30  ;;  %v3085_v36 = vadd.f32 %v3013_v53, %v2957_v13  ;;  %v2962_v46 = vld [vmem:[#allocation5 + $0x80] sm:$0xff]  ;;  %v2963_v53 = vld [vmem:[#allocation5 + $0x88] sm:$0xff] }
 0x23c   : > { %3116 = vst.msk [vmem:[#allocation5 + $0x50] sm:$0xff] %vm7748_vm15, %v3084_v3  ;;  %3117 = vst.msk [vmem:[#allocation5 + $0x58] sm:$0xff] %vm7748_vm15, %v3085_v36 }
 0x23d   : > { %v3019_v56 = vpop.xlane.xlu1 %3018 }
 0x23e   : > { %v3016_v47 = vpop.xlane.xlu0 %3015  ;;  %v3087_v20 = vadd.f32 %v3019_v56, %v2959_v63  ;;  %v2965_v56 = vld [vmem:[#allocation5 + $0x98] sm:$0xff] }
 0x23f   : > { %v3086_v0 = vadd.f32 %v3016_v47, %v2958_v57  ;;  %v2964_v47 = vld [vmem:[#allocation5 + $0x90] sm:$0xff] }
 0x240   : > { %3119 = vst.msk [vmem:[#allocation5 + $0x68] sm:$0xff] %vm7748_vm15, %v3087_v20 }
 0x241   : > { %3118 = vst.msk [vmem:[#allocation5 + $0x60] sm:$0xff] %vm7748_vm15, %v3086_v0  ;;  %v3025_v6 = vpop.xlane.xlu1 %3024 }
 0x242   : > { %v3022_v52 = vpop.xlane.xlu0 %3021  ;;  %v3089_v13 = vadd.f32 %v3025_v6, %v2961_v24  ;;  %v2967_v6 = vld [vmem:[#allocation5 + $0xa8] sm:$0xff] }
 0x243   : > { %v3088_v30 = vadd.f32 %v3022_v52, %v2960_v41  ;;  %v2966_v52 = vld [vmem:[#allocation5 + $0xa0] sm:$0xff] }
 0x244   : > { %3121 = vst.msk [vmem:[#allocation5 + $0x78] sm:$0xff] %vm7748_vm15, %v3089_v13 }
 0x245   : > { %3120 = vst.msk [vmem:[#allocation5 + $0x70] sm:$0xff] %vm7748_vm15, %v3088_v30 }
 0x246   : > { %v3028_v3 = vpop.xlane.xlu0 %3027  ;;  %v3031_v36 = vpop.xlane.xlu1 %3030 }
 0x247   : > { %v3090_v57 = vadd.f32 %v3028_v3, %v2962_v46  ;;  %v3091_v63 = vadd.f32 %v3031_v36, %v2963_v53  ;;  %v2968_v3 = vld [vmem:[#allocation5 + $0xb0] sm:$0xff]  ;;  %v2969_v36 = vld [vmem:[#allocation5 + $0xb8] sm:$0xff] }
 0x249   : > { %3122 = vst.msk [vmem:[#allocation5 + $0x80] sm:$0xff] %vm7748_vm15, %v3090_v57  ;;  %3123 = vst.msk [vmem:[#allocation5 + $0x88] sm:$0xff] %vm7748_vm15, %v3091_v63 }
 0x24a   : > { %v3037_v20 = vpop.xlane.xlu1 %3036 }
 0x24b   : > { %v3034_v0 = vpop.xlane.xlu0 %3033  ;;  %v3093_v24 = vadd.f32 %v3037_v20, %v2965_v56  ;;  %v2971_v20 = vld [vmem:[#allocation5 + $0xc8] sm:$0xff] }
 0x24c   : > { %v3092_v41 = vadd.f32 %v3034_v0, %v2964_v47  ;;  %v2970_v0 = vld [vmem:[#allocation5 + $0xc0] sm:$0xff] }
 0x24d   : > { %3125 = vst.msk [vmem:[#allocation5 + $0x98] sm:$0xff] %vm7748_vm15, %v3093_v24 }
 0x24e   : > { %3124 = vst.msk [vmem:[#allocation5 + $0x90] sm:$0xff] %vm7748_vm15, %v3092_v41  ;;  %v3043_v13 = vpop.xlane.xlu1 %3042 }
 0x24f   : > { %v3095_v53 = vadd.f32 %v3043_v13, %v2967_v6  ;;  %v2973_v13 = vld [vmem:[#allocation5 + $0xd8] sm:$0xff] }
 0x250   : > { %v3040_v30 = vpop.xlane.xlu0 %3039 }
 0x251   : > { %v3094_v46 = vadd.f32 %v3040_v30, %v2966_v52  ;;  %3127 = vst.msk [vmem:[#allocation5 + $0xa8] sm:$0xff] %vm7748_vm15, %v3095_v53  ;;  %v2972_v30 = vld [vmem:[#allocation5 + $0xd0] sm:$0xff] }
 0x253   : > { %3126 = vst.msk [vmem:[#allocation5 + $0xa0] sm:$0xff] %vm7748_vm15, %v3094_v46  ;;  %v3049_v63 = vpop.xlane.xlu1 %3048 }
 0x254   : > { %v3046_v57 = vpop.xlane.xlu0 %3045  ;;  %v3097_v56 = vadd.f32 %v3049_v63, %v2969_v36 }
 0x255   : > { %v3096_v47 = vadd.f32 %v3046_v57, %v2968_v3  ;;  %v2974_v57 = vld [vmem:[#allocation5 + $0xe0] sm:$0xff] }
 0x256   : > { %3129 = vst.msk [vmem:[#allocation5 + $0xb8] sm:$0xff] %vm7748_vm15, %v3097_v56 }
 0x257   : > { %3128 = vst.msk [vmem:[#allocation5 + $0xb0] sm:$0xff] %vm7748_vm15, %v3096_v47 }
 0x258   : > { %v3052_v41 = vpop.xlane.xlu0 %3051  ;;  %v3055_v24 = vpop.xlane.xlu1 %3054 }
 0x259   : > { %v3098_v52 = vadd.f32 %v3052_v41, %v2970_v0  ;;  %v3099_v6 = vadd.f32 %v3055_v24, %v2971_v20 }
 0x25b   : > { %3130 = vst.msk [vmem:[#allocation5 + $0xc0] sm:$0xff] %vm7748_vm15, %v3098_v52  ;;  %3131 = vst.msk [vmem:[#allocation5 + $0xc8] sm:$0xff] %vm7748_vm15, %v3099_v6 }
 0x25c   : > { %v3058_v46 = vpop.xlane.xlu0 %3057  ;;  %v3061_v53 = vpop.xlane.xlu1 %3060 }
 0x25d   : > { %v3100_v3 = vadd.f32 %v3058_v46, %v2972_v30  ;;  %v3101_v36 = vadd.f32 %v3061_v53, %v2973_v13 }
 0x25e   : > { %v943_v56 = vpop.f32.mrf.mxu0 }
 0x25f   : > { %3132 = vst.msk [vmem:[#allocation5 + $0xd0] sm:$0xff] %vm7748_vm15, %v3100_v3  ;;  %3133 = vst.msk [vmem:[#allocation5 + $0xd8] sm:$0xff] %vm7748_vm15, %v3101_v36  ;;  %v1102_v20 = vmul.f32 10.0, %v943_v56 }
 0x260   : > { %v3064_v63 = vpop.xlane.xlu0 %3063  ;;  %v1023_v0 = vpop.f32.mrf.mxu1 }
 0x261   : > { %v3102_v47 = vadd.f32 %v3064_v63, %v2974_v57  ;;  %v945_v41 = vpop.f32.mrf.mxu0  ;;  %v3753_v52 = vadd.f32 -1e+09, %v1102_v20  ;;  %v1134_v13 = vmul.f32 10.0, %v1023_v0  ;;  %v2722_v46 = vmul.f32 %v5549_v49, %v1102_v20 }
 0x262   : > { %v1025_v24 = vpop.f32.mrf.mxu1  ;;  %v1103_v6 = vmul.f32 10.0, %v945_v41 }
 0x263   : > { %3134 = vst.msk [vmem:[#allocation5 + $0xe0] sm:$0xff] %vm7748_vm15, %v3102_v47  ;;  %v1135_v43 = vmul.f32 10.0, %v1025_v24  ;;  %v947_v19 = vpop.f32.mrf.mxu0  ;;  %v6303_v47 = vsel %vm7953_vm5, %v3753_v52, %v1102_v20  ;;  %vm7954_vm15 = vcmp.eq.s32.totalorder %v5431_v38, %v5445_v45  ;;  %v2754_v27 = vmul.f32 %v6018_v60, %v1134_v13 }
 0x264   : > { %v1027_v30 = vpop.f32.mrf.mxu1  ;;  %v3754_v53 = vadd.f32 -1e+09, %v1103_v6  ;;  %v2723_v3 = vmul.f32 %v5555_v44, %v1103_v6  ;;  %v1104_v36 = vmul.f32 10.0, %v947_v19 }
 0x265   : > { %v949_v57 = vpop.f32.mrf.mxu0  ;;  %v2755_v56 = vmul.f32 %v6023_v62, %v1135_v43  ;;  %v3786_v44 = vadd.f32 -1e+09, %v1135_v43 }
 0x266   : > { %v1029_v63 = vpop.f32.mrf.mxu1  ;;  %v1105_v41 = vmul.f32 10.0, %v949_v57  ;;  %v2786_v23 = vadd.f32 %v2723_v3, %v2722_v46  ;;  %v6309_v49 = vsel %vm7954_vm15, %v3754_v53, %v1103_v6  ;;  %v2724_v20 = vmul.f32 %v5513_v11, %v1104_v36 }
 0x267   : > { %v953_v24 = vpop.f32.mrf.mxu0  ;;  %7955 = vst [vmem:[#allocation63_spill] sm:$0xff] %v6309_v49  ;;  %v1137_v19 = vmul.f32 10.0, %v1029_v63  ;;  %v1857_v0 = vmax.f32 %v6303_v47, %v6309_v49  ;;  %v3785_v46 = vadd.f32 -1e+09, %v1134_v13  ;;  %v1136_v3 = vmul.f32 10.0, %v1027_v30 }
 0x268   : > { %v2725_v62 = vmul.f32 %v5518_v14, %v1105_v41  ;;  %2787 = vadd.xlane.f32.xlu0 %v2786_v23  ;;  %v2834_v6 = vadd.f32 %v2755_v56, %v2754_v27  ;;  %v3756_v39 = vadd.f32 -1e+09, %v1105_v41  ;;  %v6320_v60 = vsel %vm1273_vm6, %v3786_v44, %v1135_v43 }
 0x269   : > { %v1033_v42 = vpop.f32.mrf.mxu1  ;;  %v955_v52 = vpop.f32.mrf.mxu0  ;;  %1858 = vmax.xlane.f32.xlu1 %v1857_v0  ;;  %v2757_v63 = vmul.f32 %v5990_v5, %v1137_v19  ;;  %v3755_v23 = vadd.f32 -1e+09, %v1104_v36  ;;  %v2756_v49 = vmul.f32 %v5979_v28, %v1136_v3  ;;  %v6326_v27 = vsel %vm1272_vm11, %v3785_v46, %v1134_v13 }
 0x26a   : > { %v2789_v53 = vadd.f32 %v2725_v62, %v2724_v20  ;;  %v3787_v30 = vadd.f32 -1e+09, %v1136_v3  ;;  %v3788_v56 = vadd.f32 -1e+09, %v1137_v19  ;;  %v1107_v5 = vmul.f32 10.0, %v955_v52 }
 0x26b   : > { %v1035_v57 = vpop.f32.mrf.mxu1  ;;  %v957_v38 = vpop.f32.mrf.mxu0  ;;  %v1905_v0 = vmax.f32 %v6326_v27, %v6320_v60  ;;  %v2837_v44 = vadd.f32 %v2757_v63, %v2756_v49  ;;  %vm7956_vm6 = vcmp.eq.s32.totalorder %v5454_v18, %v5445_v45  ;;  %v1106_v28 = vmul.f32 10.0, %v953_v24  ;;  %v7958_v63 = vld [vmem:[#allocation21_spill] sm:$0xff] }
 0x26c   : > { %2835 = vadd.xlane.f32.xlu0 %v2834_v6  ;;  %v6333_v20 = vsel %vm7956_vm6, %v3756_v39, %v1105_v41  ;;  %v1139_v17 = vmul.f32 10.0, %v1035_v57  ;;  %v1108_v13 = vmul.f32 10.0, %v957_v38  ;;  %vm7957_vm11 = vcmp.eq.s32.totalorder %v5454_v18, %v5433_v61 }
 0x26d   : > { %v1037_v11 = vpop.f32.mrf.mxu1  ;;  %v959_v14 = vpop.f32.mrf.mxu0  ;;  %2790 = vadd.xlane.f32.xlu1 %v2789_v53  ;;  %v6338_v52 = vsel %vm7957_vm11, %v3755_v23, %v1104_v36  ;;  %v2727_v46 = vmul.f32 %v5565_v4, %v1107_v5  ;;  %v6346_v39 = vsel %vm1274_vm8, %v3787_v30, %v1136_v3  ;;  %v6351_v41 = vsel %vm1275_vm10, %v3788_v56, %v1137_v19 }
 0x26e   : > { %v1109_v43 = vmul.f32 10.0, %v959_v14  ;;  %v1860_v49 = vmax.f32 %v6338_v52, %v6333_v20  ;;  %v1908_v36 = vmax.f32 %v6346_v39, %v6351_v41  ;;  %v2726_v4 = vmul.f32 %v5560_v2, %v1106_v28 }
 0x26f   : > { %v1039_v62 = vpop.f32.mrf.mxu1  ;;  %v963_v6 = vpop.f32.mrf.mxu0  ;;  %v1138_v57 = vmul.f32 10.0, %v1033_v42  ;;  %v2728_v3 = vmul.f32 %v7958_v63, %v1108_v13  ;;  %v1140_v14 = vmul.f32 10.0, %v1037_v11  ;;  %v2759_v54 = vmul.f32 %v6069_v59, %v1139_v17  ;;  %v7959_v59 = vld [vmem:[#allocation9_spill] sm:$0xff] }
 0x270   : > { %1906 = vmax.xlane.f32.xlu0 %v1905_v0  ;;  %v2729_v24 = vmul.f32 %v5592_v9, %v1109_v43  ;;  %v1141_v18 = vmul.f32 10.0, %v1039_v62  ;;  %v2792_v19 = vadd.f32 %v2727_v46, %v2726_v4  ;;  %v3758_v23 = vadd.f32 -1e+09, %v1107_v5 }
 0x271   : > { %2838 = vadd.xlane.f32.xlu1 %v2837_v44  ;;  %v1043_v38 = vpop.f32.mrf.mxu1  ;;  %v965_v53 = vpop.f32.mrf.mxu0  ;;  %v2758_v56 = vmul.f32 %v6064_v7, %v1138_v57  ;;  %v3760_v0 = vadd.f32 -1e+09, %v1109_v43  ;;  %v3757_v42 = vadd.f32 -1e+09, %v1106_v28  ;;  %v2760_v62 = vmul.f32 %v5995_v16, %v1140_v14  ;;  %v7961_v7 = vld [vmem:[#allocation20_spill] sm:$0xff] }
 0x272   : > { %v2761_v9 = vmul.f32 %v6007_v32, %v1141_v18  ;;  %v2795_v30 = vadd.f32 %v2729_v24, %v2728_v3  ;;  %vm7960_vm10 = vcmp.eq.s32.totalorder %v7959_v59, %v5445_v45  ;;  %vm7962_vm8 = vcmp.eq.s32.totalorder %v7961_v7, %v5445_v45 }
 0x273   : > { %v1045_v44 = vpop.f32.mrf.mxu1  ;;  %v967_v2 = vpop.f32.mrf.mxu0  ;;  %v2840_v11 = vadd.f32 %v2759_v54, %v2758_v56  ;;  %v6365_v46 = vsel %vm7960_vm10, %v3758_v23, %v1107_v5  ;;  %v6370_v4 = vsel %vm7962_vm8, %v3760_v0, %v1109_v43  ;;  %v3789_v3 = vadd.f32 -1e+09, %v1138_v57 }
 0x274   : > { %1861 = vmax.xlane.f32.xlu0 %v1860_v49  ;;  %v3759_v49 = vadd.f32 -1e+09, %v1108_v13  ;;  %v2843_v63 = vadd.f32 %v2761_v9, %v2760_v62  ;;  %v3791_v16 = vadd.f32 -1e+09, %v1140_v14  ;;  %vm7963_vm15 = vcmp.eq.s32.totalorder %v7959_v59, %v5433_v61 }
 0x275   : > { %1909 = vmax.xlane.f32.xlu1 %v1908_v36  ;;  %v3790_v36 = vadd.f32 -1e+09, %v1139_v17  ;;  %v1047_v32 = vpop.f32.mrf.mxu1  ;;  %v969_v24 = vpop.f32.mrf.mxu0  ;;  %v6375_v54 = vsel %vm7963_vm15, %v3757_v42, %v1106_v28  ;;  %v1111_v9 = vmul.f32 10.0, %v965_v53  ;;  %vm7964_vm5 = vcmp.eq.s32.totalorder %v7961_v7, %v5433_v61 }
 0x276   : > { %v1863_v5 = vmax.f32 %v6375_v54, %v6365_v46  ;;  %v6382_v23 = vsel %vm7964_vm5, %v3759_v49, %v1108_v13  ;;  %v1113_v43 = vmul.f32 10.0, %v969_v24  ;;  %vm7965_vm6 = vcmp.eq.s32.totalorder %v5630_v21, %v5445_v45  ;;  %v7967_v49 = vld [vmem:[#allocation26_spill] sm:$0xff] }
 0x277   : > { %v6389_v56 = vsel %vm7965_vm6, %v3790_v36, %v1139_v17  ;;  %v1110_v28 = vmul.f32 10.0, %v963_v6  ;;  %v1049_v0 = vpop.f32.mrf.mxu1  ;;  %v973_v53 = vpop.f32.mrf.mxu0  ;;  %v1143_v42 = vmul.f32 10.0, %v1045_v44  ;;  %v1112_v62 = vmul.f32 10.0, %v967_v2  ;;  %v7972_v44 = vld [vmem:[#allocation27_spill] sm:$0xff] }
 0x278   : > { %2793 = vadd.xlane.f32.xlu0 %v2792_v19  ;;  %v3792_v19 = vadd.f32 -1e+09, %v1141_v18  ;;  %vm7966_vm11 = vcmp.eq.s32.totalorder %v5630_v21, %v5433_v61  ;;  %vm7968_vm10 = vcmp.eq.s32.totalorder %v5767_v58, %v5433_v61  ;;  %vm7970_vm8 = vcmp.eq.s32.totalorder %v5767_v58, %v5445_v45  ;;  %v7973_v36 = vld [vmem:[#allocation23_spill] sm:$0xff] }
 0x279   : > { %2796 = vadd.xlane.f32.xlu1 %v2795_v30  ;;  %v1866_v30 = vmax.f32 %v6382_v23, %v6370_v4  ;;  %v6394_v13 = vsel %vm7966_vm11, %v3789_v3, %v1138_v57  ;;  %v6402_v6 = vsel %vm7968_vm10, %v3791_v16, %v1140_v14  ;;  %v2733_v2 = vmul.f32 %v7972_v44, %v1113_v43  ;;  %v1053_v7 = vpop.f32.mrf.mxu1  ;;  %v975_v3 = vpop.f32.mrf.mxu0 }
 0x27a   : > { %7969 = vst [vmem:[#allocation21_spill] sm:$0xff] %v6402_v6  ;;  %v6407_v17 = vsel %vm7970_vm8, %v3792_v19, %v1141_v18  ;;  %v1145_v21 = vmul.f32 10.0, %v1049_v0  ;;  %v2730_v59 = vmul.f32 %v7973_v36, %v1110_v28  ;;  %v1142_v24 = vmul.f32 10.0, %v1043_v38 }
 0x27b   : > { %7971 = vst [vmem:[#allocation9_spill] sm:$0xff] %v6407_v17  ;;  %v1914_v57 = vmax.f32 %v6402_v6, %v6407_v17  ;;  %v1144_v16 = vmul.f32 10.0, %v1047_v32  ;;  %v2763_v58 = vmul.f32 %v6112_v8, %v1143_v42  ;;  %v3762_v19 = vadd.f32 -1e+09, %v1111_v9  ;;  %v1055_v17 = vpop.f32.mrf.mxu1  ;;  %v977_v36 = vpop.f32.mrf.mxu0  ;;  %v7975_v8 = vld [vmem:[#allocation12_spill] sm:$0xff] }
 0x27c   : > { %2841 = vadd.xlane.f32.xlu0 %v2840_v11  ;;  %v2731_v11 = vmul.f32 %v7967_v49, %v1111_v9  ;;  %v2762_v49 = vmul.f32 %v6107_v26, %v1142_v24  ;;  %v3764_v44 = vadd.f32 -1e+09, %v1113_v43  ;;  %v3761_v38 = vadd.f32 -1e+09, %v1110_v28  ;;  %v7977_v26 = vld [vmem:[#allocation15_spill] sm:$0xff] }
 0x27d   : > { %2844 = vadd.xlane.f32.xlu1 %v2843_v63  ;;  %v1911_v63 = vmax.f32 %v6394_v13, %v6389_v56  ;;  %vm7976_vm15 = vcmp.eq.s32.totalorder %v7975_v8, %v5445_v45  ;;  %vm7978_vm5 = vcmp.eq.s32.totalorder %v7977_v26, %v5445_v45  ;;  %vm7979_vm6 = vcmp.eq.s32.totalorder %v7975_v8, %v5433_v61 }
 0x27e   : > { %v2798_v18 = vadd.f32 %v2731_v11, %v2730_v59  ;;  %v2846_v32 = vadd.f32 %v2763_v58, %v2762_v49  ;;  %v6421_v11 = vsel %vm7976_vm15, %v3762_v19, %v1111_v9  ;;  %v6426_v59 = vsel %vm7978_vm5, %v3764_v44, %v1113_v43 }
 0x27f   : > { %v6431_v58 = vsel %vm7979_vm6, %v3761_v38, %v1110_v28  ;;  %vm7980_vm11 = vcmp.eq.s32.totalorder %v7977_v26, %v5433_v61  ;;  %v1114_v28 = vmul.f32 10.0, %v973_v53  ;;  %v1147_v44 = vmul.f32 10.0, %v1055_v17  ;;  %v7987_v17 = vld [vmem:[#allocation34_spill] sm:$0xff] }
 0x280   : > { %1864 = vmax.xlane.f32.xlu0 %v1863_v5  ;;  %v7974_v5 = vld [vmem:[#allocation28_spill] sm:$0xff]  ;;  %v1869_v9 = vmax.f32 %v6431_v58, %v6421_v11  ;;  %v1116_v38 = vmul.f32 10.0, %v977_v36  ;;  %vm7981_vm10 = vcmp.eq.s32.totalorder %v5666_v51, %v5433_v61  ;;  %vm7985_vm8 = vcmp.eq.s32.totalorder %v5865_v10, %v5445_v45 }
 0x281   : > { %1867 = vmax.xlane.f32.xlu1 %v1866_v30  ;;  %v2732_v14 = vmul.f32 %v7974_v5, %v1112_v62  ;;  %v2765_v30 = vmul.f32 %v6050_v37, %v1145_v21  ;;  %v3763_v5 = vadd.f32 -1e+09, %v1112_v62  ;;  %v1057_v37 = vpop.f32.mrf.mxu1 }
 0x283   : > { %v2801_v0 = vadd.f32 %v2733_v2, %v2732_v14  ;;  %v979_v2 = vpop.f32.mrf.mxu0  ;;  %v3793_v14 = vadd.f32 -1e+09, %v1142_v24  ;;  %v6438_v19 = vsel %vm7980_vm11, %v3763_v5, %v1112_v62  ;;  %v1059_v49 = vpop.f32.mrf.mxu1 }
 0x284   : > { %1912 = vmax.xlane.f32.xlu0 %v1911_v63  ;;  %v2764_v63 = vmul.f32 %v6045_v33, %v1144_v16  ;;  %v3795_v33 = vadd.f32 -1e+09, %v1144_v16  ;;  %v1117_v43 = vmul.f32 10.0, %v979_v2  ;;  %v1149_v51 = vmul.f32 10.0, %v1059_v49 }
 0x285   : > { %1915 = vmax.xlane.f32.xlu1 %v1914_v57  ;;  %v3794_v57 = vadd.f32 -1e+09, %v1143_v42  ;;  %v6450_v62 = vsel %vm7981_vm10, %v3793_v14, %v1142_v24  ;;  %v1146_v2 = vmul.f32 10.0, %v1053_v7  ;;  %v1063_v26 = vpop.f32.mrf.mxu1  ;;  %v3765_v7 = vadd.f32 -1e+09, %v1114_v28 }
 0x286   : > { %v2849_v6 = vadd.f32 %v2765_v30, %v2764_v63  ;;  %v1115_v30 = vmul.f32 10.0, %v975_v3  ;;  %v983_v3 = vpop.f32.mrf.mxu0  ;;  %v7982_v63 = vld [vmem:[#allocation31_spill] sm:$0xff]  ;;  %v2737_v36 = vmul.f32 %v7987_v17, %v1117_v43  ;;  %v3768_v17 = vadd.f32 -1e+09, %v1117_v43 }
 0x287   : > { %vm7999_vm10 = vcmp.eq.s32.totalorder %v6013_v55, %v5445_v45 }
 0x288   : > { %2799 = vadd.xlane.f32.xlu0 %v2798_v18  ;;  %v3796_v18 = vadd.f32 -1e+09, %v1145_v21  ;;  %v2735_v5 = vmul.f32 %v7982_v63, %v1115_v30  ;;  %v985_v14 = vpop.f32.mrf.mxu0  ;;  %v2766_v63 = vmul.f32 %v6145_v35, %v1146_v2 }
 0x289   : > { %2802 = vadd.xlane.f32.xlu1 %v2801_v0  ;;  %v1872_v0 = vmax.f32 %v6438_v19, %v6426_v59 }
 0x28c   : > { %2847 = vadd.xlane.f32.xlu0 %v2846_v32 }
 0x28d   : > { %2850 = vadd.xlane.f32.xlu1 %v2849_v6  ;;  %v6445_v6 = vsel %vm1281_vm0, %v3794_v57, %v1143_v42  ;;  %vm7983_vm0 = vcmp.eq.s32.totalorder %v5865_v10, %v5433_v61  ;;  %v6463_v42 = vsel %vm7985_vm8, %v3796_v18, %v1145_v21  ;;  %v7988_v57 = vld [vmem:[#allocation32_spill] sm:$0xff]  ;;  %v2767_v10 = vmul.f32 %v6150_v40, %v1147_v44  ;;  %v7990_v40 = vld [vmem:[#allocation14_spill] sm:$0xff] }
 0x28e   : > { %v1917_v32 = vmax.f32 %v6450_v62, %v6445_v6  ;;  %v6458_v53 = vsel %vm7983_vm0, %v3795_v33, %v1144_v16  ;;  %7986 = vst [vmem:[#allocation26_spill] sm:$0xff] %v6463_v42  ;;  %v2734_v8 = vmul.f32 %v7988_v57, %v1114_v28  ;;  %v1148_v33 = vmul.f32 10.0, %v1057_v37  ;;  %v987_v57 = vpop.f32.mrf.mxu0 }
 0x28f   : > { %7984 = vst [vmem:[#allocation20_spill] sm:$0xff] %v6458_v53  ;;  %v1920_v24 = vmax.f32 %v6458_v53, %v6463_v42  ;;  %v3766_v18 = vadd.f32 -1e+09, %v1115_v30  ;;  %v1065_v42 = vpop.f32.mrf.mxu1  ;;  %v2852_v37 = vadd.f32 %v2767_v10, %v2766_v63  ;;  %vm7991_vm15 = vcmp.eq.s32.totalorder %v7990_v40, %v5445_v45 }
 0x290   : > { %1870 = vmax.xlane.f32.xlu0 %v1869_v9  ;;  %v7989_v9 = vld [vmem:[#allocation33_spill] sm:$0xff]  ;;  %v2804_v21 = vadd.f32 %v2735_v5, %v2734_v8  ;;  %v989_v35 = vpop.f32.mrf.mxu0  ;;  %v7992_v8 = vld [vmem:[#allocation22_spill] sm:$0xff]  ;;  %vm7995_vm6 = vcmp.eq.s32.totalorder %v7990_v40, %v5433_v61 }
 0x291   : > { %1873 = vmax.xlane.f32.xlu1 %v1872_v0  ;;  %v2736_v16 = vmul.f32 %v7989_v9, %v1116_v38  ;;  %v2769_v0 = vmul.f32 %v6102_v29, %v1149_v51  ;;  %v3767_v9 = vadd.f32 -1e+09, %v1116_v38  ;;  %v6477_v5 = vsel %vm7991_vm15, %v3766_v18, %v1115_v30 }
 0x292   : > { %v3800_v29 = vadd.f32 -1e+09, %v1149_v51  ;;  %vm7993_vm5 = vcmp.eq.s32.totalorder %v7992_v8, %v5445_v45  ;;  %v6487_v10 = vsel %vm7995_vm6, %v3765_v7, %v1114_v28  ;;  %vm7996_vm11 = vcmp.eq.s32.totalorder %v7992_v8, %v5433_v61 }
 0x293   : > { %v2807_v49 = vadd.f32 %v2737_v36, %v2736_v16  ;;  %v1067_v36 = vpop.f32.mrf.mxu1  ;;  %v6482_v16 = vsel %vm7993_vm5, %v3768_v17, %v1117_v43  ;;  %v1875_v30 = vmax.f32 %v6487_v10, %v6477_v5  ;;  %v6494_v18 = vsel %vm7996_vm11, %v3767_v9, %v1116_v38 }
 0x294   : > { %1918 = vmax.xlane.f32.xlu0 %v1917_v32  ;;  %v2768_v32 = vmul.f32 %v6094_v48, %v1148_v33  ;;  %7994 = vst [vmem:[#allocation27_spill] sm:$0xff] %v6482_v16  ;;  %v3797_v48 = vadd.f32 -1e+09, %v1146_v2  ;;  %7997 = vst [vmem:[#allocation23_spill] sm:$0xff] %v6494_v18  ;;  %v1878_v43 = vmax.f32 %v6494_v18, %v6482_v16  ;;  %v1118_v28 = vmul.f32 10.0, %v983_v3 }
 0x295   : > { %1921 = vmax.xlane.f32.xlu1 %v1920_v24  ;;  %v3798_v24 = vadd.f32 -1e+09, %v1147_v44  ;;  %v1069_v63 = vpop.f32.mrf.mxu1  ;;  %v6506_v17 = vsel %vm7999_vm10, %v3800_v29, %v1149_v51  ;;  %v1120_v38 = vmul.f32 10.0, %v987_v57  ;;  %v8005_v51 = vld [vmem:[#allocation38_spill] sm:$0xff]  ;;  %v1150_v29 = vmul.f32 10.0, %v1063_v26 }
 0x296   : > { %v2855_v53 = vadd.f32 %v2769_v0, %v2768_v32  ;;  %v1119_v0 = vmul.f32 10.0, %v985_v14  ;;  %v993_v14 = vpop.f32.mrf.mxu0  ;;  %8000 = vst [vmem:[#allocation12_spill] sm:$0xff] %v6506_v17  ;;  %v6511_v7 = vsel %vm1284_vm13, %v3797_v48, %v1146_v2  ;;  %v8002_v32 = vld [vmem:[#allocation40_spill] sm:$0xff]  ;;  %v1153_v57 = vmul.f32 10.0, %v1069_v63 }
 0x297   : > { %8001 = vst [vmem:[#allocation15_spill] sm:$0xff] %v6511_v7  ;;  %v2738_v2 = vmul.f32 %v8006_v31, %v1118_v28  ;;  %v3769_v26 = vadd.f32 -1e+09, %v1118_v28 }
 0x298   : > { %2805 = vadd.xlane.f32.xlu0 %v2804_v21  ;;  %v3799_v21 = vadd.f32 -1e+09, %v1148_v33  ;;  %v2739_v9 = vmul.f32 %v8002_v32, %v1119_v0  ;;  %v995_v8 = vpop.f32.mrf.mxu0  ;;  %v2770_v32 = vmul.f32 %v6187_v50, %v1150_v29 }
 0x299   : > { %2808 = vadd.xlane.f32.xlu1 %v2807_v49  ;;  %v1121_v49 = vmul.f32 10.0, %v989_v35  ;;  %v1073_v35 = vpop.f32.mrf.mxu1 }
 0x29a   : > { %v997_v31 = vpop.f32.mrf.mxu0 }
 0x29c   : > { %2853 = vadd.xlane.f32.xlu0 %v2852_v37  ;;  %v999_v50 = vpop.f32.mrf.mxu0 }
 0x29d   : > { %2856 = vadd.xlane.f32.xlu1 %v2855_v53  ;;  %v6501_v53 = vsel %vm1285_vm1, %v3798_v24, %v1147_v44  ;;  %v1151_v44 = vmul.f32 10.0, %v1065_v42  ;;  %vm8003_vm1 = vcmp.eq.s32.totalorder %v6013_v55, %v5433_v61  ;;  %v2741_v24 = vmul.f32 %v8005_v51, %v1121_v49  ;;  %v8007_v42 = vld [vmem:[#allocation37_spill] sm:$0xff] }
 0x29e   : > { %7998 = vst [vmem:[#allocation28_spill] sm:$0xff] %v6501_v53  ;;  %v1923_v3 = vmax.f32 %v6511_v7, %v6501_v53  ;;  %v6519_v37 = vsel %vm8003_vm1, %v3799_v21, %v1148_v33  ;;  %v2740_v48 = vmul.f32 %v8007_v42, %v1120_v38  ;;  %v2810_v33 = vadd.f32 %v2739_v9, %v2738_v2  ;;  %v8011_v2 = vld [vmem:[#allocation24_spill] sm:$0xff]  ;;  %v8060_v7 = vld [vmem:[#allocation19_spill] sm:$0xff] }
 0x29f   : > { %8004 = vst [vmem:[#allocation31_spill] sm:$0xff] %v6519_v37  ;;  %v1926_v40 = vmax.f32 %v6519_v37, %v6506_v17  ;;  %v2771_v55 = vmul.f32 %v6192_v1, %v1151_v44  ;;  %v3770_v21 = vadd.f32 -1e+09, %v1119_v0  ;;  %v3772_v51 = vadd.f32 -1e+09, %v1121_v49  ;;  %v1075_v17 = vpop.f32.mrf.mxu1  ;;  %v8008_v1 = vld [vmem:[#allocation13_spill] sm:$0xff] }
 0x2a0   : > { %1876 = vmax.xlane.f32.xlu0 %v1875_v30  ;;  %v1152_v30 = vmul.f32 10.0, %v1067_v36  ;;  %v2813_v63 = vadd.f32 %v2741_v24, %v2740_v48  ;;  %v3771_v42 = vadd.f32 -1e+09, %v1120_v38  ;;  %vm8009_vm13 = vcmp.eq.s32.totalorder %v8008_v1, %v5445_v45 }
 0x2a1   : > { %1879 = vmax.xlane.f32.xlu1 %v1878_v43  ;;  %v2773_v43 = vmul.f32 %v6170_v34, %v1153_v57  ;;  %v2858_v36 = vadd.f32 %v2771_v55, %v2770_v32  ;;  %v6533_v9 = vsel %vm8009_vm13, %v3770_v21, %v1119_v0  ;;  %v3804_v34 = vadd.f32 -1e+09, %v1153_v57  ;;  %v1077_v24 = vpop.f32.mrf.mxu1 }
 0x2a2   : > { %8010 = vst [vmem:[#allocation34_spill] sm:$0xff] %v6533_v9  ;;  %vm8012_vm0 = vcmp.eq.s32.totalorder %v8011_v2, %v5445_v45  ;;  %vm8014_vm8 = vcmp.eq.s32.totalorder %v8008_v1, %v5433_v61  ;;  %vm8016_vm15 = vcmp.eq.s32.totalorder %v8011_v2, %v5433_v61  ;;  %v8027_v2 = vld [vmem:[#allocation43_spill] sm:$0xff] }
 0x2a3   : > { %v6538_v48 = vsel %vm8012_vm0, %v3772_v51, %v1121_v49  ;;  %v6543_v55 = vsel %vm8014_vm8, %v3769_v26, %v1118_v28  ;;  %v6550_v21 = vsel %vm8016_vm15, %v3771_v42, %v1120_v38  ;;  %v1122_v28 = vmul.f32 10.0, %v993_v14  ;;  %v1079_v51 = vpop.f32.mrf.mxu1  ;;  %v8020_v26 = vld [vmem:[#allocation53_spill] sm:$0xff] }
 0x2a4   : > { %1924 = vmax.xlane.f32.xlu0 %v1923_v3  ;;  %v2772_v3 = vmul.f32 %v6165_v12, %v1152_v30  ;;  %8013 = vst [vmem:[#allocation32_spill] sm:$0xff] %v6538_v48  ;;  %v3801_v12 = vadd.f32 -1e+09, %v1150_v29  ;;  %8015 = vst [vmem:[#allocation33_spill] sm:$0xff] %v6543_v55  ;;  %v1881_v0 = vmax.f32 %v6543_v55, %v6533_v9  ;;  %v1124_v38 = vmul.f32 10.0, %v997_v31 }
 0x2a5   : > { %1927 = vmax.xlane.f32.xlu1 %v1926_v40  ;;  %v3802_v40 = vadd.f32 -1e+09, %v1151_v44  ;;  %8017 = vst [vmem:[#allocation14_spill] sm:$0xff] %v6550_v21  ;;  %v1884_v49 = vmax.f32 %v6550_v21, %v6538_v48  ;;  %v1157_v31 = vmul.f32 10.0, %v1079_v51  ;;  %v8030_v48 = vld [vmem:[#allocation57_spill] sm:$0xff]  ;;  %vm8061_vm0 = vcmp.eq.s32.totalorder %v8060_v7, %v5445_v45 }
 0x2a6   : > { %v2861_v37 = vadd.f32 %v2773_v43, %v2772_v3  ;;  %v1123_v43 = vmul.f32 10.0, %v995_v8  ;;  %v1003_v8 = vpop.f32.mrf.mxu0  ;;  %v6562_v3 = vsel %vm1291_vm12, %v3804_v34, %v1153_v57  ;;  %v6567_v42 = vsel %vm1288_vm9, %v3801_v12, %v1150_v29  ;;  %v8026_v57 = vld [vmem:[#allocation42_spill] sm:$0xff] }
 0x2a7   : > { %v6557_v32 = vsel %vm1289_vm2, %v3802_v40, %v1151_v44  ;;  %8021 = vst [vmem:[#allocation40_spill] sm:$0xff] %v6562_v3  ;;  %8022 = vst [vmem:[#allocation38_spill] sm:$0xff] %v6567_v42  ;;  %v1155_v44 = vmul.f32 10.0, %v1075_v17  ;;  %vm8024_vm2 = vcmp.eq.s32.totalorder %v8020_v26, %v5433_v61  ;;  %v2742_v29 = vmul.f32 %v8027_v2, %v1122_v28  ;;  %v8028_v17 = vld [vmem:[#allocation41_spill] sm:$0xff] }
 0x2a8   : > { %2811 = vadd.xlane.f32.xlu0 %v2810_v33  ;;  %v3803_v33 = vadd.f32 -1e+09, %v1152_v30  ;;  %8019 = vst [vmem:[#allocation22_spill] sm:$0xff] %v6557_v32  ;;  %v1929_v14 = vmax.f32 %v6567_v42, %v6557_v32  ;;  %v1154_v12 = vmul.f32 10.0, %v1073_v35  ;;  %v8029_v35 = vld [vmem:[#allocation35_spill] sm:$0xff] }
 0x2a9   : > { %2814 = vadd.xlane.f32.xlu1 %v2813_v63  ;;  %v1125_v63 = vmul.f32 10.0, %v999_v50  ;;  %v2775_v26 = vmul.f32 %v6232_v15, %v1155_v44  ;;  %v1197_v42 = vadd.s32 232, %v8029_v35  ;;  %v3806_v15 = vadd.f32 -1e+09, %v1155_v44 }
 0x2aa   : > { %v6575_v40 = vsel %vm8024_vm2, %v3803_v33, %v1152_v30  ;;  %v3774_v33 = vadd.f32 -1e+09, %v1123_v43  ;;  %v2774_v32 = vmul.f32 %v6227_v25, %v1154_v12  ;;  %v3808_v25 = vadd.f32 -1e+09, %v1157_v31 }
 0x2ab   : > { %8025 = vst [vmem:[#allocation39_spill] sm:$0xff] %v6575_v40  ;;  %v2745_v34 = vmul.f32 %v8026_v57, %v1125_v63  ;;  %v1932_v50 = vmax.f32 %v6575_v40, %v6562_v3  ;;  %v2777_v57 = vmul.f32 %v6211_v22, %v1157_v31  ;;  %v3776_v3 = vadd.f32 -1e+09, %v1125_v63 }
 0x2ac   : > { %2859 = vadd.xlane.f32.xlu0 %v2858_v36  ;;  %v8023_v36 = vld [vmem:[#allocation44_spill] sm:$0xff] }
 0x2ad   : > { %2862 = vadd.xlane.f32.xlu1 %v2861_v37  ;;  %v2743_v1 = vmul.f32 %v8023_v36, %v1123_v43  ;;  %v2744_v37 = vmul.f32 %v8028_v17, %v1124_v38  ;;  %v1156_v36 = vmul.f32 10.0, %v1077_v24  ;;  %v3775_v24 = vadd.f32 -1e+09, %v1124_v38 }
 0x2af   : > { %v2816_v30 = vadd.f32 %v2743_v1, %v2742_v29  ;;  %v2819_v51 = vadd.f32 %v2745_v34, %v2744_v37  ;;  %v2776_v17 = vmul.f32 %v8030_v48, %v1156_v36  ;;  %v8031_v29 = vld [vmem:[#allocation16_spill] sm:$0xff]  ;;  %v8037_v48 = vld [vmem:[#allocation10_spill] sm:$0xff] }
 0x2b0   : > { %1882 = vmax.xlane.f32.xlu0 %v1881_v0  ;;  %v1083_v0 = vpop.f32.mrf.mxu1  ;;  %vm8032_vm12 = vcmp.eq.s32.totalorder %v8031_v29, %v5445_v45  ;;  %vm8038_vm5 = vcmp.eq.s32.totalorder %v8031_v29, %v5433_v61 }
 0x2b1   : > { %1885 = vmax.xlane.f32.xlu1 %v1884_v49  ;;  %v1005_v49 = vpop.f32.mrf.mxu0  ;;  %v2867_v1 = vadd.f32 %v2777_v57, %v2776_v17  ;;  %v6590_v22 = vsel %vm8032_vm12, %v3774_v33, %v1123_v43  ;;  %v3807_v43 = vadd.f32 -1e+09, %v1156_v36  ;;  %v8042_v17 = vld [vmem:[#allocation55_spill] sm:$0xff] }
 0x2b2   : > { %v1085_v40 = vpop.f32.mrf.mxu1  ;;  %8033 = vst [vmem:[#allocation37_spill] sm:$0xff] %v6590_v22  ;;  %v1127_v33 = vmul.f32 10.0, %v1005_v49  ;;  %v6621_v49 = vmul.f32 10.0, %v1003_v8  ;;  %vm8049_vm1 = vcmp.eq.s32.totalorder %v8042_v17, %v5433_v61 }
 0x2b3   : > { %v1007_v2 = vpop.f32.mrf.mxu0 }
 0x2b4   : > { %1930 = vmax.xlane.f32.xlu0 %v1929_v14  ;;  %v3773_v14 = vadd.f32 -1e+09, %v1122_v28  ;;  %v1087_v34 = vpop.f32.mrf.mxu1 }
 0x2b5   : > { %1933 = vmax.xlane.f32.xlu1 %v1932_v50  ;;  %v2864_v50 = vadd.f32 %v2775_v26, %v2774_v32  ;;  %v1009_v37 = vpop.f32.mrf.mxu0  ;;  %v3805_v32 = vadd.f32 -1e+09, %v1154_v12 }
 0x2b6   : > { %v6603_v26 = vsel %vm8038_vm5, %v3773_v14, %v1122_v28  ;;  %v8044_v28 = vld [vmem:[#allocation11_spill] sm:$0xff]  ;;  %v8045_v14 = vld [vmem:[#allocation60_spill] sm:$0xff]  ;;  %vm8066_vm5 = vcmp.eq.s32.totalorder %v8060_v7, %v5433_v61 }
 0x2b7   : > { %8039 = vst [vmem:[#allocation24_spill] sm:$0xff] %v6603_v26  ;;  %v1887_v57 = vmax.f32 %v6603_v26, %v6590_v22  ;;  %vm1500_vm11 = vcmp.eq.s32.totalorder %v8045_v14, %v8044_v28  ;;  %v6623_v29 = vpop.f32.mrf.mxu0  ;;  %v6637_v8 = vsel %vm8049_vm1, %v3805_v32, %v1154_v12  ;;  %v1198_v32 = vadd.s32 240, %v8029_v35 }
 0x2b8   : > { %2817 = vadd.xlane.f32.xlu0 %v2816_v30  ;;  %v8034_v30 = vld [vmem:[#allocation25_spill] sm:$0xff]  ;;  %8050 = vst [vmem:[#allocation42_spill] sm:$0xff] %v6637_v8 }
 0x2b9   : > { %2820 = vadd.xlane.f32.xlu1 %v2819_v51  ;;  %vm8035_vm9 = vcmp.eq.s32.totalorder %v8034_v30, %v5445_v45  ;;  %v6598_v51 = vadd.s32 %v8037_v48, %v1197_v42  ;;  %vm8040_vm6 = vcmp.eq.s32.totalorder %v8034_v30, %v5433_v61  ;;  %v6671_v9 = vadd.s32 %v8037_v48, %v1198_v32 }
 0x2ba   : > { %v6595_v21 = vsel %vm8035_vm9, %v3776_v3, %v1125_v63  ;;  %v6610_v63 = vsel %vm8040_vm6, %v3775_v24, %v1124_v38  ;;  %v1129_v3 = vmul.f32 10.0, %v1009_v37  ;;  %v8046_v38 = vld [vmem:[#allocation54_spill] sm:$0xff]  ;;  %v6628_v24 = vsel %vm1295_vm3, %v3808_v25, %v1157_v31 }
 0x2bb   : > { %8036 = vst [vmem:[#allocation13_spill] sm:$0xff] %v6595_v21  ;;  %8041 = vst [vmem:[#allocation36_spill] sm:$0xff] %v6610_v63  ;;  %v1890_v42 = vmax.f32 %v6610_v63, %v6595_v21  ;;  %vm1299_vm10 = vcmp.eq.s32.totalorder %v6598_v51, %v5445_v45  ;;  %v8048_v37 = vld [vmem:[#allocation18_spill] sm:$0xff]  ;;  %vm8052_vm3 = vcmp.eq.s32.totalorder %v8046_v38, %v5433_v61  ;;  %v8054_v21 = vmov 0.0  }
 0x2bc   : > { %2865 = vadd.xlane.f32.xlu0 %v2864_v50  ;;  %v6617_v50 = vsel %vm1293_vm7, %v3806_v15, %v1155_v44  ;;  %8047 = vst [vmem:[#allocation44_spill] sm:$0xff] %v6628_v24  ;;  %vm1499_vm7 = vcmp.eq.s32.totalorder %v8045_v14, %v8048_v37  ;;  %v1128_v44 = vmul.f32 10.0, %v1007_v2  ;;  %v8051_v15 = vld [vmem:[#allocation50_spill] sm:$0xff]  ;;  %v6645_v25 = vsel %vm8052_vm3, %v3807_v43, %v1156_v36  ;;  %v8057_v43 = vld [vmem:[#allocation45_spill] sm:$0xff] }
 0x2bd   : > { %2868 = vadd.xlane.f32.xlu1 %v2867_v1  ;;  %8043 = vst [vmem:[#allocation53_spill] sm:$0xff] %v6617_v50  ;;  %v1089_v1 = vpop.f32.mrf.mxu1  ;;  %v2747_v30 = vmul.f32 %v8051_v15, %v1127_v33  ;;  %v1935_v31 = vmax.f32 %v6637_v8, %v6617_v50  ;;  %8053 = vst [vmem:[#allocation43_spill] sm:$0xff] %v6645_v25  ;;  %v3748_v63 = vsel %vm1500_vm11, 1.0, %v8054_v21  ;;  %v8055_v2 = vld [vmem:[#allocation46_spill] sm:$0xff]  ;;  %v1158_v15 = vmul.f32 10.0, %v1083_v0  ;;  %v1015_v8 = vpop.f32.mrf.mxu0 }
 0x2be   : > { %v1161_v22 = vmul.f32 10.0, %v1089_v1  ;;  %v1938_v12 = vmax.f32 %v6645_v25, %v6628_v24  ;;  %vm1298_vm13 = vcmp.eq.s32.totalorder %v6598_v51, %v5433_v61  ;;  %v3747_v36 = vsel %vm1499_vm7, 1.0, %v8054_v21  ;;  %v8059_v14 = vld [vmem:[#allocation58_spill] sm:$0xff] }
 0x2bf   : > { %v6654_v50 = vpop.f32.mrf.mxu1  ;;  %v2748_v1 = vmul.f32 %v8057_v43, %v1128_v44  ;;  %v1160_v38 = vmul.f32 10.0, %v1087_v34  ;;  %v6666_v0 = vsel %vm1299_vm10, 0.0, %v3748_v63  ;;  %v3778_v24 = vadd.f32 -1e+09, %v1127_v33  ;;  %v1017_v55 = vpop.f32.mrf.mxu0 }
 0x2c0   : > { %1888 = vmax.xlane.f32.xlu0 %v1887_v57  ;;  %v1159_v57 = vmul.f32 10.0, %v1085_v40  ;;  %v8056_v40 = vld [vmem:[#allocation49_spill] sm:$0xff]  ;;  %v2781_v25 = vmul.f32 %v6666_v0, %v1161_v22  ;;  %v6676_v34 = vsel %vm1298_vm13, 0.0, %v3747_v36  ;;  %v3780_v43 = vadd.f32 -1e+09, %v1129_v3 }
 0x2c1   : > { %1891 = vmax.xlane.f32.xlu1 %v1890_v42  ;;  %v2749_v42 = vmul.f32 %v8055_v2, %v1129_v3  ;;  %v2746_v17 = vmul.f32 %v8056_v40, %v6621_v49  ;;  %v8058_v2 = vld [vmem:[#allocation59_spill] sm:$0xff]  ;;  %v1095_v63 = vpop.f32.mrf.mxu1  ;;  %v1199_v32 = vadd.s32 248, %v8029_v35  ;;  %v6685_v36 = vsel %vm8061_vm0, %v3778_v24, %v1127_v33  ;;  %v8065_v33 = vld [vmem:[#allocation62_spill] sm:$0xff] }
 0x2c2   : > { %v2779_v40 = vmul.f32 %v8058_v2, %v1159_v57  ;;  %v3810_v2 = vadd.f32 -1e+09, %v1159_v57  ;;  %vm1300_vm8 = vcmp.eq.s32.totalorder %v6671_v9, %v5433_v61  ;;  %vm1301_vm15 = vcmp.eq.s32.totalorder %v6671_v9, %v5445_v45 }
 0x2c3   : > { %v2825_v26 = vadd.f32 %v2749_v42, %v2748_v1  ;;  %v3779_v42 = vadd.f32 -1e+09, %v1128_v44  ;;  %vm1504_vm9 = vcmp.eq.s32.totalorder %v8065_v33, %v8044_v28  ;;  %v3809_v24 = vadd.f32 -1e+09, %v1158_v15 }
 0x2c4   : > { %1936 = vmax.xlane.f32.xlu0 %v1935_v31  ;;  %v2822_v31 = vadd.f32 %v2747_v30, %v2746_v17  ;;  %v3777_v30 = vadd.f32 -1e+09, %v6621_v49  ;;  %v2780_v17 = vmul.f32 %v6676_v34, %v1160_v38  ;;  %v6714_v16 = vadd.s32 %v8037_v48, %v1199_v32  ;;  %v8069_v32 = vld [vmem:[#allocation52_spill] sm:$0xff] }
 0x2c5   : > { %1939 = vmax.xlane.f32.xlu1 %v1938_v12  ;;  %v2778_v12 = vmul.f32 %v8059_v14, %v1158_v15  ;;  %v1097_v14 = vpop.f32.mrf.mxu1  ;;  %vm1503_vm11 = vcmp.eq.s32.totalorder %v8065_v33, %v8048_v37  ;;  %v1162_v51 = vmul.f32 10.0, %v6654_v50  ;;  %vm8080_vm0 = vcmask 7168  }
 0x2c6   : > { %v2873_v53 = vadd.f32 %v2781_v25, %v2780_v17  ;;  %v8064_v25 = vld [vmem:[#allocation61_spill] sm:$0xff]  ;;  %v3811_v17 = vadd.f32 -1e+09, %v1160_v38  ;;  %v1164_v7 = vmul.f32 10.0, %v1097_v14 }
 0x2c7   : > { %v2870_v1 = vadd.f32 %v2779_v40, %v2778_v12  ;;  %v8062_v40 = vld [vmem:[#allocation30_spill] sm:$0xff]  ;;  %vm1502_vm12 = vcmp.eq.s32.totalorder %v8064_v25, %v8044_v28  ;;  %v6704_v12 = vsel %vm8066_vm5, %v3777_v30, %v6621_v49  ;;  %v6721_v49 = vsel %vm1297_vm14, %v3810_v2, %v1159_v57  ;;  %v1099_v30 = vpop.f32.mrf.mxu1  ;;  %v8070_v28 = vld [vmem:[#allocation48_spill] sm:$0xff]  ;;  %vm8087_vm5 = vmmov %vm8080_vm0 }
 0x2c8   : > { %2823 = vadd.xlane.f32.xlu0 %v2822_v31  ;;  %v3812_v31 = vadd.f32 -1e+09, %v1161_v22  ;;  %vm8063_vm2 = vcmp.eq.s32.totalorder %v8062_v40, %v5445_v45  ;;  %vm8067_vm6 = vcmp.eq.s32.totalorder %v8062_v40, %v5433_v61  ;;  %vm1501_vm7 = vcmp.eq.s32.totalorder %v8064_v25, %v8048_v37 }
 0x2c9   : > { %2826 = vadd.xlane.f32.xlu1 %v2825_v26  ;;  %v1019_v26 = vpop.f32.mrf.mxu0  ;;  %v6694_v35 = vsel %vm8063_vm2, %v3780_v43, %v1129_v3  ;;  %v1893_v3 = vmax.f32 %v6704_v12, %v6685_v36  ;;  %v6711_v43 = vsel %vm8067_vm6, %v3779_v42, %v1128_v44  ;;  %v1130_v44 = vmul.f32 10.0, %v6623_v29  ;;  %vm8083_vm2 = vmmov %vm8080_vm0 }
 0x2ca   : > { %v1896_v18 = vmax.f32 %v6711_v43, %v6694_v35  ;;  %v6730_v48 = vsel %vm1299_vm10, %v3812_v31, %v1161_v22  ;;  %v3750_v57 = vsel %vm1502_vm12, 1.0, %v8054_v21  ;;  %v1132_v42 = vmul.f32 10.0, %v1017_v55  ;;  %vm8084_vm12 = vmmov %vm8080_vm0 }
 0x2cb   : > { %v6741_v29 = vsel %vm1296_vm4, %v3809_v24, %v1158_v15  ;;  %v6749_v31 = vsel %vm1298_vm13, %v3811_v17, %v1160_v38  ;;  %v1165_v55 = vmul.f32 10.0, %v1099_v30  ;;  %vm1303_vm14 = vcmp.eq.s32.totalorder %v6714_v16, %v5445_v45  ;;  %v8072_v17 = vld [vmem:[#allocation47_spill] sm:$0xff]  ;;  %vm8088_vm6 = vmmov %vm8080_vm0 }
 0x2cc   : > { %2871 = vadd.xlane.f32.xlu0 %v2870_v1  ;;  %v1131_v1 = vmul.f32 10.0, %v1015_v8  ;;  %v3752_v8 = vsel %vm1504_vm9, 1.0, %v8054_v21  ;;  %v1941_v22 = vmax.f32 %v6741_v29, %v6721_v49  ;;  %v3749_v15 = vsel %vm1501_vm7, 1.0, %v8054_v21  ;;  %vm8085_vm9 = vmmov %vm8080_vm0 }
 0x2cd   : > { %2874 = vadd.xlane.f32.xlu1 %v2873_v53  ;;  %v1133_v53 = vmul.f32 10.0, %v1019_v26  ;;  %v1163_v26 = vmul.f32 10.0, %v1095_v63  ;;  %vm1302_vm4 = vcmp.eq.s32.totalorder %v6714_v16, %v5433_v61  ;;  %v8071_v63 = vld [vmem:[#allocation51_spill] sm:$0xff]  ;;  %v6764_v38 = vsel %vm1301_vm15, 0.0, %v3750_v57  ;;  %vm8090_vm7 = vmmov %vm8080_vm0 }
 0x2ce   : > { %v2751_v2 = vmul.f32 %v8069_v32, %v1131_v1  ;;  %v2750_v25 = vmul.f32 %v8071_v63, %v1130_v44  ;;  %v3751_v24 = vsel %vm1503_vm11, 1.0, %v8054_v21  ;;  %v6775_v50 = vsel %vm1303_vm14, 0.0, %v3752_v8  ;;  %vm8089_vm11 = vmmov %vm8080_vm0 }
 0x2cf   : > { %v2753_v40 = vmul.f32 %v8070_v28, %v1133_v53  ;;  %v2783_v30 = vmul.f32 %v6764_v38, %v1163_v26  ;;  %8073 = vst [vmem:[#allocation41_spill] sm:$0xff] %v6775_v50  ;;  %v6780_v57 = vsel %vm1300_vm8, 0.0, %v3749_v15  ;;  %v2785_v21 = vmul.f32 %v6775_v50, %v1165_v55 }
 0x2d0   : > { %1894 = vmax.xlane.f32.xlu0 %v1893_v3  ;;  %v2752_v3 = vmul.f32 %v8072_v17, %v1132_v42  ;;  %v2828_v32 = vadd.f32 %v2751_v2, %v2750_v25  ;;  %v6786_v14 = vsel %vm1302_vm4, 0.0, %v3751_v24  ;;  %v2782_v33 = vmul.f32 %v6780_v57, %v1162_v51  ;;  %v8074_v17 = vld [vmem:[#allocation17_spill] sm:$0xff] }
 0x2d1   : > { %1897 = vmax.xlane.f32.xlu1 %v1896_v18  ;;  %v1944_v18 = vmax.f32 %v6749_v31, %v6730_v48  ;;  %v3784_v28 = vadd.f32 -1e+09, %v1133_v53  ;;  %v3781_v8 = vadd.f32 -1e+09, %v1130_v44  ;;  %v2784_v2 = vmul.f32 %v6786_v14, %v1164_v7 }
 0x2d2   : > { %v2831_v37 = vadd.f32 %v2753_v40, %v2752_v3  ;;  %v2876_v15 = vadd.f32 %v2783_v30, %v2782_v33  ;;  %v3814_v63 = vadd.f32 -1e+09, %v1163_v26  ;;  %vm8075_vm10 = vcmp.eq.s32.totalorder %v8074_v17, %v5445_v45  ;;  %v8076_v3 = vld [vmem:[#allocation29_spill] sm:$0xff] }
 0x2d3   : > { %v2879_v25 = vadd.f32 %v2785_v21, %v2784_v2  ;;  %vm8077_vm1 = vcmp.eq.s32.totalorder %v8076_v3, %v5445_v45  ;;  %v3816_v50 = vadd.f32 -1e+09, %v1165_v55  ;;  %vm8078_vm3 = vcmp.eq.s32.totalorder %v8074_v17, %v5433_v61  ;;  %v2706_v2 = vld [vmem:[#allocation4 + $0x80] sm:$0xff]  ;;  %v2707_v17 = vld [vmem:[#allocation4 + $0x88] sm:$0xff] }
 0x2d4   : > { %1942 = vmax.xlane.f32.xlu0 %v1941_v22  ;;  %v3782_v22 = vadd.f32 -1e+09, %v1131_v1  ;;  %v6798_v24 = vsel %vm8077_vm1, %v3784_v28, %v1133_v53  ;;  %v6803_v30 = vsel %vm8078_vm3, %v3781_v8, %v1130_v44  ;;  %v3815_v21 = vadd.f32 -1e+09, %v1164_v7  ;;  %vm8100_vm1 = vmmov %vm8080_vm0 }
 0x2d5   : > { %1945 = vmax.xlane.f32.xlu1 %v1944_v18  ;;  %v3783_v18 = vadd.f32 -1e+09, %v1132_v42  ;;  %vm8079_vm13 = vcmp.eq.s32.totalorder %v8076_v3, %v5433_v61  ;;  %v6822_v44 = vsel %vm1303_vm14, %v3816_v50, %v1165_v55  ;;  %v2690_v55 = vld [vmem:[#allocation4] sm:$0xff]  ;;  %v2691_v61 = vld [vmem:[#allocation4 + $0x8] sm:$0xff]  ;;  %vm8092_vm14 = vmmov %vm8080_vm0 }
 0x2d6   : > { %v6793_v40 = vsel %vm8075_vm10, %v3782_v22, %v1131_v1  ;;  %v6817_v22 = vsel %vm1301_vm15, %v3814_v63, %v1163_v26  ;;  %v6834_v26 = vsel %vm1302_vm4, %v3815_v21, %v1164_v7  ;;  %v6838_v50 = vld [vmem:[#allocation2] sm:$0xff]  ;;  %vm8082_vm15 = vmmov %vm8080_vm0 }
 0x2d7   : > { %v6810_v1 = vsel %vm8079_vm13, %v3783_v18, %v1132_v42  ;;  %v1950_v45 = vmax.f32 %v6834_v26, %v6822_v44  ;;  %vm8094_vm4 = vmmov %vm8080_vm0 }
 0x2d8   : > { %2829 = vadd.xlane.f32.xlu0 %v2828_v32  ;;  %v3813_v32 = vadd.f32 -1e+09, %v1162_v51  ;;  %v1902_v53 = vmax.f32 %v6810_v1, %v6798_v24  ;;  %vm8098_vm10 = vmmov %vm8080_vm0 }
 0x2d9   : > { %2832 = vadd.xlane.f32.xlu1 %v2831_v37  ;;  %v1899_v37 = vmax.f32 %v6803_v30, %v6793_v40  ;;  %vm8103_vm3 = vmmov %vm8080_vm0 }
 0x2da   : > { %v6827_v42 = vsel %vm1300_vm8, %v3813_v32, %v1162_v51  ;;  %vm8081_vm8 = vmmov %vm8080_vm0 }
 0x2db   : > { %v1947_v33 = vmax.f32 %v6827_v42, %v6817_v22  ;;  %vm8104_vm13 = vmmov %vm8080_vm0 }
 0x2dc   : > { %2877 = vadd.xlane.f32.xlu0 %v2876_v15 }
 0x2dd   : > { %2880 = vadd.xlane.f32.xlu1 %v2879_v25  ;;  %v6848_v25 = vld [vmem:[#allocation2 + $0x80] sm:$0xff] }
 0x2e0   : > { %1900 = vmax.xlane.f32.xlu0 %v1899_v37 }
 0x2e1   : > { %1903 = vmax.xlane.f32.xlu1 %v1902_v53  ;;  %v6856_v53 = vld [vmem:[#allocation2 + $0x8] sm:$0xff] }
 0x2e4   : > { %1948 = vmax.xlane.f32.xlu0 %v1947_v33  ;;  %v6887_v33 = vld [vmem:[#allocation2 + $0x18] sm:$0xff] }
 0x2e5   : > { %1951 = vmax.xlane.f32.xlu1 %v1950_v45  ;;  %v6863_v45 = vld [vmem:[#allocation2 + $0x88] sm:$0xff]  ;;  %8093 = vst [vmem:[#allocation16_spill] sm:$0xff] %v6887_v33 }
 0x2f1   : > { %v2788_v28 = vpop.xlane.xlu0 %2787 }
 0x2f2   : > { %v2882_v9 = vadd.f32 %v2788_v28, %v2690_v55  ;;  %v1859_v51 = vpop.xlane.xlu1 %1858 }
 0x2f3   : > { %v6841_v8 = vmax.f32 %v6838_v50, %v1859_v51 }
 0x2f4   : > { %2914 = vst.msk [vmem:[#allocation4] sm:$0xff] %vm8080_vm0, %v2882_v9 }
 0x2f5   : > { %2658 = vst.msk [vmem:[#allocation2] sm:$0xff] %vm8081_vm8, %v6841_v8  ;;  %v2836_v7 = vpop.xlane.xlu0 %2835  ;;  %vm8105_vm8 = vmmov %vm8080_vm0 }
 0x2f6   : > { %v2898_v18 = vadd.f32 %v2836_v7, %v2706_v2  ;;  %v2791_v15 = vpop.xlane.xlu1 %2790  ;;  %v2692_v2 = vld [vmem:[#allocation4 + $0x10] sm:$0xff]  ;;  %v2693_v7 = vld [vmem:[#allocation4 + $0x18] sm:$0xff] }
 0x2f7   : > { %v2883_v63 = vadd.f32 %v2791_v15, %v2691_v61 }
 0x2f8   : > { %2930 = vst.msk [vmem:[#allocation4 + $0x80] sm:$0xff] %vm8082_vm15, %v2898_v18  ;;  %v6884_v18 = vld [vmem:[#allocation2 + $0x10] sm:$0xff]  ;;  %vm8107_vm15 = vmmov %vm8080_vm0 }
 0x2f9   : > { %2915 = vst.msk [vmem:[#allocation4 + $0x8] sm:$0xff] %vm8083_vm2, %v2883_v63  ;;  %v1907_v3 = vpop.xlane.xlu0 %1906  ;;  %8091 = vst [vmem:[#allocation57_spill] sm:$0xff] %v6884_v18 }
 0x2fa   : > { %v6853_v32 = vmax.f32 %v6848_v25, %v1907_v3  ;;  %v2839_v21 = vpop.xlane.xlu1 %2838  ;;  %2147 = vperm.xlu0 %3962, %v6841_v8   ;;  %vm8109_vm2 = vmmov %vm8080_vm0 }
 0x2fb   : > { %v2899_v37 = vadd.f32 %v2839_v21, %v2707_v17  ;;  %v2708_v21 = vld [vmem:[#allocation4 + $0x90] sm:$0xff] }
 0x2fc   : > { %2674 = vst.msk [vmem:[#allocation2 + $0x80] sm:$0xff] %vm8084_vm12, %v6853_v32  ;;  %2227 = vperm.xlu1 %3963, %v6853_v32   ;;  %vm8113_vm12 = vmmov %vm8080_vm0 }
 0x2fd   : > { %2931 = vst.msk [vmem:[#allocation4 + $0x88] sm:$0xff] %vm8085_vm9, %v2899_v37  ;;  %v1862_v55 = vpop.xlane.xlu0 %1861  ;;  %v2709_v37 = vld [vmem:[#allocation4 + $0x98] sm:$0xff]  ;;  %vm8115_vm9 = vmmov %vm8080_vm0 }
 0x2fe   : > { %v6867_v28 = vmax.f32 %v6856_v53, %v1862_v55  ;;  %v1910_v9 = vpop.xlane.xlu1 %1909 }
 0x2ff   : > { %v6870_v51 = vmax.f32 %v6863_v45, %v1910_v9 }
 0x300   : > { %2659 = vst.msk [vmem:[#allocation2 + $0x8] sm:$0xff] %vm8087_vm5, %v6867_v28  ;;  %2152 = vperm.xlu1 %3963, %v6867_v28   ;;  %vm8118_vm5 = vmmov %vm8080_vm0 }
 0x301   : > { %8086 = vst [vmem:[#allocation35_spill] sm:$0xff] %v6870_v51  ;;  %2675 = vst.msk [vmem:[#allocation2 + $0x88] sm:$0xff] %vm8088_vm6, %v6870_v51  ;;  %2232 = vperm.xlu0 %3962, %v6870_v51   ;;  %v2794_v15 = vpop.xlane.xlu0 %2793 }
 0x302   : > { %v2884_v63 = vadd.f32 %v2794_v15, %v2692_v2  ;;  %v2797_v17 = vpop.xlane.xlu1 %2796  ;;  %vm8119_vm6 = vmmov %vm8080_vm0 }
 0x303   : > { %v2885_v3 = vadd.f32 %v2797_v17, %v2693_v7  ;;  %v6896_v17 = vld [vmem:[#allocation2 + $0x90] sm:$0xff] }
 0x304   : > { %2916 = vst.msk [vmem:[#allocation4 + $0x10] sm:$0xff] %vm8089_vm11, %v2884_v63  ;;  %8097 = vst [vmem:[#allocation55_spill] sm:$0xff] %v6896_v17 }
 0x305   : > { %2917 = vst.msk [vmem:[#allocation4 + $0x18] sm:$0xff] %vm8090_vm7, %v2885_v3  ;;  %v2842_v55 = vpop.xlane.xlu0 %2841  ;;  %v6903_v3 = vld [vmem:[#allocation2 + $0x98] sm:$0xff]  ;;  %vm8120_vm11 = vmmov %vm8080_vm0 }
 0x306   : > { %v2900_v9 = vadd.f32 %v2842_v55, %v2708_v21  ;;  %v2845_v16 = vpop.xlane.xlu1 %2844  ;;  %8099 = vst [vmem:[#allocation11_spill] sm:$0xff] %v6903_v3  ;;  %vm8121_vm7 = vmmov %vm8080_vm0 }
 0x307   : > { %v2901_v61 = vadd.f32 %v2845_v16, %v2709_v37  ;;  %v6928_v16 = vld [vmem:[#allocation2 + $0x20] sm:$0xff] }
 0x308   : > { %2932 = vst.msk [vmem:[#allocation4 + $0x90] sm:$0xff] %vm8092_vm14, %v2900_v9  ;;  %8106 = vst [vmem:[#allocation18_spill] sm:$0xff] %v6928_v16 }
 0x309   : > { %2933 = vst.msk [vmem:[#allocation4 + $0x98] sm:$0xff] %vm8094_vm4, %v2901_v61  ;;  %v1865_v2 = vpop.xlane.xlu0 %1864  ;;  %v2695_v61 = vld [vmem:[#allocation4 + $0x28] sm:$0xff]  ;;  %vm8123_vm14 = vmmov %vm8080_vm0 }
 0x30a   : > { %v6891_v7 = vmax.f32 %v6884_v18, %v1865_v2  ;;  %v1868_v15 = vpop.xlane.xlu1 %1867  ;;  %v2694_v2 = vld [vmem:[#allocation4 + $0x20] sm:$0xff]  ;;  %vm8125_vm4 = vmmov %vm8080_vm0 }
 0x30b   : > { %v6894_v63 = vmax.f32 %v6887_v33, %v1868_v15  ;;  %v2711_v15 = vld [vmem:[#allocation4 + $0xa8] sm:$0xff] }
 0x30c   : > { %8095 = vst [vmem:[#allocation25_spill] sm:$0xff] %v6891_v7  ;;  %2660 = vst.msk [vmem:[#allocation2 + $0x10] sm:$0xff] %vm8098_vm10, %v6891_v7  ;;  %2157 = vperm.xlu1 %3963, %v6891_v7   ;;  %v2710_v7 = vld [vmem:[#allocation4 + $0xa0] sm:$0xff] }
 0x30d   : > { %8096 = vst [vmem:[#allocation10_spill] sm:$0xff] %v6894_v63  ;;  %2661 = vst.msk [vmem:[#allocation2 + $0x18] sm:$0xff] %vm8100_vm1, %v6894_v63  ;;  %2162 = vperm.xlu0 %3962, %v6894_v63   ;;  %v1913_v21 = vpop.xlane.xlu0 %1912 }
 0x30e   : > { %v6911_v37 = vmax.f32 %v6896_v17, %v1913_v21  ;;  %v1916_v55 = vpop.xlane.xlu1 %1915  ;;  %vm8129_vm10 = vmmov %vm8080_vm0 }
 0x30f   : > { %v6914_v9 = vmax.f32 %v6903_v3, %v1916_v55  ;;  %v6931_v3 = vld [vmem:[#allocation2 + $0x28] sm:$0xff]  ;;  %vm8131_vm1 = vmmov %vm8080_vm0 }
 0x310   : > { %8101 = vst [vmem:[#allocation60_spill] sm:$0xff] %v6911_v37  ;;  %2676 = vst.msk [vmem:[#allocation2 + $0x90] sm:$0xff] %vm8103_vm3, %v6911_v37  ;;  %2237 = vperm.xlu1 %3963, %v6911_v37  }
 0x311   : > { %8102 = vst [vmem:[#allocation54_spill] sm:$0xff] %v6914_v9  ;;  %2677 = vst.msk [vmem:[#allocation2 + $0x98] sm:$0xff] %vm8104_vm13, %v6914_v9  ;;  %2242 = vperm.xlu0 %3962, %v6914_v9   ;;  %v2800_v21 = vpop.xlane.xlu0 %2799 }
 0x312   : > { %v2886_v55 = vadd.f32 %v2800_v21, %v2694_v2  ;;  %v2803_v63 = vpop.xlane.xlu1 %2802  ;;  %8108 = vst [vmem:[#allocation50_spill] sm:$0xff] %v6931_v3  ;;  %vm8134_vm3 = vmmov %vm8080_vm0 }
 0x313   : > { %v2887_v33 = vadd.f32 %v2803_v63, %v2695_v61  ;;  %vm8135_vm13 = vmmov %vm8080_vm0 }
 0x314   : > { %2918 = vst.msk [vmem:[#allocation4 + $0x20] sm:$0xff] %vm8080_vm0, %v2886_v55 }
 0x315   : > { %2919 = vst.msk [vmem:[#allocation4 + $0x28] sm:$0xff] %vm8105_vm8, %v2887_v33  ;;  %v2848_v37 = vpop.xlane.xlu0 %2847  ;;  %v6940_v33 = vld [vmem:[#allocation2 + $0xa0] sm:$0xff]  ;;  %vm8136_vm8 = vmmov %vm8080_vm0 }
 0x316   : > { %v2902_v17 = vadd.f32 %v2848_v37, %v2710_v7  ;;  %v2851_v18 = vpop.xlane.xlu1 %2850  ;;  %8112 = vst [vmem:[#allocation45_spill] sm:$0xff] %v6940_v33  ;;  %v6947_v7 = vld [vmem:[#allocation2 + $0xa8] sm:$0xff] }
 0x317   : > { %v2903_v51 = vadd.f32 %v2851_v18, %v2711_v15  ;;  %8114 = vst [vmem:[#allocation59_spill] sm:$0xff] %v6947_v7  ;;  %v6972_v18 = vld [vmem:[#allocation2 + $0x30] sm:$0xff] }
 0x318   : > { %2934 = vst.msk [vmem:[#allocation4 + $0xa0] sm:$0xff] %vm8107_vm15, %v2902_v17  ;;  %8122 = vst [vmem:[#allocation30_spill] sm:$0xff] %v6972_v18 }
 0x319   : > { %2935 = vst.msk [vmem:[#allocation4 + $0xa8] sm:$0xff] %vm8109_vm2, %v2903_v51  ;;  %v1871_v2 = vpop.xlane.xlu0 %1870  ;;  %v2697_v51 = vld [vmem:[#allocation4 + $0x38] sm:$0xff]  ;;  %vm8138_vm15 = vmmov %vm8080_vm0 }
 0x31a   : > { %v6935_v63 = vmax.f32 %v6928_v16, %v1871_v2  ;;  %v1874_v61 = vpop.xlane.xlu1 %1873  ;;  %v2696_v2 = vld [vmem:[#allocation4 + $0x30] sm:$0xff]  ;;  %vm8140_vm2 = vmmov %vm8080_vm0 }
 0x31b   : > { %v6938_v21 = vmax.f32 %v6931_v3, %v1874_v61  ;;  %v2713_v61 = vld [vmem:[#allocation4 + $0xb8] sm:$0xff] }
 0x31c   : > { %8110 = vst [vmem:[#allocation46_spill] sm:$0xff] %v6935_v63  ;;  %2662 = vst.msk [vmem:[#allocation2 + $0x20] sm:$0xff] %vm8113_vm12, %v6935_v63  ;;  %2167 = vperm.xlu1 %3963, %v6935_v63   ;;  %v2712_v63 = vld [vmem:[#allocation4 + $0xb0] sm:$0xff] }
 0x31d   : > { %8111 = vst [vmem:[#allocation49_spill] sm:$0xff] %v6938_v21  ;;  %2663 = vst.msk [vmem:[#allocation2 + $0x28] sm:$0xff] %vm8115_vm9, %v6938_v21  ;;  %2172 = vperm.xlu0 %3962, %v6938_v21   ;;  %v1919_v17 = vpop.xlane.xlu0 %1918 }
 0x31e   : > { %v6955_v37 = vmax.f32 %v6940_v33, %v1919_v17  ;;  %v1922_v15 = vpop.xlane.xlu1 %1921  ;;  %vm8144_vm12 = vmmov %vm8080_vm0 }
 0x31f   : > { %v6958_v55 = vmax.f32 %v6947_v7, %v1922_v15  ;;  %v6975_v7 = vld [vmem:[#allocation2 + $0x38] sm:$0xff]  ;;  %vm8146_vm9 = vmmov %vm8080_vm0 }
 0x320   : > { %8116 = vst [vmem:[#allocation58_spill] sm:$0xff] %v6955_v37  ;;  %2678 = vst.msk [vmem:[#allocation2 + $0xa0] sm:$0xff] %vm8118_vm5, %v6955_v37  ;;  %2247 = vperm.xlu1 %3963, %v6955_v37  }
 0x321   : > { %8117 = vst [vmem:[#allocation19_spill] sm:$0xff] %v6958_v55  ;;  %2679 = vst.msk [vmem:[#allocation2 + $0xa8] sm:$0xff] %vm8119_vm6, %v6958_v55  ;;  %2252 = vperm.xlu0 %3962, %v6958_v55   ;;  %v2806_v17 = vpop.xlane.xlu0 %2805 }
 0x322   : > { %v2888_v15 = vadd.f32 %v2806_v17, %v2696_v2  ;;  %v2809_v21 = vpop.xlane.xlu1 %2808  ;;  %8124 = vst [vmem:[#allocation61_spill] sm:$0xff] %v6975_v7  ;;  %vm8149_vm5 = vmmov %vm8080_vm0 }
 0x323   : > { %v2889_v3 = vadd.f32 %v2809_v21, %v2697_v51  ;;  %vm8150_vm6 = vmmov %vm8080_vm0 }
 0x324   : > { %2920 = vst.msk [vmem:[#allocation4 + $0x30] sm:$0xff] %vm8120_vm11, %v2888_v15  ;;  %vm8151_vm11 = vmmov %vm8080_vm0 }
 0x325   : > { %2921 = vst.msk [vmem:[#allocation4 + $0x38] sm:$0xff] %vm8121_vm7, %v2889_v3  ;;  %v2854_v37 = vpop.xlane.xlu0 %2853  ;;  %v6984_v3 = vld [vmem:[#allocation2 + $0xb0] sm:$0xff]  ;;  %vm8152_vm7 = vmmov %vm8080_vm0 }
 0x326   : > { %v2904_v33 = vadd.f32 %v2854_v37, %v2712_v63  ;;  %v2857_v16 = vpop.xlane.xlu1 %2856  ;;  %8128 = vst [vmem:[#allocation52_spill] sm:$0xff] %v6984_v3  ;;  %v6991_v63 = vld [vmem:[#allocation2 + $0xb8] sm:$0xff] }
 0x327   : > { %v2905_v9 = vadd.f32 %v2857_v16, %v2713_v61  ;;  %8130 = vst [vmem:[#allocation48_spill] sm:$0xff] %v6991_v63  ;;  %v7016_v16 = vld [vmem:[#allocation2 + $0x40] sm:$0xff] }
 0x328   : > { %2936 = vst.msk [vmem:[#allocation4 + $0xb0] sm:$0xff] %vm8123_vm14, %v2904_v33  ;;  %8137 = vst [vmem:[#allocation17_spill] sm:$0xff] %v7016_v16 }
 0x329   : > { %2937 = vst.msk [vmem:[#allocation4 + $0xb8] sm:$0xff] %vm8125_vm4, %v2905_v9  ;;  %v1877_v2 = vpop.xlane.xlu0 %1876  ;;  %v2699_v9 = vld [vmem:[#allocation4 + $0x48] sm:$0xff]  ;;  %vm8154_vm14 = vmmov %vm8080_vm0 }
 0x32a   : > { %v6979_v21 = vmax.f32 %v6972_v18, %v1877_v2  ;;  %v1880_v51 = vpop.xlane.xlu1 %1879  ;;  %v2698_v2 = vld [vmem:[#allocation4 + $0x40] sm:$0xff]  ;;  %vm8156_vm4 = vmmov %vm8080_vm0 }
 0x32b   : > { %v6982_v17 = vmax.f32 %v6975_v7, %v1880_v51  ;;  %v2715_v51 = vld [vmem:[#allocation4 + $0xc8] sm:$0xff] }
 0x32c   : > { %8126 = vst [vmem:[#allocation62_spill] sm:$0xff] %v6979_v21  ;;  %2664 = vst.msk [vmem:[#allocation2 + $0x30] sm:$0xff] %vm8129_vm10, %v6979_v21  ;;  %2177 = vperm.xlu1 %3963, %v6979_v21   ;;  %v2714_v21 = vld [vmem:[#allocation4 + $0xc0] sm:$0xff] }
 0x32d   : > { %8127 = vst [vmem:[#allocation56_spill] sm:$0xff] %v6982_v17  ;;  %2665 = vst.msk [vmem:[#allocation2 + $0x38] sm:$0xff] %vm8131_vm1, %v6982_v17  ;;  %2182 = vperm.xlu0 %3962, %v6982_v17   ;;  %v1925_v33 = vpop.xlane.xlu0 %1924 }
 0x32e   : > { %v6999_v37 = vmax.f32 %v6984_v3, %v1925_v33  ;;  %v1928_v61 = vpop.xlane.xlu1 %1927  ;;  %vm8160_vm10 = vmmov %vm8080_vm0 }
 0x32f   : > { %v7002_v15 = vmax.f32 %v6991_v63, %v1928_v61  ;;  %v7019_v63 = vld [vmem:[#allocation2 + $0x48] sm:$0xff]  ;;  %vm8162_vm1 = vmmov %vm8080_vm0 }
 0x330   : > { %8132 = vst [vmem:[#allocation51_spill] sm:$0xff] %v6999_v37  ;;  %2680 = vst.msk [vmem:[#allocation2 + $0xb0] sm:$0xff] %vm8134_vm3, %v6999_v37  ;;  %2257 = vperm.xlu1 %3963, %v6999_v37  }
 0x331   : > { %8133 = vst [vmem:[#allocation47_spill] sm:$0xff] %v7002_v15  ;;  %2681 = vst.msk [vmem:[#allocation2 + $0xb8] sm:$0xff] %vm8135_vm13, %v7002_v15  ;;  %2262 = vperm.xlu0 %3962, %v7002_v15   ;;  %v2812_v33 = vpop.xlane.xlu0 %2811 }
 0x332   : > { %v2890_v61 = vadd.f32 %v2812_v33, %v2698_v2  ;;  %v2815_v17 = vpop.xlane.xlu1 %2814  ;;  %8139 = vst [vmem:[#allocation29_spill] sm:$0xff] %v7019_v63  ;;  %vm8165_vm3 = vmmov %vm8080_vm0 }
 0x333   : > { %v2891_v7 = vadd.f32 %v2815_v17, %v2699_v9  ;;  %vm8166_vm13 = vmmov %vm8080_vm0 }
 0x334   : > { %2922 = vst.msk [vmem:[#allocation4 + $0x40] sm:$0xff] %vm8080_vm0, %v2890_v61 }
 0x335   : > { %2923 = vst.msk [vmem:[#allocation4 + $0x48] sm:$0xff] %vm8136_vm8, %v2891_v7  ;;  %v2860_v37 = vpop.xlane.xlu0 %2859  ;;  %v7028_v7 = vld [vmem:[#allocation2 + $0xc0] sm:$0xff]  ;;  %vm8167_vm8 = vmmov %vm8080_vm0 }
 0x336   : > { %v2906_v3 = vadd.f32 %v2860_v37, %v2714_v21  ;;  %v2863_v18 = vpop.xlane.xlu1 %2862  ;;  %8143 = vst [vmem:[#allocation66_spill] sm:$0xff] %v7028_v7  ;;  %v7035_v21 = vld [vmem:[#allocation2 + $0xc8] sm:$0xff] }
 0x337   : > { %v2907_v55 = vadd.f32 %v2863_v18, %v2715_v51  ;;  %8145 = vst [vmem:[#allocation67_spill] sm:$0xff] %v7035_v21  ;;  %v7060_v18 = vld [vmem:[#allocation2 + $0x50] sm:$0xff] }
 0x338   : > { %2938 = vst.msk [vmem:[#allocation4 + $0xc0] sm:$0xff] %vm8138_vm15, %v2906_v3  ;;  %8153 = vst [vmem:[#allocation70_spill] sm:$0xff] %v7060_v18 }
 0x339   : > { %2939 = vst.msk [vmem:[#allocation4 + $0xc8] sm:$0xff] %vm8140_vm2, %v2907_v55  ;;  %v1883_v2 = vpop.xlane.xlu0 %1882  ;;  %v2701_v55 = vld [vmem:[#allocation4 + $0x58] sm:$0xff]  ;;  %vm8169_vm15 = vmmov %vm8080_vm0 }
 0x33a   : > { %v7023_v17 = vmax.f32 %v7016_v16, %v1883_v2  ;;  %v1886_v9 = vpop.xlane.xlu1 %1885  ;;  %v2700_v2 = vld [vmem:[#allocation4 + $0x50] sm:$0xff]  ;;  %vm8171_vm2 = vmmov %vm8080_vm0 }
 0x33b   : > { %v7026_v33 = vmax.f32 %v7019_v63, %v1886_v9  ;;  %v2717_v9 = vld [vmem:[#allocation4 + $0xd8] sm:$0xff] }
 0x33c   : > { %8141 = vst [vmem:[#allocation64_spill] sm:$0xff] %v7023_v17  ;;  %2666 = vst.msk [vmem:[#allocation2 + $0x40] sm:$0xff] %vm8144_vm12, %v7023_v17  ;;  %2187 = vperm.xlu1 %3963, %v7023_v17   ;;  %v2716_v17 = vld [vmem:[#allocation4 + $0xd0] sm:$0xff] }
 0x33d   : > { %8142 = vst [vmem:[#allocation65_spill] sm:$0xff] %v7026_v33  ;;  %2667 = vst.msk [vmem:[#allocation2 + $0x48] sm:$0xff] %vm8146_vm9, %v7026_v33  ;;  %2192 = vperm.xlu0 %3962, %v7026_v33   ;;  %v1931_v3 = vpop.xlane.xlu0 %1930 }
 0x33e   : > { %v7043_v37 = vmax.f32 %v7028_v7, %v1931_v3  ;;  %v1934_v51 = vpop.xlane.xlu1 %1933  ;;  %vm8175_vm12 = vmmov %vm8080_vm0 }
 0x33f   : > { %v7046_v61 = vmax.f32 %v7035_v21, %v1934_v51  ;;  %v7063_v21 = vld [vmem:[#allocation2 + $0x58] sm:$0xff]  ;;  %vm8177_vm9 = vmmov %vm8080_vm0 }
 0x340   : > { %8147 = vst [vmem:[#allocation68_spill] sm:$0xff] %v7043_v37  ;;  %2682 = vst.msk [vmem:[#allocation2 + $0xc0] sm:$0xff] %vm8149_vm5, %v7043_v37  ;;  %2267 = vperm.xlu1 %3963, %v7043_v37  }
 0x341   : > { %8148 = vst [vmem:[#allocation69_spill] sm:$0xff] %v7046_v61  ;;  %2683 = vst.msk [vmem:[#allocation2 + $0xc8] sm:$0xff] %vm8150_vm6, %v7046_v61  ;;  %2272 = vperm.xlu0 %3962, %v7046_v61   ;;  %v2818_v3 = vpop.xlane.xlu0 %2817 }
 0x342   : > { %v2892_v51 = vadd.f32 %v2818_v3, %v2700_v2  ;;  %v2821_v33 = vpop.xlane.xlu1 %2820  ;;  %8155 = vst [vmem:[#allocation71_spill] sm:$0xff] %v7063_v21  ;;  %vm8180_vm5 = vmmov %vm8080_vm0 }
 0x343   : > { %v2893_v63 = vadd.f32 %v2821_v33, %v2701_v55  ;;  %vm8181_vm6 = vmmov %vm8080_vm0 }
 0x344   : > { %2924 = vst.msk [vmem:[#allocation4 + $0x50] sm:$0xff] %vm8151_vm11, %v2892_v51  ;;  %vm8182_vm11 = vmmov %vm8080_vm0 }
 0x345   : > { %2925 = vst.msk [vmem:[#allocation4 + $0x58] sm:$0xff] %vm8152_vm7, %v2893_v63  ;;  %v2866_v37 = vpop.xlane.xlu0 %2865  ;;  %v7072_v63 = vld [vmem:[#allocation2 + $0xd0] sm:$0xff]  ;;  %vm8183_vm7 = vmmov %vm8080_vm0 }
 0x346   : > { %v2908_v7 = vadd.f32 %v2866_v37, %v2716_v17  ;;  %v2869_v16 = vpop.xlane.xlu1 %2868  ;;  %8159 = vst [vmem:[#allocation74_spill] sm:$0xff] %v7072_v63  ;;  %v7079_v17 = vld [vmem:[#allocation2 + $0xd8] sm:$0xff] }
 0x347   : > { %v2909_v15 = vadd.f32 %v2869_v16, %v2717_v9  ;;  %8161 = vst [vmem:[#allocation75_spill] sm:$0xff] %v7079_v17  ;;  %v7104_v16 = vld [vmem:[#allocation2 + $0x60] sm:$0xff] }
 0x348   : > { %2940 = vst.msk [vmem:[#allocation4 + $0xd0] sm:$0xff] %vm8154_vm14, %v2908_v7  ;;  %8168 = vst [vmem:[#allocation78_spill] sm:$0xff] %v7104_v16 }
 0x349   : > { %2941 = vst.msk [vmem:[#allocation4 + $0xd8] sm:$0xff] %vm8156_vm4, %v2909_v15  ;;  %v1889_v2 = vpop.xlane.xlu0 %1888  ;;  %v2703_v15 = vld [vmem:[#allocation4 + $0x68] sm:$0xff]  ;;  %vm8185_vm14 = vmmov %vm8080_vm0 }
 0x34a   : > { %v7067_v33 = vmax.f32 %v7060_v18, %v1889_v2  ;;  %v1892_v55 = vpop.xlane.xlu1 %1891  ;;  %v2702_v2 = vld [vmem:[#allocation4 + $0x60] sm:$0xff]  ;;  %vm8187_vm4 = vmmov %vm8080_vm0 }
 0x34b   : > { %v7070_v3 = vmax.f32 %v7063_v21, %v1892_v55  ;;  %v2719_v55 = vld [vmem:[#allocation4 + $0xe8] sm:$0xff] }
 0x34c   : > { %8157 = vst [vmem:[#allocation72_spill] sm:$0xff] %v7067_v33  ;;  %2668 = vst.msk [vmem:[#allocation2 + $0x50] sm:$0xff] %vm8160_vm10, %v7067_v33  ;;  %2197 = vperm.xlu1 %3963, %v7067_v33   ;;  %v2718_v33 = vld [vmem:[#allocation4 + $0xe0] sm:$0xff] }
 0x34d   : > { %8158 = vst [vmem:[#allocation73_spill] sm:$0xff] %v7070_v3  ;;  %2669 = vst.msk [vmem:[#allocation2 + $0x58] sm:$0xff] %vm8162_vm1, %v7070_v3  ;;  %2202 = vperm.xlu0 %3962, %v7070_v3   ;;  %v1937_v7 = vpop.xlane.xlu0 %1936 }
 0x34e   : > { %v7087_v37 = vmax.f32 %v7072_v63, %v1937_v7  ;;  %v1940_v9 = vpop.xlane.xlu1 %1939  ;;  %vm8191_vm10 = vmmov %vm8080_vm0 }
 0x34f   : > { %v7090_v51 = vmax.f32 %v7079_v17, %v1940_v9  ;;  %v7107_v17 = vld [vmem:[#allocation2 + $0x68] sm:$0xff]  ;;  %vm8193_vm1 = vmmov %vm8080_vm0 }
 0x350   : > { %8163 = vst [vmem:[#allocation76_spill] sm:$0xff] %v7087_v37  ;;  %2684 = vst.msk [vmem:[#allocation2 + $0xd0] sm:$0xff] %vm8165_vm3, %v7087_v37  ;;  %2277 = vperm.xlu1 %3963, %v7087_v37  }
 0x351   : > { %8164 = vst [vmem:[#allocation77_spill] sm:$0xff] %v7090_v51  ;;  %2685 = vst.msk [vmem:[#allocation2 + $0xd8] sm:$0xff] %vm8166_vm13, %v7090_v51  ;;  %2282 = vperm.xlu0 %3962, %v7090_v51   ;;  %v2824_v7 = vpop.xlane.xlu0 %2823 }
 0x352   : > { %v2894_v9 = vadd.f32 %v2824_v7, %v2702_v2  ;;  %v2827_v3 = vpop.xlane.xlu1 %2826  ;;  %8170 = vst [vmem:[#allocation79_spill] sm:$0xff] %v7107_v17  ;;  %vm8196_vm3 = vmmov %vm8080_vm0 }
 0x353   : > { %v2895_v21 = vadd.f32 %v2827_v3, %v2703_v15  ;;  %vm8197_vm13 = vmmov %vm8080_vm0 }
 0x354   : > { %2926 = vst.msk [vmem:[#allocation4 + $0x60] sm:$0xff] %vm8080_vm0, %v2894_v9 }
 0x355   : > { %2927 = vst.msk [vmem:[#allocation4 + $0x68] sm:$0xff] %vm8167_vm8, %v2895_v21  ;;  %v2872_v37 = vpop.xlane.xlu0 %2871  ;;  %v7116_v21 = vld [vmem:[#allocation2 + $0xe0] sm:$0xff]  ;;  %vm8243_vm8 = vmmov %vm8080_vm0 }
 0x356   : > { %v2910_v63 = vadd.f32 %v2872_v37, %v2718_v33  ;;  %v2875_v18 = vpop.xlane.xlu1 %2874  ;;  %8174 = vst [vmem:[#allocation82_spill] sm:$0xff] %v7116_v21  ;;  %v7123_v33 = vld [vmem:[#allocation2 + $0xe8] sm:$0xff] }
 0x357   : > { %v2911_v61 = vadd.f32 %v2875_v18, %v2719_v55  ;;  %8176 = vst [vmem:[#allocation83_spill] sm:$0xff] %v7123_v33  ;;  %v7148_v18 = vld [vmem:[#allocation2 + $0x70] sm:$0xff] }
 0x358   : > { %2942 = vst.msk [vmem:[#allocation4 + $0xe0] sm:$0xff] %vm8169_vm15, %v2910_v63  ;;  %8184 = vst [vmem:[#allocation86_spill] sm:$0xff] %v7148_v18 }
 0x359   : > { %2943 = vst.msk [vmem:[#allocation4 + $0xe8] sm:$0xff] %vm8171_vm2, %v2911_v61  ;;  %v1895_v2 = vpop.xlane.xlu0 %1894  ;;  %v2705_v61 = vld [vmem:[#allocation4 + $0x78] sm:$0xff]  ;;  %vm8244_vm15 = vmmov %vm8080_vm0 }
 0x35a   : > { %v7111_v3 = vmax.f32 %v7104_v16, %v1895_v2  ;;  %v1898_v15 = vpop.xlane.xlu1 %1897  ;;  %v2704_v2 = vld [vmem:[#allocation4 + $0x70] sm:$0xff]  ;;  %vm8251_vm2 = vmmov %vm8080_vm0 }
 0x35b   : > { %v7114_v7 = vmax.f32 %v7107_v17, %v1898_v15  ;;  %v2721_v15 = vld [vmem:[#allocation4 + $0xf8] sm:$0xff] }
 0x35c   : > { %8172 = vst [vmem:[#allocation80_spill] sm:$0xff] %v7111_v3  ;;  %2670 = vst.msk [vmem:[#allocation2 + $0x60] sm:$0xff] %vm8175_vm12, %v7111_v3  ;;  %2207 = vperm.xlu1 %3963, %v7111_v3   ;;  %v2720_v3 = vld [vmem:[#allocation4 + $0xf0] sm:$0xff] }
 0x35d   : > { %8173 = vst [vmem:[#allocation81_spill] sm:$0xff] %v7114_v7  ;;  %2671 = vst.msk [vmem:[#allocation2 + $0x68] sm:$0xff] %vm8177_vm9, %v7114_v7  ;;  %2212 = vperm.xlu0 %3962, %v7114_v7   ;;  %v1943_v63 = vpop.xlane.xlu0 %1942 }
 0x35e   : > { %v7131_v37 = vmax.f32 %v7116_v21, %v1943_v63  ;;  %v1946_v55 = vpop.xlane.xlu1 %1945  ;;  %vm8258_vm12 = vmmov %vm8080_vm0 }
 0x35f   : > { %v7134_v9 = vmax.f32 %v7123_v33, %v1946_v55  ;;  %v7151_v33 = vld [vmem:[#allocation2 + $0x78] sm:$0xff]  ;;  %vm8259_vm9 = vmmov %vm8080_vm0 }
 0x360   : > { %8178 = vst [vmem:[#allocation84_spill] sm:$0xff] %v7131_v37  ;;  %2686 = vst.msk [vmem:[#allocation2 + $0xe0] sm:$0xff] %vm8180_vm5, %v7131_v37  ;;  %2287 = vperm.xlu1 %3963, %v7131_v37  }
 0x361   : > { %8179 = vst [vmem:[#allocation85_spill] sm:$0xff] %v7134_v9  ;;  %2687 = vst.msk [vmem:[#allocation2 + $0xe8] sm:$0xff] %vm8181_vm6, %v7134_v9  ;;  %2292 = vperm.xlu0 %3962, %v7134_v9   ;;  %v2830_v63 = vpop.xlane.xlu0 %2829 }
 0x362   : > { %v2896_v55 = vadd.f32 %v2830_v63, %v2704_v2  ;;  %v2833_v7 = vpop.xlane.xlu1 %2832  ;;  %8186 = vst [vmem:[#allocation87_spill] sm:$0xff] %v7151_v33  ;;  %vm8260_vm5 = vmmov %vm8080_vm0 }
 0x363   : > { %v2897_v17 = vadd.f32 %v2833_v7, %v2705_v61  ;;  %vm8261_vm6 = vmmov %vm8080_vm0 }
 0x364   : > { %2928 = vst.msk [vmem:[#allocation4 + $0x70] sm:$0xff] %vm8182_vm11, %v2896_v55  ;;  %vm8262_vm11 = vmmov %vm8080_vm0 }
 0x365   : > { %2929 = vst.msk [vmem:[#allocation4 + $0x78] sm:$0xff] %vm8183_vm7, %v2897_v17  ;;  %v2878_v37 = vpop.xlane.xlu0 %2877  ;;  %v7160_v17 = vld [vmem:[#allocation2 + $0xf0] sm:$0xff]  ;;  %vm8275_vm7 = vmmov %vm8080_vm0 }
 0x366   : > { %v2912_v21 = vadd.f32 %v2878_v37, %v2720_v3  ;;  %v2881_v16 = vpop.xlane.xlu1 %2880  ;;  %8190 = vst [vmem:[#allocation90_spill] sm:$0xff] %v7160_v17  ;;  %v7167_v3 = vld [vmem:[#allocation2 + $0xf8] sm:$0xff] }
 0x367   : > { %v2913_v51 = vadd.f32 %v2881_v16, %v2721_v15  ;;  %8192 = vst [vmem:[#allocation91_spill] sm:$0xff] %v7167_v3 }
 0x368   : > { %2944 = vst.msk [vmem:[#allocation4 + $0xf0] sm:$0xff] %vm8185_vm14, %v2912_v21  ;;  %vm8276_vm14 = vmmov %vm8080_vm0 }
 0x369   : > { %2945 = vst.msk [vmem:[#allocation4 + $0xf8] sm:$0xff] %vm8187_vm4, %v2913_v51  ;;  %v1901_v2 = vpop.xlane.xlu0 %1900  ;;  %vm8277_vm4 = vmmov %vm8080_vm0 }
 0x36a   : > { %v7155_v7 = vmax.f32 %v7148_v18, %v1901_v2  ;;  %v1904_v61 = vpop.xlane.xlu1 %1903 }
 0x36b   : > { %v7158_v63 = vmax.f32 %v7151_v33, %v1904_v61 }
 0x36c   : > { %8188 = vst [vmem:[#allocation88_spill] sm:$0xff] %v7155_v7  ;;  %2672 = vst.msk [vmem:[#allocation2 + $0x70] sm:$0xff] %vm8191_vm10, %v7155_v7  ;;  %2217 = vperm.xlu1 %3963, %v7155_v7  }
 0x36d   : > { %8189 = vst [vmem:[#allocation89_spill] sm:$0xff] %v7158_v63  ;;  %2673 = vst.msk [vmem:[#allocation2 + $0x78] sm:$0xff] %vm8193_vm1, %v7158_v63  ;;  %2222 = vperm.xlu0 %3962, %v7158_v63   ;;  %v1949_v21 = vpop.xlane.xlu0 %1948 }
 0x36e   : > { %v7175_v37 = vmax.f32 %v7160_v17, %v1949_v21  ;;  %v1952_v15 = vpop.xlane.xlu1 %1951  ;;  %vm8278_vm10 = vmmov %vm8080_vm0 }
 0x36f   : > { %v7178_v55 = vmax.f32 %v7167_v3, %v1952_v15  ;;  %v8198_v3 = vld [vmem:[#allocation63_spill] sm:$0xff]  ;;  %vm8291_vm1 = vmmov %vm8080_vm0 }
 0x370   : > { %8194 = vst [vmem:[#allocation92_spill] sm:$0xff] %v7175_v37  ;;  %2688 = vst.msk [vmem:[#allocation2 + $0xf0] sm:$0xff] %vm8196_vm3, %v7175_v37  ;;  %2297 = vperm.xlu1 %3963, %v7175_v37  }
 0x371   : > { %8195 = vst [vmem:[#allocation93_spill] sm:$0xff] %v7178_v55  ;;  %2689 = vst.msk [vmem:[#allocation2 + $0xf8] sm:$0xff] %vm8197_vm13, %v7178_v55  ;;  %2302 = vperm.xlu0 %3962, %v7178_v55  }
 0x372   : > { %vm8292_vm3 = vmmov %vm8080_vm0 }
 0x373   : > { %vm8293_vm13 = vmmov %vm8080_vm0 }
 0x375   : > { %v2148_v16 = vpop.permute.xlu0 %2147 }
 0x376   : > { %v2305_v61 = vsub.f32 %v6303_v47, %v2148_v16  ;;  %v2306_v7 = vsub.f32 %v8198_v3, %v2148_v16 }
 0x377   : > { %v2228_v21 = vpop.permute.xlu1 %2227 }
 0x378   : > { %v2337_v15 = vsub.f32 %v6326_v27, %v2228_v21  ;;  %v2338_v51 = vsub.f32 %v6320_v60, %v2228_v21  ;;  %v2369_v27 = vmul.f32 1.442695, %v2305_v61  ;;  %v2371_v21 = vmul.f32 1.442695, %v2306_v7  ;;  %v8199_v61 = vld [vmem:[#allocation21_spill] sm:$0xff] }
 0x37a   : > { %v2433_v2 = vmul.f32 1.442695, %v2337_v15  ;;  %v2435_v17 = vmul.f32 1.442695, %v2338_v51 }
 0x37b   : > { %v2153_v63 = vpop.permute.xlu1 %2152 }
 0x37c   : > { %v2307_v33 = vsub.f32 %v6338_v52, %v2153_v63  ;;  %v2308_v37 = vsub.f32 %v6333_v20, %v2153_v63  ;;  %4092 = vpow2.f32 %v2433_v2  ;;  %v2233_v9 = vpop.permute.xlu0 %2232 }
 0x37d   : > { %4094 = vpow2.f32 %v2435_v17  ;;  %v2339_v60 = vsub.f32 %v6346_v39, %v2233_v9  ;;  %v2340_v51 = vsub.f32 %v6351_v41, %v2233_v9 }
 0x37e   : > { %v2373_v55 = vmul.f32 1.442695, %v2307_v33  ;;  %v2375_v18 = vmul.f32 1.442695, %v2308_v37 }
 0x37f   : > { %v2437_v52 = vmul.f32 1.442695, %v2339_v60  ;;  %v2439_v20 = vmul.f32 1.442695, %v2340_v51 }
 0x380   : > { %4096 = vpow2.f32 %v2373_v55 }
 0x381   : > { %4098 = vpow2.f32 %v2375_v18 }
 0x382   : > { %4100 = vpow2.f32 %v2369_v27 }
 0x383   : > { %4102 = vpow2.f32 %v2371_v21 }
 0x384   : > { %4104 = vpow2.f32 %v2437_v52 }
 0x385   : > { %4106 = vpow2.f32 %v2439_v20 }
 0x387   : > { %v2158_v47 = vpop.permute.xlu1 %2157 }
 0x388   : > { %v2309_v63 = vsub.f32 %v6375_v54, %v2158_v47  ;;  %v2310_v17 = vsub.f32 %v6365_v46, %v2158_v47  ;;  %v2163_v33 = vpop.permute.xlu0 %2162 }
 0x389   : > { %v2311_v16 = vsub.f32 %v6382_v23, %v2163_v33  ;;  %v2312_v3 = vsub.f32 %v6370_v4, %v2163_v33  ;;  %v4093_v39 = vpop.eup %4092  ;;  %v8200_v23 = vld [vmem:[#allocation9_spill] sm:$0xff] }
 0x38a   : > { %v2377_v18 = vmul.f32 1.442695, %v2309_v63  ;;  %v2379_v7 = vmul.f32 1.442695, %v2310_v17  ;;  %v4095_v41 = vpop.eup %4094  ;;  %v3065_v63 = vadd.f32 %v6666_v0, %v6676_v34 }
 0x38b   : > { %v2381_v9 = vmul.f32 1.442695, %v2311_v16  ;;  %v2383_v37 = vmul.f32 1.442695, %v2312_v3  ;;  %v2238_v55 = vpop.permute.xlu1 %2237  ;;  %v2545_v51 = vadd.f32 %v4095_v41, %v4093_v39 }
 0x38c   : > { %4108 = vpow2.f32 %v2377_v18  ;;  %v2341_v2 = vsub.f32 %v6394_v13, %v2238_v55  ;;  %v2342_v54 = vsub.f32 %v6389_v56, %v2238_v55  ;;  %v2243_v46 = vpop.permute.xlu0 %2242 }
 0x38d   : > { %4110 = vpow2.f32 %v2379_v7  ;;  %v2343_v15 = vsub.f32 %v8199_v61, %v2243_v46  ;;  %v2344_v27 = vsub.f32 %v8200_v23, %v2243_v46  ;;  %v4097_v4 = vpop.eup %4096 }
 0x38e   : > { %4112 = vpow2.f32 %v2381_v9  ;;  %v2441_v60 = vmul.f32 1.442695, %v2341_v2  ;;  %v2443_v21 = vmul.f32 1.442695, %v2342_v54  ;;  %v4099_v52 = vpop.eup %4098 }
 0x38f   : > { %4114 = vpow2.f32 %v2383_v37  ;;  %v2445_v20 = vmul.f32 1.442695, %v2343_v15  ;;  %v2447_v47 = vmul.f32 1.442695, %v2344_v27  ;;  %v4101_v13 = vpop.eup %4100  ;;  %v2500_v56 = vadd.f32 %v4099_v52, %v4097_v4 }
 0x390   : > { %4116 = vpow2.f32 %v2441_v60  ;;  %2546 = vadd.xlane.f32.xlu0 %v2545_v51  ;;  %v4103_v17 = vpop.eup %4102  ;;  %v8202_v51 = vld [vmem:[#allocation26_spill] sm:$0xff] }
 0x391   : > { %4118 = vpow2.f32 %v2443_v21  ;;  %v4105_v33 = vpop.eup %4104  ;;  %v2497_v16 = vadd.f32 %v4103_v17, %v4101_v13 }
 0x392   : > { %4120 = vpow2.f32 %v2445_v20  ;;  %v4107_v3 = vpop.eup %4106 }
 0x393   : > { %4122 = vpow2.f32 %v2447_v47  ;;  %v2548_v54 = vadd.f32 %v4107_v3, %v4105_v33 }
 0x394   : > { %2501 = vadd.xlane.f32.xlu0 %v2500_v56  ;;  %3066 = vadd.xlane.f32.xlu1 %v3065_v63 }
 0x397   : > { %v2168_v39 = vpop.permute.xlu1 %2167 }
 0x398   : > { %v2313_v18 = vsub.f32 %v6431_v58, %v2168_v39  ;;  %v2314_v7 = vsub.f32 %v6421_v11, %v2168_v39  ;;  %2498 = vadd.xlane.f32.xlu1 %v2497_v16  ;;  %v2173_v41 = vpop.permute.xlu0 %2172 }
 0x399   : > { %v4109_v9 = vpop.eup %4108  ;;  %v2315_v37 = vsub.f32 %v6438_v19, %v2173_v41  ;;  %v2316_v55 = vsub.f32 %v6426_v59, %v2173_v41  ;;  %v8201_v59 = vld [vmem:[#allocation20_spill] sm:$0xff] }
 0x39a   : > { %v4111_v0 = vpop.eup %4110  ;;  %v2385_v34 = vmul.f32 1.442695, %v2313_v18  ;;  %v2387_v2 = vmul.f32 1.442695, %v2314_v7 }
 0x39b   : > { %v4113_v46 = vpop.eup %4112  ;;  %v2389_v61 = vmul.f32 1.442695, %v2315_v37  ;;  %v2391_v15 = vmul.f32 1.442695, %v2316_v55  ;;  %v2248_v23 = vpop.permute.xlu1 %2247  ;;  %v2503_v27 = vadd.f32 %v4111_v0, %v4109_v9  ;;  %v8203_v9 = vld [vmem:[#allocation23_spill] sm:$0xff] }
 0x39c   : > { %v4115_v4 = vpop.eup %4114  ;;  %4124 = vpow2.f32 %v2385_v34  ;;  %v2345_v11 = vsub.f32 %v6450_v62, %v2248_v23  ;;  %v2346_v58 = vsub.f32 %v6445_v6, %v2248_v23  ;;  %2549 = vadd.xlane.f32.xlu1 %v2548_v54  ;;  %v2253_v60 = vpop.permute.xlu0 %2252  ;;  %v8204_v55 = vld [vmem:[#allocation27_spill] sm:$0xff] }
 0x39d   : > { %v4117_v19 = vpop.eup %4116  ;;  %4126 = vpow2.f32 %v2387_v2  ;;  %2504 = vadd.xlane.f32.xlu0 %v2503_v27  ;;  %v2347_v21 = vsub.f32 %v8201_v59, %v2253_v60  ;;  %v2348_v52 = vsub.f32 %v8202_v51, %v2253_v60  ;;  %v2506_v56 = vadd.f32 %v4115_v4, %v4113_v46  ;;  %v8207_v59 = vld [vmem:[#allocation31_spill] sm:$0xff]  ;;  %v8208_v51 = vld [vmem:[#allocation12_spill] sm:$0xff] }
 0x39e   : > { %v4119_v20 = vpop.eup %4118  ;;  %4128 = vpow2.f32 %v2389_v61  ;;  %v2449_v47 = vmul.f32 1.442695, %v2345_v11  ;;  %v2451_v13 = vmul.f32 1.442695, %v2346_v58  ;;  %v8205_v11 = vld [vmem:[#allocation15_spill] sm:$0xff]  ;;  %v8206_v58 = vld [vmem:[#allocation28_spill] sm:$0xff] }
 0x39f   : > { %v4121_v63 = vpop.eup %4120  ;;  %4130 = vpow2.f32 %v2391_v15  ;;  %v2453_v17 = vmul.f32 1.442695, %v2347_v21  ;;  %v2455_v62 = vmul.f32 1.442695, %v2348_v52  ;;  %v2551_v33 = vadd.f32 %v4119_v20, %v4117_v19 }
 0x3a0   : > { %v4123_v6 = vpop.eup %4122  ;;  %4132 = vpow2.f32 %v2449_v47  ;;  %2507 = vadd.xlane.f32.xlu1 %v2506_v56 }
 0x3a1   : > { %4134 = vpow2.f32 %v2451_v13  ;;  %2552 = vadd.xlane.f32.xlu0 %v2551_v33  ;;  %v2554_v16 = vadd.f32 %v4123_v6, %v4121_v63 }
 0x3a2   : > { %4136 = vpow2.f32 %v2453_v17 }
 0x3a3   : > { %4138 = vpow2.f32 %v2455_v62 }
 0x3a4   : > { %2555 = vadd.xlane.f32.xlu1 %v2554_v16 }
 0x3a7   : > { %v2178_v3 = vpop.permute.xlu1 %2177 }
 0x3a8   : > { %v2317_v39 = vsub.f32 %v6487_v10, %v2178_v3  ;;  %v2318_v18 = vsub.f32 %v6477_v5, %v2178_v3  ;;  %v2183_v7 = vpop.permute.xlu0 %2182 }
 0x3a9   : > { %v4125_v41 = vpop.eup %4124  ;;  %v2319_v37 = vsub.f32 %v8203_v9, %v2183_v7  ;;  %v2320_v0 = vsub.f32 %v8204_v55, %v2183_v7  ;;  %v8210_v7 = vld [vmem:[#allocation34_spill] sm:$0xff] }
 0x3aa   : > { %v4127_v34 = vpop.eup %4126  ;;  %v2393_v2 = vmul.f32 1.442695, %v2317_v39  ;;  %v2395_v54 = vmul.f32 1.442695, %v2318_v18  ;;  %v8209_v39 = vld [vmem:[#allocation33_spill] sm:$0xff]  ;;  %v8211_v55 = vld [vmem:[#allocation14_spill] sm:$0xff] }
 0x3ab   : > { %v4129_v46 = vpop.eup %4128  ;;  %v2397_v61 = vmul.f32 1.442695, %v2319_v37  ;;  %v2399_v15 = vmul.f32 1.442695, %v2320_v0  ;;  %v2258_v23 = vpop.permute.xlu1 %2257  ;;  %v2509_v27 = vadd.f32 %v4127_v34, %v4125_v41  ;;  %v8212_v34 = vld [vmem:[#allocation32_spill] sm:$0xff] }
 0x3ac   : > { %v4131_v4 = vpop.eup %4130  ;;  %4140 = vpow2.f32 %v2393_v2  ;;  %v2349_v10 = vsub.f32 %v8205_v11, %v2258_v23  ;;  %v2350_v5 = vsub.f32 %v8206_v58, %v2258_v23  ;;  %v2263_v60 = vpop.permute.xlu0 %2262  ;;  %v8213_v58 = vld [vmem:[#allocation38_spill] sm:$0xff] }
 0x3ad   : > { %v4133_v19 = vpop.eup %4132  ;;  %4142 = vpow2.f32 %v2395_v54  ;;  %2510 = vadd.xlane.f32.xlu0 %v2509_v27  ;;  %v2351_v21 = vsub.f32 %v8207_v59, %v2263_v60  ;;  %v2352_v52 = vsub.f32 %v8208_v51, %v2263_v60  ;;  %v2512_v20 = vadd.f32 %v4131_v4, %v4129_v46  ;;  %v8214_v60 = vld [vmem:[#allocation22_spill] sm:$0xff]  ;;  %v8215_v51 = vld [vmem:[#allocation39_spill] sm:$0xff] }
 0x3ae   : > { %v4135_v47 = vpop.eup %4134  ;;  %4144 = vpow2.f32 %v2397_v61  ;;  %v2457_v13 = vmul.f32 1.442695, %v2349_v10  ;;  %v2459_v56 = vmul.f32 1.442695, %v2350_v5 }
 0x3af   : > { %v4137_v63 = vpop.eup %4136  ;;  %4146 = vpow2.f32 %v2399_v15  ;;  %v2461_v17 = vmul.f32 1.442695, %v2351_v21  ;;  %v2463_v62 = vmul.f32 1.442695, %v2352_v52  ;;  %2513 = vadd.xlane.f32.xlu1 %v2512_v20  ;;  %v2557_v33 = vadd.f32 %v4135_v47, %v4133_v19  ;;  %v8216_v20 = vld [vmem:[#allocation40_spill] sm:$0xff] }
 0x3b0   : > { %v4139_v6 = vpop.eup %4138  ;;  %4148 = vpow2.f32 %v2457_v13 }
 0x3b1   : > { %4150 = vpow2.f32 %v2459_v56  ;;  %2558 = vadd.xlane.f32.xlu0 %v2557_v33  ;;  %v2560_v16 = vadd.f32 %v4139_v6, %v4137_v63 }
 0x3b2   : > { %4152 = vpow2.f32 %v2461_v17 }
 0x3b3   : > { %4154 = vpow2.f32 %v2463_v62  ;;  %2561 = vadd.xlane.f32.xlu1 %v2560_v16 }
 0x3b7   : > { %v2188_v3 = vpop.permute.xlu1 %2187 }
 0x3b8   : > { %v2321_v18 = vsub.f32 %v8209_v39, %v2188_v3  ;;  %v2322_v41 = vsub.f32 %v8210_v7, %v2188_v3  ;;  %v2193_v9 = vpop.permute.xlu0 %2192  ;;  %v8217_v7 = vld [vmem:[#allocation24_spill] sm:$0xff] }
 0x3b9   : > { %v4141_v37 = vpop.eup %4140  ;;  %v2323_v0 = vsub.f32 %v8211_v55, %v2193_v9  ;;  %v2324_v2 = vsub.f32 %v8212_v34, %v2193_v9  ;;  %v8218_v9 = vld [vmem:[#allocation37_spill] sm:$0xff]  ;;  %v8219_v34 = vld [vmem:[#allocation36_spill] sm:$0xff] }
 0x3ba   : > { %v4143_v54 = vpop.eup %4142  ;;  %v2401_v46 = vmul.f32 1.442695, %v2321_v18  ;;  %v2403_v61 = vmul.f32 1.442695, %v2322_v41 }
 0x3bb   : > { %v4145_v15 = vpop.eup %4144  ;;  %v2405_v23 = vmul.f32 1.442695, %v2323_v0  ;;  %v2407_v27 = vmul.f32 1.442695, %v2324_v2  ;;  %v2268_v4 = vpop.permute.xlu1 %2267  ;;  %v2515_v11 = vadd.f32 %v4143_v54, %v4141_v37  ;;  %v8220_v54 = vld [vmem:[#allocation13_spill] sm:$0xff] }
 0x3bc   : > { %v4147_v10 = vpop.eup %4146  ;;  %4156 = vpow2.f32 %v2401_v46  ;;  %v2353_v5 = vsub.f32 %v8213_v58, %v2268_v4  ;;  %v2354_v19 = vsub.f32 %v8214_v60, %v2268_v4  ;;  %v2273_v59 = vpop.permute.xlu0 %2272  ;;  %v8221_v60 = vld [vmem:[#allocation42_spill] sm:$0xff] }
 0x3bd   : > { %v4149_v21 = vpop.eup %4148  ;;  %4158 = vpow2.f32 %v2403_v61  ;;  %2516 = vadd.xlane.f32.xlu0 %v2515_v11  ;;  %v2355_v52 = vsub.f32 %v8215_v51, %v2273_v59  ;;  %v2356_v47 = vsub.f32 %v8216_v20, %v2273_v59  ;;  %v2518_v13 = vadd.f32 %v4147_v10, %v4145_v15  ;;  %v8222_v59 = vld [vmem:[#allocation53_spill] sm:$0xff]  ;;  %v8223_v20 = vld [vmem:[#allocation43_spill] sm:$0xff] }
 0x3be   : > { %v4151_v56 = vpop.eup %4150  ;;  %4160 = vpow2.f32 %v2405_v23  ;;  %v2465_v63 = vmul.f32 1.442695, %v2353_v5  ;;  %v2467_v17 = vmul.f32 1.442695, %v2354_v19 }
 0x3bf   : > { %v4153_v62 = vpop.eup %4152  ;;  %4162 = vpow2.f32 %v2407_v27  ;;  %v2469_v33 = vmul.f32 1.442695, %v2355_v52  ;;  %v2471_v6 = vmul.f32 1.442695, %v2356_v47  ;;  %2519 = vadd.xlane.f32.xlu1 %v2518_v13  ;;  %v2563_v16 = vadd.f32 %v4151_v56, %v4149_v21  ;;  %v8224_v13 = vld [vmem:[#allocation44_spill] sm:$0xff] }
 0x3c0   : > { %v4155_v3 = vpop.eup %4154  ;;  %4164 = vpow2.f32 %v2465_v63 }
 0x3c1   : > { %4166 = vpow2.f32 %v2467_v17  ;;  %2564 = vadd.xlane.f32.xlu0 %v2563_v16  ;;  %v2566_v39 = vadd.f32 %v4155_v3, %v4153_v62 }
 0x3c2   : > { %4168 = vpow2.f32 %v2469_v33 }
 0x3c3   : > { %4170 = vpow2.f32 %v2471_v6  ;;  %2567 = vadd.xlane.f32.xlu1 %v2566_v39 }
 0x3c7   : > { %v2198_v18 = vpop.permute.xlu1 %2197 }
 0x3c8   : > { %v2325_v41 = vsub.f32 %v8217_v7, %v2198_v18  ;;  %v2326_v37 = vsub.f32 %v8218_v9, %v2198_v18  ;;  %v2203_v55 = vpop.permute.xlu0 %2202 }
 0x3c9   : > { %v4157_v0 = vpop.eup %4156  ;;  %v2327_v2 = vsub.f32 %v8219_v34, %v2203_v55  ;;  %v2328_v46 = vsub.f32 %v8220_v54, %v2203_v55 }
 0x3ca   : > { %v4159_v61 = vpop.eup %4158  ;;  %v2409_v15 = vmul.f32 1.442695, %v2325_v41  ;;  %v2411_v23 = vmul.f32 1.442695, %v2326_v37 }
 0x3cb   : > { %v4161_v27 = vpop.eup %4160  ;;  %v2413_v4 = vmul.f32 1.442695, %v2327_v2  ;;  %v2415_v11 = vmul.f32 1.442695, %v2328_v46  ;;  %v2278_v10 = vpop.permute.xlu1 %2277  ;;  %v2521_v58 = vadd.f32 %v4159_v61, %v4157_v0 }
 0x3cc   : > { %v4163_v5 = vpop.eup %4162  ;;  %4172 = vpow2.f32 %v2409_v15  ;;  %v2357_v19 = vsub.f32 %v8221_v60, %v2278_v10  ;;  %v2358_v21 = vsub.f32 %v8222_v59, %v2278_v10  ;;  %v2283_v51 = vpop.permute.xlu0 %2282 }
 0x3cd   : > { %v4165_v52 = vpop.eup %4164  ;;  %4174 = vpow2.f32 %v2411_v23  ;;  %2522 = vadd.xlane.f32.xlu0 %v2521_v58  ;;  %v2359_v47 = vsub.f32 %v8223_v20, %v2283_v51  ;;  %v2360_v56 = vsub.f32 %v8224_v13, %v2283_v51  ;;  %v2524_v63 = vadd.f32 %v4163_v5, %v4161_v27 }
 0x3ce   : > { %v4167_v17 = vpop.eup %4166  ;;  %4176 = vpow2.f32 %v2413_v4  ;;  %v2473_v62 = vmul.f32 1.442695, %v2357_v19  ;;  %v2475_v33 = vmul.f32 1.442695, %v2358_v21 }
 0x3cf   : > { %v4169_v6 = vpop.eup %4168  ;;  %4178 = vpow2.f32 %v2415_v11  ;;  %v2477_v16 = vmul.f32 1.442695, %v2359_v47  ;;  %v2479_v3 = vmul.f32 1.442695, %v2360_v56  ;;  %2525 = vadd.xlane.f32.xlu1 %v2524_v63  ;;  %v2569_v39 = vadd.f32 %v4167_v17, %v4165_v52 }
 0x3d0   : > { %v4171_v18 = vpop.eup %4170  ;;  %4180 = vpow2.f32 %v2473_v62 }
 0x3d1   : > { %4182 = vpow2.f32 %v2475_v33  ;;  %2570 = vadd.xlane.f32.xlu0 %v2569_v39  ;;  %v2572_v7 = vadd.f32 %v4171_v18, %v4169_v6 }
 0x3d2   : > { %4184 = vpow2.f32 %v2477_v16 }
 0x3d3   : > { %4186 = vpow2.f32 %v2479_v3  ;;  %2573 = vadd.xlane.f32.xlu1 %v2572_v7 }
 0x3d7   : > { %v2208_v41 = vpop.permute.xlu1 %2207 }
 0x3d8   : > { %v2329_v9 = vsub.f32 %v6704_v12, %v2208_v41  ;;  %v2330_v37 = vsub.f32 %v6685_v36, %v2208_v41  ;;  %v2213_v55 = vpop.permute.xlu0 %2212 }
 0x3d9   : > { %v4173_v0 = vpop.eup %4172  ;;  %v2331_v34 = vsub.f32 %v6711_v43, %v2213_v55  ;;  %v2332_v2 = vsub.f32 %v6694_v35, %v2213_v55 }
 0x3da   : > { %v4175_v54 = vpop.eup %4174  ;;  %v2417_v46 = vmul.f32 1.442695, %v2329_v9  ;;  %v2419_v61 = vmul.f32 1.442695, %v2330_v37 }
 0x3db   : > { %v4177_v15 = vpop.eup %4176  ;;  %v2421_v23 = vmul.f32 1.442695, %v2331_v34  ;;  %v2423_v27 = vmul.f32 1.442695, %v2332_v2  ;;  %v2288_v4 = vpop.permute.xlu1 %2287  ;;  %v2527_v11 = vadd.f32 %v4175_v54, %v4173_v0 }
 0x3dc   : > { %v4179_v10 = vpop.eup %4178  ;;  %4188 = vpow2.f32 %v2417_v46  ;;  %v2361_v12 = vsub.f32 %v6741_v29, %v2288_v4  ;;  %v2362_v36 = vsub.f32 %v6721_v49, %v2288_v4  ;;  %v2293_v58 = vpop.permute.xlu0 %2292 }
 0x3dd   : > { %v4181_v5 = vpop.eup %4180  ;;  %4190 = vpow2.f32 %v2419_v61  ;;  %2528 = vadd.xlane.f32.xlu0 %v2527_v11  ;;  %v2363_v35 = vsub.f32 %v6749_v31, %v2293_v58  ;;  %v2364_v43 = vsub.f32 %v6730_v48, %v2293_v58  ;;  %v2530_v60 = vadd.f32 %v4179_v10, %v4177_v15 }
 0x3de   : > { %v4183_v19 = vpop.eup %4182  ;;  %4192 = vpow2.f32 %v2421_v23  ;;  %v2481_v59 = vmul.f32 1.442695, %v2361_v12  ;;  %v2483_v21 = vmul.f32 1.442695, %v2362_v36 }
 0x3df   : > { %v4185_v51 = vpop.eup %4184  ;;  %4194 = vpow2.f32 %v2423_v27  ;;  %v2485_v52 = vmul.f32 1.442695, %v2363_v35  ;;  %v2487_v20 = vmul.f32 1.442695, %v2364_v43  ;;  %2531 = vadd.xlane.f32.xlu1 %v2530_v60  ;;  %v2575_v29 = vadd.f32 %v4183_v19, %v4181_v5 }
 0x3e0   : > { %v4187_v49 = vpop.eup %4186  ;;  %4196 = vpow2.f32 %v2481_v59  ;;  %v3068_v60 = vadd.f32 %v6764_v38, %v6780_v57  ;;  %v8225_v19 = vsub.f32 %v6848_v25, %v6853_v32  ;;  %v8229_v38 = vld [vmem:[#allocation35_spill] sm:$0xff]  ;;  %v8231_v32 = vld [vmem:[#allocation57_spill] sm:$0xff] }
 0x3e1   : > { %4198 = vpow2.f32 %v2483_v21  ;;  %2576 = vadd.xlane.f32.xlu0 %v2575_v29  ;;  %v2578_v47 = vadd.f32 %v4187_v49, %v4185_v51  ;;  %v8226_v21 = vld [vmem:[#allocation41_spill] sm:$0xff]  ;;  %v8228_v29 = vsub.f32 %v6838_v50, %v6841_v8  ;;  %v8230_v57 = vsub.f32 %v6863_v45, %v8229_v38  ;;  %v8238_v50 = vld [vmem:[#allocation60_spill] sm:$0xff]  ;;  %v8241_v45 = vld [vmem:[#allocation54_spill] sm:$0xff] }
 0x3e2   : > { %4200 = vpow2.f32 %v2485_v52  ;;  %v2049_v59 = vmul.f32 1.442695, %v8225_v19  ;;  %v3071_v51 = vadd.f32 %v8226_v21, %v6786_v14  ;;  %v8227_v52 = vsub.f32 %v6856_v53, %v6867_v28 }
 0x3e3   : > { %4202 = vpow2.f32 %v2487_v20  ;;  %2579 = vadd.xlane.f32.xlu1 %v2578_v47  ;;  %v2017_v49 = vmul.f32 1.442695, %v8228_v29  ;;  %v2051_v25 = vmul.f32 1.442695, %v8230_v57  ;;  %v8232_v47 = vld [vmem:[#allocation25_spill] sm:$0xff]  ;;  %v8255_v29 = vld [vmem:[#allocation59_spill] sm:$0xff] }
 0x3e4   : > { %v2019_v20 = vmul.f32 1.442695, %v8227_v52 }
 0x3e7   : > { %v2218_v48 = vpop.permute.xlu1 %2217 }
 0x3e8   : > { %v2333_v31 = vsub.f32 %v6803_v30, %v2218_v48  ;;  %v2334_v13 = vsub.f32 %v6793_v40, %v2218_v48  ;;  %v2223_v56 = vpop.permute.xlu0 %2222  ;;  %v8233_v48 = vsub.f32 %v8231_v32, %v8232_v47 }
 0x3e9   : > { %v4189_v63 = vpop.eup %4188  ;;  %v2335_v17 = vsub.f32 %v6810_v1, %v2223_v56  ;;  %v2336_v62 = vsub.f32 %v6798_v24, %v2223_v56 }
 0x3ea   : > { %v4191_v33 = vpop.eup %4190  ;;  %v2425_v6 = vmul.f32 1.442695, %v2333_v31  ;;  %v2427_v16 = vmul.f32 1.442695, %v2334_v13  ;;  %v2021_v14 = vmul.f32 1.442695, %v8233_v48 }
 0x3eb   : > { %v4193_v3 = vpop.eup %4192  ;;  %v2429_v39 = vmul.f32 1.442695, %v2335_v17  ;;  %v2431_v18 = vmul.f32 1.442695, %v2336_v62  ;;  %v2298_v7 = vpop.permute.xlu1 %2297  ;;  %v2533_v41 = vadd.f32 %v4191_v33, %v4189_v63  ;;  %v8234_v31 = vld [vmem:[#allocation16_spill] sm:$0xff]  ;;  %v8235_v13 = vld [vmem:[#allocation10_spill] sm:$0xff] }
 0x3ec   : > { %v4195_v9 = vpop.eup %4194  ;;  %4204 = vpow2.f32 %v2425_v6  ;;  %v2365_v30 = vsub.f32 %v6827_v42, %v2298_v7  ;;  %v2366_v40 = vsub.f32 %v6817_v22, %v2298_v7  ;;  %v2303_v37 = vpop.permute.xlu0 %2302  ;;  %v8236_v56 = vsub.f32 %v8234_v31, %v8235_v13  ;;  %v8237_v63 = vld [vmem:[#allocation55_spill] sm:$0xff]  ;;  %v2097_v62 = vld [vmem:[#allocation3 + $0x80] sm:$0xff]  ;;  %v2082_v7 = vld [vmem:[#allocation3 + $0x8] sm:$0xff] }
 0x3ed   : > { %v4197_v55 = vpop.eup %4196  ;;  %4206 = vpow2.f32 %v2427_v16  ;;  %2534 = vadd.xlane.f32.xlu0 %v2533_v41  ;;  %v2367_v24 = vsub.f32 %v6834_v26, %v2303_v37  ;;  %v2368_v1 = vsub.f32 %v6822_v44, %v2303_v37  ;;  %v2536_v0 = vadd.f32 %v4195_v9, %v4193_v3  ;;  %v8240_v33 = vld [vmem:[#allocation11_spill] sm:$0xff]  ;;  %v2975_v9 = vld [vmem:[#allocation5 + $0xe8] sm:$0xff]  ;;  %v2100_v31 = vld [vmem:[#allocation3 + $0x98] sm:$0xff] }
 0x3ee   : > { %v4199_v34 = vpop.eup %4198  ;;  %4208 = vpow2.f32 %v2429_v39  ;;  %v2489_v2 = vmul.f32 1.442695, %v2365_v30  ;;  %v2491_v54 = vmul.f32 1.442695, %v2366_v40  ;;  %v2023_v53 = vmul.f32 1.442695, %v8236_v56 }
 0x3ef   : > { %v4201_v46 = vpop.eup %4200  ;;  %4210 = vpow2.f32 %v2431_v18  ;;  %v2493_v61 = vmul.f32 1.442695, %v2367_v24  ;;  %v2495_v15 = vmul.f32 1.442695, %v2368_v1  ;;  %2537 = vadd.xlane.f32.xlu1 %v2536_v0  ;;  %v2581_v42 = vadd.f32 %v4199_v34, %v4197_v55  ;;  %v2081_v24 = vld [vmem:[#allocation3] sm:$0xff] }
 0x3f0   : > { %v4203_v22 = vpop.eup %4202  ;;  %4212 = vpow2.f32 %v2489_v2  ;;  %v8239_v8 = vsub.f32 %v8237_v63, %v8238_v50  ;;  %v8242_v6 = vsub.f32 %v8240_v33, %v8241_v45 }
 0x3f1   : > { %4214 = vpow2.f32 %v2491_v54  ;;  %2582 = vadd.xlane.f32.xlu0 %v2581_v42  ;;  %v2584_v23 = vadd.f32 %v4203_v22, %v4201_v46  ;;  %v8245_v54 = vld [vmem:[#allocation18_spill] sm:$0xff] }
 0x3f2   : > { %4216 = vpow2.f32 %v2493_v61  ;;  %v2053_v17 = vmul.f32 1.442695, %v8239_v8  ;;  %v2055_v16 = vmul.f32 1.442695, %v8242_v6  ;;  %v8246_v46 = vld [vmem:[#allocation46_spill] sm:$0xff]  ;;  %v2085_v6 = vld [vmem:[#allocation3 + $0x20] sm:$0xff] }
 0x3f3   : > { %4218 = vpow2.f32 %v2495_v15  ;;  %2585 = vadd.xlane.f32.xlu1 %v2584_v23  ;;  %v8247_v61 = vsub.f32 %v8245_v54, %v8246_v46  ;;  %v2098_v22 = vld [vmem:[#allocation3 + $0x88] sm:$0xff] }
 0x3f4   : > { %4220 = vpow2.f32 %v2049_v59  ;;  %v2084_v59 = vld [vmem:[#allocation3 + $0x18] sm:$0xff]  ;;  %v8263_v8 = vld [vmem:[#allocation30_spill] sm:$0xff] }
 0x3f5   : > { %4222 = vpow2.f32 %v2019_v20  ;;  %v2025_v15 = vmul.f32 1.442695, %v8247_v61  ;;  %v2099_v20 = vld [vmem:[#allocation3 + $0x90] sm:$0xff] }
 0x3f6   : > { %4224 = vpow2.f32 %v2017_v49  ;;  %v8256_v49 = vld [vmem:[#allocation19_spill] sm:$0xff] }
 0x3f7   : > { %4226 = vpow2.f32 %v2051_v25  ;;  %v8257_v38 = vsub.f32 %v8255_v29, %v8256_v49  ;;  %v8285_v29 = vld [vmem:[#allocation66_spill] sm:$0xff]  ;;  %v8286_v49 = vld [vmem:[#allocation68_spill] sm:$0xff] }
 0x3f8   : > { %4228 = vpow2.f32 %v2021_v14 }
 0x3f9   : > { %v4205_v44 = vpop.eup %4204  ;;  %4230 = vpow2.f32 %v2023_v53  ;;  %v2059_v57 = vmul.f32 1.442695, %v8257_v38  ;;  %v8287_v38 = vsub.f32 %v8285_v29, %v8286_v49  ;;  %v2091_v49 = vld [vmem:[#allocation3 + $0x50] sm:$0xff] }
 0x3fa   : > { %v4207_v26 = vpop.eup %4206  ;;  %4232 = vpow2.f32 %v2053_v17  ;;  %v8264_v17 = vld [vmem:[#allocation62_spill] sm:$0xff] }
 0x3fb   : > { %v4209_v27 = vpop.eup %4208  ;;  %v2539_v4 = vadd.f32 %v4207_v26, %v4205_v44  ;;  %4234 = vpow2.f32 %v2055_v16  ;;  %v2083_v26 = vld [vmem:[#allocation3 + $0x10] sm:$0xff]  ;;  %v8266_v16 = vld [vmem:[#allocation61_spill] sm:$0xff] }
 0x3fc   : > { %v4211_v11 = vpop.eup %4210  ;;  %4236 = vpow2.f32 %v2025_v15 }
 0x3fd   : > { %v4213_v10 = vpop.eup %4212  ;;  %2540 = vadd.xlane.f32.xlu0 %v2539_v4  ;;  %v2542_v12 = vadd.f32 %v4211_v11, %v4209_v27  ;;  %v8248_v27 = vld [vmem:[#allocation50_spill] sm:$0xff]  ;;  %v8249_v4 = vld [vmem:[#allocation49_spill] sm:$0xff] }
 0x3fe   : > { %v4215_v36 = vpop.eup %4214  ;;  %v8250_v11 = vsub.f32 %v8248_v27, %v8249_v4 }
 0x3ff   : > { %v4217_v58 = vpop.eup %4216  ;;  %2543 = vadd.xlane.f32.xlu1 %v2542_v12  ;;  %v2587_v5 = vadd.f32 %v4215_v36, %v4213_v10 }
 0x400   : > { %v4219_v35 = vpop.eup %4218  ;;  %v2027_v10 = vmul.f32 1.442695, %v8250_v11 }
 0x401   : > { %2588 = vadd.xlane.f32.xlu0 %v2587_v5  ;;  %v2590_v43 = vadd.f32 %v4219_v35, %v4217_v58  ;;  %v4221_v28 = vpop.eup %4220  ;;  %v8252_v58 = vld [vmem:[#allocation45_spill] sm:$0xff]  ;;  %v8253_v5 = vld [vmem:[#allocation58_spill] sm:$0xff] }
 0x402   : > { %v2129_v3 = vmul.f32 %v4221_v28, %v2097_v62  ;;  %v4223_v39 = vpop.eup %4222  ;;  %v8254_v35 = vsub.f32 %v8252_v58, %v8253_v5  ;;  %4238 = vpow2.f32 %v2027_v10  ;;  %v8265_v62 = vsub.f32 %v8263_v8, %v8264_v17  ;;  %v8280_v58 = vld [vmem:[#allocation64_spill] sm:$0xff] }
 0x403   : > { %2591 = vadd.xlane.f32.xlu1 %v2590_v43  ;;  %v2114_v30 = vmul.f32 %v4223_v39, %v2082_v7  ;;  %v4225_v40 = vpop.eup %4224  ;;  %v2104_v8 = vld [vmem:[#allocation3 + $0xb8] sm:$0xff] }
 0x404   : > { %v2113_v34 = vmul.f32 %v4225_v40, %v2081_v24  ;;  %v4227_v2 = vpop.eup %4226  ;;  %v2057_v43 = vmul.f32 1.442695, %v8254_v35  ;;  %v2029_v33 = vmul.f32 1.442695, %v8265_v62 }
 0x405   : > { %3069 = vadd.xlane.f32.xlu0 %v3068_v60  ;;  %v4229_v23 = vpop.eup %4228  ;;  %v2130_v12 = vmul.f32 %v4227_v2, %v2098_v22  ;;  %v8273_v2 = vld [vmem:[#allocation47_spill] sm:$0xff] }
 0x406   : > { %v4231_v36 = vpop.eup %4230  ;;  %v2115_v19 = vmul.f32 %v4229_v23, %v2083_v26  ;;  %4240 = vpow2.f32 %v2057_v43  ;;  %v2102_v23 = vld [vmem:[#allocation3 + $0xa8] sm:$0xff] }
 0x407   : > { %3072 = vadd.xlane.f32.xlu1 %v3071_v51  ;;  %v4233_v21 = vpop.eup %4232  ;;  %v2116_v32 = vmul.f32 %v4231_v36, %v2084_v59  ;;  %4242 = vpow2.f32 %v2059_v57  ;;  %v8279_v36 = vld [vmem:[#allocation17_spill] sm:$0xff]  ;;  %v2065_v57 = vmul.f32 1.442695, %v8287_v38  ;;  %v8313_v38 = vld [vmem:[#allocation79_spill] sm:$0xff] }
 0x408   : > { %v4235_v47 = vpop.eup %4234  ;;  %v2131_v14 = vmul.f32 %v4233_v21, %v2099_v20  ;;  %4244 = vpow2.f32 %v2029_v33  ;;  %v8281_v5 = vsub.f32 %v8279_v36, %v8280_v58  ;;  %v8283_v59 = vld [vmem:[#allocation65_spill] sm:$0xff]  ;;  %v2088_v20 = vld [vmem:[#allocation3 + $0x38] sm:$0xff]  ;;  %v2106_v36 = vld [vmem:[#allocation3 + $0xc8] sm:$0xff] }
 0x409   : > { %v2132_v28 = vmul.f32 %v4235_v47, %v2100_v31  ;;  %v4237_v45 = vpop.eup %4236  ;;  %v8289_v31 = vld [vmem:[#allocation69_spill] sm:$0xff] }
 0x40a   : > { %v2033_v35 = vmul.f32 1.442695, %v8281_v5 }
 0x40f   : > { %v4239_v7 = vpop.eup %4238 }
 0x413   : > { %v4241_v24 = vpop.eup %4240 }
 0x419   : > { %v2547_v18 = vpop.xlane.xlu0 %2546 }
 0x41a   : > { %v2609_v41 = vadd.f32 %v2547_v18, %v2129_v3  ;;  %v8267_v3 = vld [vmem:[#allocation56_spill] sm:$0xff] }
 0x41b   : > { %v8268_v39 = vsub.f32 %v8266_v16, %v8267_v3 }
 0x41c   : > { %2642 = vst.msk [vmem:[#allocation3 + $0x80] sm:$0xff] %vm8080_vm0, %v2609_v41  ;;  %v2086_v41 = vld [vmem:[#allocation3 + $0x28] sm:$0xff] }
 0x41d   : > { %v3067_v37 = vpop.xlane.xlu1 %3066  ;;  %v2502_v55 = vpop.xlane.xlu0 %2501  ;;  %v2031_v18 = vmul.f32 1.442695, %v8268_v39  ;;  %v2118_v15 = vmul.f32 %v4239_v7, %v2086_v41  ;;  %v8294_v39 = vld [vmem:[#allocation70_spill] sm:$0xff] }
 0x41e   : > { %v3103_v1 = vadd.f32 %v3067_v37, %v2975_v9  ;;  %v2594_v0 = vadd.f32 %v2502_v55, %v2114_v30  ;;  %v8269_v9 = vld [vmem:[#allocation52_spill] sm:$0xff]  ;;  %v8270_v30 = vld [vmem:[#allocation51_spill] sm:$0xff]  ;;  %v2117_v55 = vmul.f32 %v4237_v45, %v2085_v6 }
 0x41f   : > { %v8271_v40 = vsub.f32 %v8269_v9, %v8270_v30  ;;  %4246 = vpow2.f32 %v2031_v18  ;;  %v8295_v18 = vld [vmem:[#allocation72_spill] sm:$0xff]  ;;  %v2089_v30 = vld [vmem:[#allocation3 + $0x40] sm:$0xff] }
 0x420   : > { %3135 = vst.msk [vmem:[#allocation5 + $0xe8] sm:$0xff] %vm8243_vm8, %v3103_v1  ;;  %v8296_v7 = vsub.f32 %v8294_v39, %v8295_v18  ;;  %vm8306_vm8 = vmmov %vm8080_vm0  ;;  %v2108_v39 = vld [vmem:[#allocation3 + $0xd8] sm:$0xff] }
 0x421   : > { %2627 = vst.msk [vmem:[#allocation3 + $0x8] sm:$0xff] %vm8244_vm15, %v2594_v0  ;;  %v2499_v42 = vpop.xlane.xlu1 %2498  ;;  %v2061_v37 = vmul.f32 1.442695, %v8271_v40  ;;  %v2101_v0 = vld [vmem:[#allocation3 + $0xa0] sm:$0xff]  ;;  %v8297_v40 = vld [vmem:[#allocation71_spill] sm:$0xff]  ;;  %vm8307_vm15 = vmmov %vm8080_vm0 }
 0x422   : > { %v2593_v44 = vadd.f32 %v2499_v42, %v2113_v34  ;;  %v8272_v34 = vld [vmem:[#allocation48_spill] sm:$0xff]  ;;  %v4243_v42 = vpop.eup %4242  ;;  %v2133_v26 = vmul.f32 %v4241_v24, %v2101_v0  ;;  %v2037_v41 = vmul.f32 1.442695, %v8296_v7  ;;  %v2090_v0 = vld [vmem:[#allocation3 + $0x48] sm:$0xff] }
 0x423   : > { %v8274_v54 = vsub.f32 %v8272_v34, %v8273_v2  ;;  %4248 = vpow2.f32 %v2061_v37  ;;  %v2134_v11 = vmul.f32 %v4243_v42, %v2102_v23  ;;  %v4245_v43 = vpop.eup %4244  ;;  %v8298_v37 = vld [vmem:[#allocation73_spill] sm:$0xff]  ;;  %v8300_v34 = vld [vmem:[#allocation74_spill] sm:$0xff]  ;;  %v8301_v2 = vld [vmem:[#allocation76_spill] sm:$0xff] }
 0x424   : > { %2626 = vst.msk [vmem:[#allocation3] sm:$0xff] %vm8251_vm2, %v2593_v44  ;;  %v8303_v23 = vld [vmem:[#allocation75_spill] sm:$0xff]  ;;  %vm8308_vm2 = vmmov %vm8080_vm0 }
 0x425   : > { %v2550_v60 = vpop.xlane.xlu1 %2549  ;;  %v2063_v46 = vmul.f32 1.442695, %v8274_v54  ;;  %v8302_v54 = vsub.f32 %v8300_v34, %v8301_v2  ;;  %v2093_v2 = vld [vmem:[#allocation3 + $0x60] sm:$0xff] }
 0x426   : > { %v2610_v51 = vadd.f32 %v2550_v60, %v2130_v12  ;;  %v2505_v52 = vpop.xlane.xlu0 %2504  ;;  %v2087_v60 = vld [vmem:[#allocation3 + $0x30] sm:$0xff] }
 0x427   : > { %v2595_v25 = vadd.f32 %v2505_v52, %v2115_v19  ;;  %4250 = vpow2.f32 %v2063_v46  ;;  %v8282_v19 = vld [vmem:[#allocation29_spill] sm:$0xff]  ;;  %v2069_v46 = vmul.f32 1.442695, %v8302_v54  ;;  %v8329_v54 = vld [vmem:[#allocation87_spill] sm:$0xff] }
 0x428   : > { %2643 = vst.msk [vmem:[#allocation3 + $0x88] sm:$0xff] %vm8258_vm12, %v2610_v51  ;;  %v8284_v21 = vsub.f32 %v8282_v19, %v8283_v59  ;;  %4252 = vpow2.f32 %v2033_v35  ;;  %vm8309_vm12 = vmmov %vm8080_vm0 }
 0x429   : > { %2628 = vst.msk [vmem:[#allocation3 + $0x10] sm:$0xff] %vm8259_vm9, %v2595_v25  ;;  %v2508_v48 = vpop.xlane.xlu1 %2507  ;;  %v2119_v25 = vmul.f32 %v4245_v43, %v2087_v60  ;;  %vm8322_vm9 = vmmov %vm8080_vm0 }
 0x42a   : > { %v2596_v13 = vadd.f32 %v2508_v48, %v2116_v32  ;;  %v2553_v56 = vpop.xlane.xlu0 %2552  ;;  %v2035_v51 = vmul.f32 1.442695, %v8284_v21  ;;  %v2103_v48 = vld [vmem:[#allocation3 + $0xb0] sm:$0xff]  ;;  %v8310_v21 = vld [vmem:[#allocation78_spill] sm:$0xff] }
 0x42b   : > { %v2611_v53 = vadd.f32 %v2553_v56, %v2131_v14  ;;  %v8288_v14 = vld [vmem:[#allocation67_spill] sm:$0xff] }
 0x42c   : > { %2629 = vst.msk [vmem:[#allocation3 + $0x18] sm:$0xff] %vm8260_vm5, %v2596_v13  ;;  %v4247_v52 = vpop.eup %4246  ;;  %4254 = vpow2.f32 %v2035_v51  ;;  %v8290_v13 = vsub.f32 %v8288_v14, %v8289_v31  ;;  %v8311_v51 = vld [vmem:[#allocation80_spill] sm:$0xff]  ;;  %v8316_v14 = vld [vmem:[#allocation82_spill] sm:$0xff]  ;;  %vm8323_vm5 = vmmov %vm8080_vm0 }
 0x42d   : > { %2644 = vst.msk [vmem:[#allocation3 + $0x90] sm:$0xff] %vm8261_vm6, %v2611_v53  ;;  %v2556_v63 = vpop.xlane.xlu1 %2555  ;;  %4256 = vpow2.f32 %v2065_v57  ;;  %v8314_v57 = vld [vmem:[#allocation81_spill] sm:$0xff]  ;;  %v8317_v31 = vld [vmem:[#allocation84_spill] sm:$0xff]  ;;  %vm8324_vm6 = vmmov %vm8080_vm0 }
 0x42e   : > { %v2612_v50 = vadd.f32 %v2556_v63, %v2132_v28  ;;  %v2067_v56 = vmul.f32 1.442695, %v8290_v13  ;;  %v2120_v28 = vmul.f32 %v4247_v52, %v2088_v20  ;;  %v8312_v52 = vsub.f32 %v8310_v21, %v8311_v51  ;;  %v2110_v21 = vld [vmem:[#allocation3 + $0xe8] sm:$0xff] }
 0x42f   : > { %v8318_v13 = vsub.f32 %v8316_v14, %v8317_v31 }
 0x430   : > { %2645 = vst.msk [vmem:[#allocation3 + $0x98] sm:$0xff] %vm8262_vm11, %v2612_v50  ;;  %v4249_v32 = vpop.eup %4248  ;;  %4258 = vpow2.f32 %v2067_v56  ;;  %v2041_v20 = vmul.f32 1.442695, %v8312_v52  ;;  %vm8325_vm11 = vmmov %vm8080_vm0 }
 0x431   : > { %v2135_v62 = vmul.f32 %v4249_v32, %v2103_v48  ;;  %4260 = vpow2.f32 %v2037_v41  ;;  %v2092_v48 = vld [vmem:[#allocation3 + $0x58] sm:$0xff]  ;;  %v2073_v56 = vmul.f32 1.442695, %v8318_v13 }
 0x434   : > { %v4251_v63 = vpop.eup %4250 }
 0x435   : > { %v2136_v6 = vmul.f32 %v4251_v63, %v2104_v8  ;;  %v4253_v9 = vpop.eup %4252  ;;  %v8319_v8 = vld [vmem:[#allocation83_spill] sm:$0xff] }
 0x436   : > { %v2511_v1 = vpop.xlane.xlu0 %2510 }
 0x437   : > { %v2597_v61 = vadd.f32 %v2511_v1, %v2117_v55  ;;  %v8299_v55 = vsub.f32 %v8297_v40, %v8298_v37 }
 0x438   : > { %v2514_v22 = vpop.xlane.xlu1 %2513 }
 0x439   : > { %2630 = vst.msk [vmem:[#allocation3 + $0x20] sm:$0xff] %vm8275_vm7, %v2597_v61  ;;  %v2598_v44 = vadd.f32 %v2514_v22, %v2118_v15  ;;  %v2039_v24 = vmul.f32 1.442695, %v8299_v55  ;;  %v4255_v1 = vpop.eup %4254  ;;  %v2121_v61 = vmul.f32 %v4253_v9, %v2089_v30  ;;  %v2105_v22 = vld [vmem:[#allocation3 + $0xc0] sm:$0xff]  ;;  %v8326_v55 = vld [vmem:[#allocation86_spill] sm:$0xff]  ;;  %vm8338_vm7 = vmmov %vm8080_vm0 }
 0x43a   : > { %v2559_v27 = vpop.xlane.xlu0 %2558  ;;  %v4257_v15 = vpop.eup %4256 }
 0x43b   : > { %2631 = vst.msk [vmem:[#allocation3 + $0x28] sm:$0xff] %vm8276_vm14, %v2598_v44  ;;  %v2613_v4 = vadd.f32 %v2559_v27, %v2133_v26  ;;  %4262 = vpow2.f32 %v2039_v24  ;;  %v8304_v44 = vld [vmem:[#allocation77_spill] sm:$0xff]  ;;  %v2137_v5 = vmul.f32 %v4257_v15, %v2105_v22  ;;  %v8327_v24 = vld [vmem:[#allocation88_spill] sm:$0xff]  ;;  %v2094_v22 = vld [vmem:[#allocation3 + $0x68] sm:$0xff] }
 0x43c   : > { %v2562_v10 = vpop.xlane.xlu1 %2561  ;;  %v8305_v26 = vsub.f32 %v8303_v23, %v8304_v44  ;;  %4264 = vpow2.f32 %v2069_v46  ;;  %v8330_v46 = vld [vmem:[#allocation89_spill] sm:$0xff]  ;;  %v8332_v23 = vld [vmem:[#allocation90_spill] sm:$0xff]  ;;  %v8333_v44 = vld [vmem:[#allocation92_spill] sm:$0xff] }
 0x43d   : > { %2646 = vst.msk [vmem:[#allocation3 + $0xa0] sm:$0xff] %vm8277_vm4, %v2613_v4  ;;  %v2614_v12 = vadd.f32 %v2562_v10, %v2134_v11  ;;  %v2122_v11 = vmul.f32 %v4255_v1, %v2090_v0  ;;  %v4259_v10 = vpop.eup %4258  ;;  %v8328_v1 = vsub.f32 %v8326_v55, %v8327_v24  ;;  %vm8339_vm14 = vmmov %vm8080_vm0 }
 0x43e   : > { %v2071_v27 = vmul.f32 1.442695, %v8305_v26  ;;  %v2138_v60 = vmul.f32 %v4259_v10, %v2106_v36  ;;  %v4261_v29 = vpop.eup %4260  ;;  %v8334_v26 = vsub.f32 %v8332_v23, %v8333_v44  ;;  %v8335_v36 = vld [vmem:[#allocation91_spill] sm:$0xff]  ;;  %vm8340_vm4 = vmmov %vm8080_vm0 }
 0x43f   : > { %2647 = vst.msk [vmem:[#allocation3 + $0xa8] sm:$0xff] %vm8278_vm10, %v2614_v12  ;;  %v2045_v0 = vmul.f32 1.442695, %v8328_v1  ;;  %vm8341_vm10 = vmmov %vm8080_vm0 }
 0x440   : > { %4266 = vpow2.f32 %v2071_v27  ;;  %v2077_v27 = vmul.f32 1.442695, %v8334_v26 }
 0x441   : > { %4268 = vpow2.f32 %v2041_v20 }
 0x446   : > { %v2517_v47 = vpop.xlane.xlu0 %2516 }
 0x447   : > { %v2599_v53 = vadd.f32 %v2517_v47, %v2119_v25  ;;  %v8315_v25 = vsub.f32 %v8313_v38, %v8314_v57 }
 0x448   : > { %v2520_v50 = vpop.xlane.xlu1 %2519  ;;  %v4263_v47 = vpop.eup %4262 }
 0x449   : > { %2632 = vst.msk [vmem:[#allocation3 + $0x30] sm:$0xff] %vm8291_vm1, %v2599_v53  ;;  %v2600_v17 = vadd.f32 %v2520_v50, %v2120_v28  ;;  %v2043_v32 = vmul.f32 1.442695, %v8315_v25  ;;  %v2123_v53 = vmul.f32 %v4261_v29, %v2091_v49  ;;  %v4265_v28 = vpop.eup %4264  ;;  %v2107_v50 = vld [vmem:[#allocation3 + $0xd0] sm:$0xff]  ;;  %vm8342_vm1 = vmmov %vm8080_vm0 }
 0x44a   : > { %v2565_v33 = vpop.xlane.xlu0 %2564  ;;  %v2139_v7 = vmul.f32 %v4265_v28, %v2107_v50 }
 0x44b   : > { %2633 = vst.msk [vmem:[#allocation3 + $0x38] sm:$0xff] %vm8292_vm3, %v2600_v17  ;;  %v2615_v45 = vadd.f32 %v2565_v33, %v2135_v62  ;;  %4270 = vpow2.f32 %v2043_v32  ;;  %v8320_v17 = vld [vmem:[#allocation85_spill] sm:$0xff]  ;;  %v2095_v32 = vld [vmem:[#allocation3 + $0x70] sm:$0xff]  ;;  %vm8343_vm3 = vmmov %vm8080_vm0 }
 0x44c   : > { %v2568_v16 = vpop.xlane.xlu1 %2567  ;;  %v8321_v62 = vsub.f32 %v8319_v8, %v8320_v17  ;;  %4272 = vpow2.f32 %v2073_v56  ;;  %v2111_v56 = vld [vmem:[#allocation3 + $0xf0] sm:$0xff]  ;;  %v2112_v8 = vld [vmem:[#allocation3 + $0xf8] sm:$0xff] }
 0x44d   : > { %2648 = vst.msk [vmem:[#allocation3 + $0xb0] sm:$0xff] %vm8293_vm13, %v2615_v45  ;;  %v2616_v3 = vadd.f32 %v2568_v16, %v2136_v6  ;;  %v2124_v6 = vmul.f32 %v4263_v47, %v2092_v48  ;;  %v4267_v16 = vpop.eup %4266  ;;  %v2096_v48 = vld [vmem:[#allocation3 + $0x78] sm:$0xff]  ;;  %vm8344_vm13 = vmmov %vm8080_vm0 }
 0x44e   : > { %v2075_v33 = vmul.f32 1.442695, %v8321_v62  ;;  %v2140_v30 = vmul.f32 %v4267_v16, %v2108_v39  ;;  %v4269_v34 = vpop.eup %4268 }
 0x44f   : > { %2649 = vst.msk [vmem:[#allocation3 + $0xb8] sm:$0xff] %vm8080_vm0, %v2616_v3 }
 0x450   : > { %4274 = vpow2.f32 %v2075_v33 }
 0x451   : > { %4276 = vpow2.f32 %v2045_v0 }
 0x456   : > { %v2523_v42 = vpop.xlane.xlu0 %2522 }
 0x457   : > { %v2601_v4 = vadd.f32 %v2523_v42, %v2121_v61  ;;  %v8331_v61 = vsub.f32 %v8329_v54, %v8330_v46 }
 0x458   : > { %v2526_v12 = vpop.xlane.xlu1 %2525  ;;  %v4271_v42 = vpop.eup %4270 }
 0x459   : > { %2634 = vst.msk [vmem:[#allocation3 + $0x40] sm:$0xff] %vm8306_vm8, %v2601_v4  ;;  %v2602_v58 = vadd.f32 %v2526_v12, %v2122_v11  ;;  %v2047_v15 = vmul.f32 1.442695, %v8331_v61  ;;  %v2125_v4 = vmul.f32 %v4269_v34, %v2093_v2  ;;  %v4273_v11 = vpop.eup %4272  ;;  %v2109_v12 = vld [vmem:[#allocation3 + $0xe0] sm:$0xff]  ;;  %vm8345_vm8 = vmmov %vm8080_vm0 }
 0x45a   : > { %v2571_v35 = vpop.xlane.xlu0 %2570  ;;  %v2141_v52 = vmul.f32 %v4273_v11, %v2109_v12 }
 0x45b   : > { %2635 = vst.msk [vmem:[#allocation3 + $0x48] sm:$0xff] %vm8307_vm15, %v2602_v58  ;;  %v2617_v43 = vadd.f32 %v2571_v35, %v2137_v5  ;;  %4278 = vpow2.f32 %v2047_v15  ;;  %v8336_v58 = vld [vmem:[#allocation93_spill] sm:$0xff]  ;;  %vm8346_vm15 = vmmov %vm8080_vm0 }
 0x45c   : > { %v2574_v19 = vpop.xlane.xlu1 %2573  ;;  %v8337_v5 = vsub.f32 %v8335_v36, %v8336_v58  ;;  %4280 = vpow2.f32 %v2077_v27 }
 0x45d   : > { %2650 = vst.msk [vmem:[#allocation3 + $0xc0] sm:$0xff] %vm8308_vm2, %v2617_v43  ;;  %v2618_v59 = vadd.f32 %v2574_v19, %v2138_v60  ;;  %v2126_v60 = vmul.f32 %v4271_v42, %v2094_v22  ;;  %v4275_v19 = vpop.eup %4274 }
 0x45e   : > { %v2079_v35 = vmul.f32 1.442695, %v8337_v5  ;;  %v2142_v49 = vmul.f32 %v4275_v19, %v2110_v21  ;;  %v4277_v25 = vpop.eup %4276 }
 0x45f   : > { %2651 = vst.msk [vmem:[#allocation3 + $0xc8] sm:$0xff] %vm8309_vm12, %v2618_v59  ;;  %v2127_v14 = vmul.f32 %v4277_v25, %v2095_v32 }
 0x460   : > { %4282 = vpow2.f32 %v2079_v35 }
 0x466   : > { %v2529_v63 = vpop.xlane.xlu0 %2528 }
 0x467   : > { %v2603_v45 = vadd.f32 %v2529_v63, %v2123_v53 }
 0x468   : > { %v2532_v3 = vpop.xlane.xlu1 %2531  ;;  %v4279_v47 = vpop.eup %4278 }
 0x469   : > { %2636 = vst.msk [vmem:[#allocation3 + $0x50] sm:$0xff] %vm8322_vm9, %v2603_v45  ;;  %v2604_v18 = vadd.f32 %v2532_v3, %v2124_v6  ;;  %v4281_v31 = vpop.eup %4280  ;;  %v2128_v28 = vmul.f32 %v4279_v47, %v2096_v48  ;;  %v2976_v3 = vld [vmem:[#allocation5 + $0xf0] sm:$0xff] }
 0x46a   : > { %v2577_v41 = vpop.xlane.xlu0 %2576  ;;  %v2143_v62 = vmul.f32 %v4281_v31, %v2111_v56 }
 0x46b   : > { %2637 = vst.msk [vmem:[#allocation3 + $0x58] sm:$0xff] %vm8323_vm5, %v2604_v18  ;;  %v2619_v9 = vadd.f32 %v2577_v41, %v2139_v7  ;;  %v2977_v7 = vld [vmem:[#allocation5 + $0xf8] sm:$0xff] }
 0x46c   : > { %v2580_v40 = vpop.xlane.xlu1 %2579 }
 0x46d   : > { %2652 = vst.msk [vmem:[#allocation3 + $0xd0] sm:$0xff] %vm8324_vm6, %v2619_v9  ;;  %v2620_v37 = vadd.f32 %v2580_v40, %v2140_v30  ;;  %v4283_v63 = vpop.eup %4282 }
 0x46e   : > { %v2144_v6 = vmul.f32 %v4283_v63, %v2112_v8 }
 0x46f   : > { %2653 = vst.msk [vmem:[#allocation3 + $0xd8] sm:$0xff] %vm8325_vm11, %v2620_v37 }
 0x476   : > { %v2535_v10 = vpop.xlane.xlu0 %2534 }
 0x477   : > { %v2605_v43 = vadd.f32 %v2535_v10, %v2125_v4 }
 0x478   : > { %v2538_v59 = vpop.xlane.xlu1 %2537 }
 0x479   : > { %2638 = vst.msk [vmem:[#allocation3 + $0x60] sm:$0xff] %vm8338_vm7, %v2605_v43  ;;  %v2606_v51 = vadd.f32 %v2538_v59, %v2126_v60 }
 0x47a   : > { %v2583_v20 = vpop.xlane.xlu0 %2582 }
 0x47b   : > { %2639 = vst.msk [vmem:[#allocation3 + $0x68] sm:$0xff] %vm8339_vm14, %v2606_v51  ;;  %v2621_v29 = vadd.f32 %v2583_v20, %v2141_v52 }
 0x47c   : > { %v2586_v38 = vpop.xlane.xlu1 %2585 }
 0x47d   : > { %2654 = vst.msk [vmem:[#allocation3 + $0xe0] sm:$0xff] %vm8340_vm4, %v2621_v29  ;;  %v2622_v57 = vadd.f32 %v2586_v38, %v2142_v49 }
 0x47f   : > { %2655 = vst.msk [vmem:[#allocation3 + $0xe8] sm:$0xff] %vm8341_vm10, %v2622_v57 }
 0x486   : > { %v2541_v13 = vpop.xlane.xlu0 %2540 }
 0x487   : > { %v2607_v53 = vadd.f32 %v2541_v13, %v2127_v14 }
 0x488   : > { %v2544_v50 = vpop.xlane.xlu1 %2543 }
 0x489   : > { %2640 = vst.msk [vmem:[#allocation3 + $0x70] sm:$0xff] %vm8342_vm1, %v2607_v53  ;;  %v2608_v17 = vadd.f32 %v2544_v50, %v2128_v28 }
 0x48a   : > { %v2589_v33 = vpop.xlane.xlu0 %2588 }
 0x48b   : > { %2641 = vst.msk [vmem:[#allocation3 + $0x78] sm:$0xff] %vm8343_vm3, %v2608_v17  ;;  %v2623_v45 = vadd.f32 %v2589_v33, %v2143_v62 }
 0x48c   : > { %v2592_v16 = vpop.xlane.xlu1 %2591 }
 0x48d   : > { %2656 = vst.msk [vmem:[#allocation3 + $0xf0] sm:$0xff] %vm8344_vm13, %v2623_v45  ;;  %v2624_v39 = vadd.f32 %v2592_v16, %v2144_v6 }
 0x48e   : > { %v3070_v18 = vpop.xlane.xlu0 %3069 }
 0x48f   : > { %2657 = vst.msk [vmem:[#allocation3 + $0xf8] sm:$0xff] %vm8080_vm0, %v2624_v39  ;;  %v3104_v41 = vadd.f32 %v3070_v18, %v2976_v3  ;;  %3141 = sbr.rel (%p3817_p11) target bundleno = 1273 (0x4f9), region = 48 }
 0x490   : > { %v3073_v9 = vpop.xlane.xlu1 %3072 }
 0x491   : > { %3136 = vst.msk [vmem:[#allocation5 + $0xf0] sm:$0xff] %vm8345_vm8, %v3104_v41  ;;  %v3105_v30 = vadd.f32 %v3073_v9, %v2977_v7 }
 0x493   : > { %3137 = vst.msk [vmem:[#allocation5 + $0xf8] sm:$0xff] %vm8346_vm15, %v3105_v30 }
 0x494   : > { %v3174_v40 = vld [vmem:[#allocation3] sm:$0xff]  ;;  %v3175_v24 = vld [vmem:[#allocation3 + $0x8] sm:$0xff]  ;;  %v3176_v34 = vld [vmem:[#allocation3 + $0x10] sm:$0xff]  ;;  %vm8347_vm2 = vcmask 7168  }
 0x495   : > { %v3302_v37 = vld [vmem:[#allocation5] sm:$0xff]  ;;  %4292 = vlog2.f32 %v3174_v40  ;;  %v3303_v1 = vld [vmem:[#allocation5 + $0x8] sm:$0xff]  ;;  %v7392_v2 = vld [vmem:[#allocation5 + $0x10] sm:$0xff] }
 0x496   : > { %v3334_v55 = vmax.f32 %v3302_v37, 1.0  ;;  %4294 = vlog2.f32 %v3175_v24  ;;  %v3335_v0 = vmax.f32 %v3303_v1, 1.0  ;;  %v3336_v54 = vmax.f32 %v7392_v2, 1.0  ;;  %v3177_v46 = vld [vmem:[#allocation3 + $0x18] sm:$0xff]  ;;  %v3178_v42 = vld [vmem:[#allocation3 + $0x20] sm:$0xff]  ;;  %v7400_v23 = vld [vmem:[#allocation5 + $0x28] sm:$0xff] }
 0x497   : > { %4296 = vlog2.f32 %v3176_v34  ;;  %v7395_v61 = vld [vmem:[#allocation5 + $0x18] sm:$0xff]  ;;  %v7398_v22 = vld [vmem:[#allocation5 + $0x20] sm:$0xff]  ;;  %v3179_v26 = vld [vmem:[#allocation3 + $0x28] sm:$0xff]  ;;  %v3339_v4 = vmax.f32 %v7400_v23, 1.0 }
 0x498   : > { %4298 = vrcp.f32 %v3334_v55  ;;  %v3337_v15 = vmax.f32 %v7395_v61, 1.0  ;;  %v3338_v44 = vmax.f32 %v7398_v22, 1.0  ;;  %v7403_v27 = vld [vmem:[#allocation5 + $0x30] sm:$0xff]  ;;  %v7406_v10 = vld [vmem:[#allocation5 + $0x38] sm:$0xff]  ;;  %v7409_v58 = vld [vmem:[#allocation5 + $0x40] sm:$0xff] }
 0x499   : > { %4300 = vrcp.f32 %v3335_v0  ;;  %v3180_v11 = vld [vmem:[#allocation3 + $0x30] sm:$0xff]  ;;  %v3340_v12 = vmax.f32 %v7403_v27, 1.0  ;;  %v3181_v36 = vld [vmem:[#allocation3 + $0x38] sm:$0xff]  ;;  %v3142_v35 = vld [vmem:[#allocation2] sm:$0xff]  ;;  %v3341_v43 = vmax.f32 %v7406_v10, 1.0  ;;  %v3342_v20 = vmax.f32 %v7409_v58, 1.0 }
 0x49a   : > { %4302 = vlog2.f32 %v3177_v46  ;;  %v3182_v60 = vld [vmem:[#allocation3 + $0x40] sm:$0xff]  ;;  %v3143_v21 = vld [vmem:[#allocation2 + $0x8] sm:$0xff]  ;;  %v3144_v57 = vld [vmem:[#allocation2 + $0x10] sm:$0xff] }
 0x49b   : > { %4304 = vrcp.f32 %v3336_v54  ;;  %v7412_v51 = vld [vmem:[#allocation5 + $0x48] sm:$0xff]  ;;  %v7415_v25 = vld [vmem:[#allocation5 + $0x50] sm:$0xff]  ;;  %v3398_v47 = vld [vmem:[#allocation4] sm:$0xff] }
 0x49c   : > { %4306 = vlog2.f32 %v3178_v42  ;;  %v3183_v29 = vld [vmem:[#allocation3 + $0x48] sm:$0xff]  ;;  %v3343_v31 = vmax.f32 %v7412_v51, 1.0  ;;  %v3184_v13 = vld [vmem:[#allocation3 + $0x50] sm:$0xff]  ;;  %v7418_v63 = vld [vmem:[#allocation5 + $0x58] sm:$0xff]  ;;  %v3344_v33 = vmax.f32 %v7415_v25, 1.0 }
 0x49d   : > { %4308 = vrcp.f32 %v3337_v15  ;;  %v3399_v28 = vld [vmem:[#allocation4 + $0x8] sm:$0xff]  ;;  %v3145_v62 = vld [vmem:[#allocation2 + $0x18] sm:$0xff]  ;;  %v3400_v3 = vld [vmem:[#allocation4 + $0x10] sm:$0xff]  ;;  %v3345_v30 = vmax.f32 %v7418_v63, 1.0 }
 0x49e   : > { %4310 = vlog2.f32 %v3179_v26  ;;  %v3185_v45 = vld [vmem:[#allocation3 + $0x58] sm:$0xff]  ;;  %v3146_v9 = vld [vmem:[#allocation2 + $0x20] sm:$0xff]  ;;  %v3147_v42 = vld [vmem:[#allocation2 + $0x28] sm:$0xff] }
 0x49f   : > { %4312 = vrcp.f32 %v3338_v44  ;;  %v3186_v40 = vld [vmem:[#allocation3 + $0x60] sm:$0xff]  ;;  %v3401_v15 = vld [vmem:[#allocation4 + $0x18] sm:$0xff]  ;;  %vm8348_vm12 = vmmov %vm8347_vm2 }
 0x4a0   : > { %4314 = vlog2.f32 %v3180_v11  ;;  %v7423_v0 = vld [vmem:[#allocation5 + $0x60] sm:$0xff]  ;;  %v3187_v11 = vld [vmem:[#allocation3 + $0x68] sm:$0xff]  ;;  %vm8349_vm9 = vmmov %vm8347_vm2 }
 0x4a1   : > { %4316 = vrcp.f32 %v3339_v4  ;;  %vm8350_vm5 = vmmov %vm8347_vm2 }
 0x4a2   : > { %v4293_v5 = vpop.eup %4292  ;;  %4318 = vlog2.f32 %v3181_v36  ;;  %vm8351_vm6 = vmmov %vm8347_vm2 }
 0x4a3   : > { %v4295_v19 = vpop.eup %4294  ;;  %v3207_v59 = vmul.f32 0.6931472, %v4293_v5  ;;  %4320 = vrcp.f32 %v3340_v12  ;;  %v3402_v5 = vld [vmem:[#allocation4 + $0x20] sm:$0xff]  ;;  %vm8352_vm11 = vmmov %vm8347_vm2 }
 0x4a4   : > { %v3209_v52 = vmul.f32 0.6931472, %v4295_v19  ;;  %v4297_v49 = vpop.eup %4296  ;;  %4322 = vlog2.f32 %v3182_v60  ;;  %vm8353_vm7 = vmmov %vm8347_vm2 }
 0x4a5   : > { %v3270_v38 = vadd.f32 %v3207_v59, %v3142_v35  ;;  %v4299_v32 = vpop.eup %4298  ;;  %v3211_v14 = vmul.f32 0.6931472, %v4297_v49  ;;  %4324 = vrcp.f32 %v3341_v43  ;;  %v3148_v35 = vld [vmem:[#allocation2 + $0x30] sm:$0xff]  ;;  %v3346_v43 = vmax.f32 %v7423_v0, 1.0  ;;  %vm8354_vm14 = vmmov %vm8347_vm2 }
 0x4a6   : > { %v3271_v48 = vadd.f32 %v3209_v52, %v3143_v21  ;;  %v4301_v56 = vpop.eup %4300  ;;  %4326 = vlog2.f32 %v3183_v29  ;;  %v7432_v52 = vld [vmem:[#allocation5 + $0x68] sm:$0xff]  ;;  %vm8355_vm4 = vmmov %vm8347_vm2 }
 0x4a7   : > { %v3366_v53 = vmul.f32 %v3302_v37, %v3270_v38  ;;  %v4303_v50 = vpop.eup %4302  ;;  %v3272_v17 = vadd.f32 %v3211_v14, %v3144_v57  ;;  %4328 = vrcp.f32 %v3342_v20  ;;  %v3403_v29 = vld [vmem:[#allocation4 + $0x28] sm:$0xff]  ;;  %v3188_v14 = vld [vmem:[#allocation3 + $0x70] sm:$0xff]  ;;  %vm8356_vm10 = vmmov %vm8347_vm2 }
 0x4a8   : > { %v3367_v8 = vmul.f32 %v3303_v1, %v3271_v48  ;;  %v4305_v6 = vpop.eup %4304  ;;  %v3213_v39 = vmul.f32 0.6931472, %v4303_v50  ;;  %4330 = vlog2.f32 %v3184_v13  ;;  %v3149_v48 = vld [vmem:[#allocation2 + $0x38] sm:$0xff]  ;;  %vm8357_vm1 = vmmov %vm8347_vm2 }
 0x4a9   : > { %v3430_v16 = vsub.f32 %v3366_v53, %v3398_v47  ;;  %v4307_v18 = vpop.eup %4306  ;;  %v3368_v41 = vmul.f32 %v7392_v2, %v3272_v17  ;;  %4332 = vrcp.f32 %v3343_v31  ;;  %v3347_v53 = vmax.f32 %v7432_v52, 1.0  ;;  %vm8358_vm3 = vmmov %vm8357_vm1 }
 0x4aa   : > { %v3431_v7 = vsub.f32 %v3367_v8, %v3399_v28  ;;  %v4309_v37 = vpop.eup %4308  ;;  %v3273_v24 = vadd.f32 %v3213_v39, %v3145_v62  ;;  %v3215_v1 = vmul.f32 0.6931472, %v4307_v18  ;;  %4334 = vlog2.f32 %v3185_v45  ;;  %v3405_v18 = vld [vmem:[#allocation4 + $0x38] sm:$0xff]  ;;  %vm8359_vm13 = vmmov %vm8357_vm1 }
 0x4ab   : > { %v3463_v55 = vmul.f32 %v4299_v32, %v3430_v16  ;;  %v4311_v34 = vpop.eup %4310  ;;  %v3432_v46 = vsub.f32 %v3368_v41, %v3400_v3  ;;  %4336 = vrcp.f32 %v3344_v33  ;;  %vm8360_vm0 = vmmov %vm8357_vm1 }
 0x4ac   : > { %v3465_v54 = vmul.f32 %v4301_v56, %v3431_v7  ;;  %v4313_v2 = vpop.eup %4312  ;;  %v3369_v44 = vmul.f32 %v7395_v61, %v3273_v24  ;;  %v3274_v26 = vadd.f32 %v3215_v1, %v3146_v9  ;;  %v3217_v4 = vmul.f32 0.6931472, %v4311_v34  ;;  %v3150_v56 = vld [vmem:[#allocation2 + $0x40] sm:$0xff]  ;;  %v3189_v9 = vld [vmem:[#allocation3 + $0x78] sm:$0xff]  ;;  %vm8361_vm8 = vmmov %vm8360_vm0 }
 0x4ad   : > { %3526 = vst.msk [vmem:[%s4658_s8] sm:$0xff] %vm8347_vm2, %v3463_v55  ;;  %4338 = vlog2.f32 %v3186_v40  ;;  %v4315_v12 = vpop.eup %4314  ;;  %v3467_v36 = vmul.f32 %v4305_v6, %v3432_v46  ;;  %v3151_v6 = vld [vmem:[#allocation2 + $0x48] sm:$0xff]  ;;  %v3152_v55 = vld [vmem:[#allocation2 + $0x50] sm:$0xff]  ;;  %vm8362_vm15 = vmmov %vm8360_vm0 }
 0x4ae   : > { %3527 = vst.msk [vmem:[%s4658_s8 + $0x8] sm:$0xff] %vm8348_vm12, %v3465_v54  ;;  %4340 = vrcp.f32 %v3345_v30  ;;  %v4317_v60 = vpop.eup %4316  ;;  %v3433_v19 = vsub.f32 %v3369_v44, %v3401_v15  ;;  %v3370_v59 = vmul.f32 %v7398_v22, %v3274_v26  ;;  %v3275_v21 = vadd.f32 %v3217_v4, %v3147_v42  ;;  %v3404_v22 = vld [vmem:[#allocation4 + $0x30] sm:$0xff]  ;;  %v7445_v30 = vld [vmem:[#allocation5 + $0x78] sm:$0xff]  ;;  %v7452_v42 = vld [vmem:[#allocation5 + $0x80] sm:$0xff] }
 0x4af   : > { %v3219_v61 = vmul.f32 0.6931472, %v4315_v12  ;;  %v4319_v20 = vpop.eup %4318  ;;  %3528 = vst.msk [vmem:[%s4658_s8 + $0x10] sm:$0xff] %vm8349_vm9, %v3467_v36  ;;  %4342 = vlog2.f32 %v3187_v11  ;;  %v3407_v26 = vld [vmem:[#allocation4 + $0x48] sm:$0xff]  ;;  %v3349_v4 = vmax.f32 %v7445_v30, 1.0  ;;  %vm8363_vm2 = vmmov %vm8360_vm0 }
 0x4b0   : > { %v4321_v49 = vpop.eup %4320  ;;  %v3469_v38 = vmul.f32 %v4309_v37, %v3433_v19  ;;  %v3434_v57 = vsub.f32 %v3370_v59, %v3402_v5  ;;  %v3371_v32 = vmul.f32 %v7400_v23, %v3275_v21  ;;  %v3221_v13 = vmul.f32 0.6931472, %v4319_v20  ;;  %v7441_v23 = vld [vmem:[#allocation5 + $0x70] sm:$0xff]  ;;  %v3406_v37 = vld [vmem:[#allocation4 + $0x40] sm:$0xff]  ;;  %vm8364_vm12 = vmmov %vm8360_vm0 }
 0x4b1   : > { %v3276_v47 = vadd.f32 %v3219_v61, %v3148_v35  ;;  %v4323_v31 = vpop.eup %4322  ;;  %4344 = vrcp.f32 %v3346_v43  ;;  %v3348_v24 = vmax.f32 %v7441_v23, 1.0  ;;  %v3190_v35 = vld [vmem:[#allocation3 + $0x80] sm:$0xff]  ;;  %v7458_v43 = vld [vmem:[#allocation5 + $0x88] sm:$0xff]  ;;  %v3408_v59 = vld [vmem:[#allocation4 + $0x50] sm:$0xff]  ;;  %v3350_v21 = vmax.f32 %v7452_v42, 1.0 }
 0x4b2   : > { %v4325_v28 = vpop.eup %4324  ;;  %3529 = vst.msk [vmem:[%s4658_s8 + $0x18] sm:$0xff] %vm8350_vm5, %v3469_v38  ;;  %v3471_v50 = vmul.f32 %v4313_v2, %v3434_v57  ;;  %v3435_v8 = vsub.f32 %v3371_v32, %v3403_v29  ;;  %v3223_v62 = vmul.f32 0.6931472, %v4323_v31  ;;  %v3277_v45 = vadd.f32 %v3221_v13, %v3149_v48  ;;  %v3191_v57 = vld [vmem:[#allocation3 + $0x88] sm:$0xff]  ;;  %v3409_v32 = vld [vmem:[#allocation4 + $0x58] sm:$0xff]  ;;  %vm8365_vm9 = vmmov %vm8360_vm0 }
 0x4b3   : > { %v3372_v17 = vmul.f32 %v7403_v27, %v3276_v47  ;;  %v4327_v33 = vpop.eup %4326  ;;  %4346 = vlog2.f32 %v3188_v14  ;;  %v3351_v48 = vmax.f32 %v7458_v43, 1.0  ;;  %v7465_v14 = vld [vmem:[#allocation5 + $0x90] sm:$0xff]  ;;  %vm8366_vm5 = vmmov %vm8360_vm0 }
 0x4b4   : > { %v4329_v16 = vpop.eup %4328  ;;  %3530 = vst.msk [vmem:[%s4658_s8 + $0x20] sm:$0xff] %vm8351_vm6, %v3471_v50  ;;  %v3473_v3 = vmul.f32 %v4317_v60, %v3435_v8  ;;  %v3278_v7 = vadd.f32 %v3223_v62, %v3150_v56  ;;  %v3225_v41 = vmul.f32 0.6931472, %v4327_v33  ;;  %v3373_v40 = vmul.f32 %v7406_v10, %v3277_v45  ;;  %v3153_v10 = vld [vmem:[#allocation2 + $0x58] sm:$0xff]  ;;  %v3155_v56 = vld [vmem:[#allocation2 + $0x68] sm:$0xff]  ;;  %v3410_v45 = vld [vmem:[#allocation4 + $0x60] sm:$0xff] }
 0x4b5   : > { %v3436_v39 = vsub.f32 %v3372_v17, %v3404_v22  ;;  %v4331_v27 = vpop.eup %4330  ;;  %4348 = vrcp.f32 %v3347_v53  ;;  %v3192_v53 = vld [vmem:[#allocation3 + $0x90] sm:$0xff]  ;;  %v7470_v8 = vld [vmem:[#allocation5 + $0x98] sm:$0xff]  ;;  %vm8367_vm6 = vmmov %vm8360_vm0 }
 0x4b6   : > { %v4333_v1 = vpop.eup %4332  ;;  %3531 = vst.msk [vmem:[%s4658_s8 + $0x28] sm:$0xff] %vm8352_vm11, %v3473_v3  ;;  %v3374_v54 = vmul.f32 %v7409_v58, %v3278_v7  ;;  %v3279_v46 = vadd.f32 %v3225_v41, %v3151_v6  ;;  %v3227_v15 = vmul.f32 0.6931472, %v4331_v27  ;;  %v3437_v44 = vsub.f32 %v3373_v40, %v3405_v18  ;;  %v3411_v41 = vld [vmem:[#allocation4 + $0x68] sm:$0xff]  ;;  %v3194_v40 = vld [vmem:[#allocation3 + $0xa0] sm:$0xff]  ;;  %vm8368_vm11 = vmmov %vm8360_vm0 }
 0x4b7   : > { %v3475_v34 = vmul.f32 %v4321_v49, %v3436_v39  ;;  %v4335_v2 = vpop.eup %4334  ;;  %4350 = vlog2.f32 %v3189_v9  ;;  %v3352_v6 = vmax.f32 %v7465_v14, 1.0  ;;  %v7476_v39 = vld [vmem:[#allocation5 + $0xa0] sm:$0xff]  ;;  %v3156_v9 = vld [vmem:[#allocation2 + $0x70] sm:$0xff]  ;;  %v3353_v27 = vmax.f32 %v7470_v8, 1.0 }
 0x4b8   : > { %v4337_v11 = vpop.eup %4336  ;;  %v3438_v12 = vsub.f32 %v3374_v54, %v3406_v37  ;;  %v3375_v36 = vmul.f32 %v7412_v51, %v3279_v46  ;;  %v3280_v5 = vadd.f32 %v3227_v15, %v3152_v55  ;;  %v3229_v58 = vmul.f32 0.6931472, %v4335_v2  ;;  %v3154_v51 = vld [vmem:[#allocation2 + $0x60] sm:$0xff]  ;;  %v3195_v54 = vld [vmem:[#allocation3 + $0xa8] sm:$0xff] }
 0x4b9   : > { %3532 = vst.msk [vmem:[%s4658_s8 + $0x30] sm:$0xff] %vm8353_vm7, %v3475_v34  ;;  %v3477_v19 = vmul.f32 %v4325_v28, %v3437_v44  ;;  %4352 = vrcp.f32 %v3348_v24  ;;  %v3354_v34 = vmax.f32 %v7476_v39, 1.0  ;;  %v7487_v44 = vld [vmem:[#allocation5 + $0xb0] sm:$0xff]  ;;  %vm8369_vm7 = vmmov %vm8360_vm0 }
 0x4ba   : > { %v4339_v60 = vpop.eup %4338  ;;  %v3479_v20 = vmul.f32 %v4329_v16, %v3438_v12  ;;  %v3439_v29 = vsub.f32 %v3375_v36, %v3407_v26  ;;  %v3376_v49 = vmul.f32 %v7415_v25, %v3280_v5  ;;  %v3281_v38 = vadd.f32 %v3229_v58, %v3153_v10  ;;  %v3193_v16 = vld [vmem:[#allocation3 + $0x98] sm:$0xff] }
 0x4bb   : > { %v4341_v61 = vpop.eup %4340  ;;  %3533 = vst.msk [vmem:[%s4658_s8 + $0x38] sm:$0xff] %vm8354_vm14, %v3477_v19  ;;  %v3231_v47 = vmul.f32 0.6931472, %v4339_v60  ;;  %4354 = vlog2.f32 %v3190_v35  ;;  %v3157_v10 = vld [vmem:[#allocation2 + $0x78] sm:$0xff]  ;;  %v3356_v60 = vmax.f32 %v7487_v44, 1.0  ;;  %vm8370_vm14 = vmmov %vm8360_vm0 }
 0x4bc   : > { %v4343_v31 = vpop.eup %4342  ;;  %3534 = vst.msk [vmem:[%s4658_s8 + $0x40] sm:$0xff] %vm8355_vm4, %v3479_v20  ;;  %v3481_v22 = vmul.f32 %v4333_v1, %v3439_v29  ;;  %v3440_v13 = vsub.f32 %v3376_v49, %v3408_v59  ;;  %v3377_v25 = vmul.f32 %v7418_v63, %v3281_v38  ;;  %4356 = vrcp.f32 %v3349_v4  ;;  %v7493_v58 = vld [vmem:[#allocation5 + $0xb8] sm:$0xff]  ;;  %v3158_v29 = vld [vmem:[#allocation2 + $0x80] sm:$0xff]  ;;  %vm8371_vm4 = vmmov %vm8360_vm0 }
 0x4bd   : > { %v3282_v28 = vadd.f32 %v3231_v47, %v3154_v51  ;;  %v3233_v50 = vmul.f32 0.6931472, %v4343_v31  ;;  %4358 = vlog2.f32 %v3191_v57  ;;  %v3197_v19 = vld [vmem:[#allocation3 + $0xb8] sm:$0xff]  ;;  %v3198_v49 = vld [vmem:[#allocation3 + $0xc0] sm:$0xff]  ;;  %v3159_v31 = vld [vmem:[#allocation2 + $0x88] sm:$0xff] }
 0x4be   : > { %v4345_v17 = vpop.eup %4344  ;;  %3535 = vst.msk [vmem:[%s4658_s8 + $0x48] sm:$0xff] %vm8356_vm10, %v3481_v22  ;;  %v3483_v62 = vmul.f32 %v4337_v11, %v3440_v13  ;;  %v3441_v33 = vsub.f32 %v3377_v25, %v3409_v32  ;;  %4360 = vrcp.f32 %v3350_v21  ;;  %v3196_v11 = vld [vmem:[#allocation3 + $0xb0] sm:$0xff]  ;;  %v3413_v20 = vld [vmem:[#allocation4 + $0x78] sm:$0xff]  ;;  %v7500_v47 = vld [vmem:[#allocation5 + $0xc0] sm:$0xff] }
 0x4bf   : > { %v3378_v63 = vmul.f32 %v7423_v0, %v3282_v28  ;;  %v3283_v3 = vadd.f32 %v3233_v50, %v3155_v56  ;;  %4362 = vlog2.f32 %v3192_v53  ;;  %v7482_v0 = vld [vmem:[#allocation5 + $0xa8] sm:$0xff]  ;;  %v3414_v50 = vld [vmem:[#allocation4 + $0x80] sm:$0xff]  ;;  %vm8372_vm10 = vmmov %vm8360_vm0 }
 0x4c0   : > { %v4347_v18 = vpop.eup %4346  ;;  %3536 = vst.msk [vmem:[%s4658_s8 + $0x50] sm:$0xff] %vm8357_vm1, %v3483_v62  ;;  %v3485_v7 = vmul.f32 %v4341_v61, %v3441_v33  ;;  %4364 = vrcp.f32 %v3351_v48  ;;  %v3355_v4 = vmax.f32 %v7482_v0, 1.0  ;;  %v3199_v53 = vld [vmem:[#allocation3 + $0xc8] sm:$0xff]  ;;  %vm8373_vm1 = vmmov %vm8360_vm0 }
 0x4c1   : > { %v3442_v37 = vsub.f32 %v3378_v63, %v3410_v45  ;;  %v3379_v55 = vmul.f32 %v7432_v52, %v3283_v3  ;;  %v3235_v24 = vmul.f32 0.6931472, %v4347_v18  ;;  %4366 = vlog2.f32 %v3193_v16  ;;  %v3412_v52 = vld [vmem:[#allocation4 + $0x70] sm:$0xff]  ;;  %v7506_v63 = vld [vmem:[#allocation5 + $0xc8] sm:$0xff] }
 0x4c2   : > { %v4349_v1 = vpop.eup %4348  ;;  %3537 = vst.msk [vmem:[%s4658_s8 + $0x58] sm:$0xff] %vm8358_vm3, %v3485_v7  ;;  %4368 = vrcp.f32 %v3352_v6  ;;  %v3415_v18 = vld [vmem:[#allocation4 + $0x88] sm:$0xff]  ;;  %v3161_v7 = vld [vmem:[#allocation2 + $0x98] sm:$0xff]  ;;  %vm8374_vm3 = vmmov %vm8360_vm0 }
 0x4c3   : > { %v3487_v46 = vmul.f32 %v4345_v17, %v3442_v37  ;;  %v3443_v15 = vsub.f32 %v3379_v55, %v3411_v41  ;;  %v3284_v2 = vadd.f32 %v3235_v24, %v3156_v9  ;;  %4370 = vlog2.f32 %v3194_v40  ;;  %v3160_v17 = vld [vmem:[#allocation2 + $0x90] sm:$0xff] }
 0x4c4   : > { %v4351_v26 = vpop.eup %4350  ;;  %4372 = vrcp.f32 %v3353_v27  ;;  %v3200_v55 = vld [vmem:[#allocation3 + $0xd0] sm:$0xff] }
 0x4c5   : > { %3538 = vst.msk [vmem:[%s4658_s8 + $0x60] sm:$0xff] %vm8359_vm13, %v3487_v46  ;;  %v3489_v12 = vmul.f32 %v4349_v1, %v3443_v15  ;;  %v3380_v36 = vmul.f32 %v7441_v23, %v3284_v2  ;;  %v3237_v5 = vmul.f32 0.6931472, %v4351_v26  ;;  %4374 = vlog2.f32 %v3195_v54  ;;  %v3416_v1 = vld [vmem:[#allocation4 + $0x90] sm:$0xff]  ;;  %v3162_v26 = vld [vmem:[#allocation2 + $0xa0] sm:$0xff]  ;;  %vm8375_vm13 = vmmov %vm8360_vm0 }
 0x4c6   : > { %v4353_v35 = vpop.eup %4352  ;;  %4376 = vrcp.f32 %v3354_v34  ;;  %v3357_v23 = vmax.f32 %v7493_v58, 1.0 }
 0x4c7   : > { %3539 = vst.msk [vmem:[%s4658_s8 + $0x68] sm:$0xff] %vm8360_vm0, %v3489_v12  ;;  %v3444_v59 = vsub.f32 %v3380_v36, %v3412_v52  ;;  %v3285_v21 = vadd.f32 %v3237_v5, %v3157_v10  ;;  %4378 = vlog2.f32 %v3196_v11  ;;  %v7513_v52 = vld [vmem:[#allocation5 + $0xd0] sm:$0xff]  ;;  %v3163_v11 = vld [vmem:[#allocation2 + $0xa8] sm:$0xff] }
 0x4c8   : > { %v4355_v61 = vpop.eup %4354  ;;  %4380 = vrcp.f32 %v3355_v4 }
 0x4c9   : > { %v4357_v38 = vpop.eup %4356  ;;  %v3491_v51 = vmul.f32 %v4353_v35, %v3444_v59  ;;  %v3381_v57 = vmul.f32 %v7445_v30, %v3285_v21  ;;  %v3239_v32 = vmul.f32 0.6931472, %v4355_v61  ;;  %4382 = vlog2.f32 %v3197_v19  ;;  %v3201_v19 = vld [vmem:[#allocation3 + $0xd8] sm:$0xff]  ;;  %v3164_v21 = vld [vmem:[#allocation2 + $0xb0] sm:$0xff] }
 0x4ca   : > { %v4359_v48 = vpop.eup %4358  ;;  %4384 = vrcp.f32 %v3356_v60  ;;  %v3358_v30 = vmax.f32 %v7500_v47, 1.0  ;;  %v3360_v61 = vmax.f32 %v7513_v52, 1.0 }
 0x4cb   : > { %v4361_v22 = vpop.eup %4360  ;;  %3540 = vst.msk [vmem:[%s4658_s8 + $0x70] sm:$0xff] %vm8361_vm8, %v3491_v51  ;;  %v3445_v13 = vsub.f32 %v3381_v57, %v3413_v20  ;;  %v3286_v25 = vadd.f32 %v3239_v32, %v3158_v29  ;;  %v3241_v56 = vmul.f32 0.6931472, %v4359_v48  ;;  %4386 = vlog2.f32 %v3198_v49  ;;  %v3418_v49 = vld [vmem:[#allocation4 + $0xa0] sm:$0xff]  ;;  %v7521_v57 = vld [vmem:[#allocation5 + $0xd8] sm:$0xff]  ;;  %v3419_v48 = vld [vmem:[#allocation4 + $0xa8] sm:$0xff] }
 0x4cc   : > { %v4363_v28 = vpop.eup %4362  ;;  %4388 = vrcp.f32 %v3357_v23  ;;  %vm8376_vm8 = vmmov %vm8360_vm0 }
 0x4cd   : > { %v4365_v62 = vpop.eup %4364  ;;  %v3493_v33 = vmul.f32 %v4357_v38, %v3445_v13  ;;  %v3382_v45 = vmul.f32 %v7452_v42, %v3286_v25  ;;  %v3287_v6 = vadd.f32 %v3241_v56, %v3159_v31  ;;  %v3243_v16 = vmul.f32 0.6931472, %v4363_v28  ;;  %v3165_v31 = vld [vmem:[#allocation2 + $0xb8] sm:$0xff]  ;;  %v3202_v28 = vld [vmem:[#allocation3 + $0xe0] sm:$0xff] }
 0x4ce   : > { %v4367_v3 = vpop.eup %4366  ;;  %4390 = vlog2.f32 %v3199_v53  ;;  %v3359_v42 = vmax.f32 %v7506_v63, 1.0 }
 0x4cf   : > { %v4369_v41 = vpop.eup %4368  ;;  %3541 = vst.msk [vmem:[%s4658_s8 + $0x78] sm:$0xff] %vm8362_vm15, %v3493_v33  ;;  %v3446_v9 = vsub.f32 %v3382_v45, %v3414_v50  ;;  %v3383_v27 = vmul.f32 %v7458_v43, %v3287_v6  ;;  %v3288_v40 = vadd.f32 %v3243_v16, %v3160_v17  ;;  %v3245_v37 = vmul.f32 0.6931472, %v4367_v3  ;;  %v3417_v43 = vld [vmem:[#allocation4 + $0x98] sm:$0xff]  ;;  %vm8377_vm15 = vmmov %vm8360_vm0 }
 0x4d0   : > { %v4371_v24 = vpop.eup %4370  ;;  %4392 = vrcp.f32 %v3358_v30  ;;  %v3420_v30 = vld [vmem:[#allocation4 + $0xb0] sm:$0xff] }
 0x4d1   : > { %v4373_v34 = vpop.eup %4372  ;;  %v3495_v54 = vmul.f32 %v4361_v22, %v3446_v9  ;;  %v3447_v46 = vsub.f32 %v3383_v27, %v3415_v18  ;;  %v3384_v15 = vmul.f32 %v7465_v14, %v3288_v40  ;;  %v3289_v2 = vadd.f32 %v3245_v37, %v3161_v7  ;;  %v3421_v7 = vld [vmem:[#allocation4 + $0xb8] sm:$0xff] }
 0x4d2   : > { %v4375_v10 = vpop.eup %4374  ;;  %v3247_v4 = vmul.f32 0.6931472, %v4371_v24  ;;  %4394 = vlog2.f32 %v3200_v55  ;;  %v3167_v24 = vld [vmem:[#allocation2 + $0xc8] sm:$0xff] }
 0x4d3   : > { %v4377_v12 = vpop.eup %4376  ;;  %3542 = vst.msk [vmem:[%s4658_s8 + $0x80] sm:$0xff] %vm8363_vm2, %v3495_v54  ;;  %v3497_v36 = vmul.f32 %v4365_v62, %v3447_v46  ;;  %v3448_v5 = vsub.f32 %v3384_v15, %v3416_v1  ;;  %v3385_v35 = vmul.f32 %v7470_v8, %v3289_v2  ;;  %v3249_v60 = vmul.f32 0.6931472, %v4375_v10  ;;  %v3166_v62 = vld [vmem:[#allocation2 + $0xc0] sm:$0xff]  ;;  %v3204_v54 = vld [vmem:[#allocation3 + $0xf0] sm:$0xff] }
 0x4d4   : > { %v4379_v14 = vpop.eup %4378  ;;  %v3290_v59 = vadd.f32 %v3247_v4, %v3162_v26  ;;  %4396 = vrcp.f32 %v3359_v42  ;;  %v3422_v1 = vld [vmem:[#allocation4 + $0xc0] sm:$0xff]  ;;  %v7542_v10 = vld [vmem:[#allocation5 + $0xf0] sm:$0xff] }
 0x4d5   : > { %v4381_v20 = vpop.eup %4380  ;;  %3543 = vst.msk [vmem:[%s4658_s8 + $0x88] sm:$0xff] %vm8364_vm12, %v3497_v36  ;;  %v3499_v29 = vmul.f32 %v4369_v41, %v3448_v5  ;;  %v3449_v23 = vsub.f32 %v3385_v35, %v3417_v43  ;;  %v3291_v38 = vadd.f32 %v3249_v60, %v3163_v11  ;;  %v3251_v51 = vmul.f32 0.6931472, %v4379_v14  ;;  %v3203_v41 = vld [vmem:[#allocation3 + $0xe8] sm:$0xff]  ;;  %v3205_v43 = vld [vmem:[#allocation3 + $0xf8] sm:$0xff]  ;;  %v3168_v5 = vld [vmem:[#allocation2 + $0xd0] sm:$0xff] }
 0x4d6   : > { %v4383_v8 = vpop.eup %4382  ;;  %v3386_v32 = vmul.f32 %v7476_v39, %v3290_v59  ;;  %4398 = vlog2.f32 %v3201_v19  ;;  %v3361_v39 = vmax.f32 %v7521_v57, 1.0  ;;  %v3423_v36 = vld [vmem:[#allocation4 + $0xc8] sm:$0xff]  ;;  %v7548_v19 = vld [vmem:[#allocation5 + $0xf8] sm:$0xff] }
 0x4d7   : > { %v4385_v22 = vpop.eup %4384  ;;  %3544 = vst.msk [vmem:[%s4658_s8 + $0x90] sm:$0xff] %vm8365_vm9, %v3499_v29  ;;  %v3501_v13 = vmul.f32 %v4373_v34, %v3449_v23  ;;  %v3387_v25 = vmul.f32 %v7482_v0, %v3291_v38  ;;  %v3292_v56 = vadd.f32 %v3251_v51, %v3164_v21  ;;  %v3253_v53 = vmul.f32 0.6931472, %v4383_v8  ;;  %v7531_v0 = vld [vmem:[#allocation5 + $0xe0] sm:$0xff]  ;;  %v7537_v34 = vld [vmem:[#allocation5 + $0xe8] sm:$0xff]  ;;  %v3424_v23 = vld [vmem:[#allocation4 + $0xd0] sm:$0xff] }
 0x4d8   : > { %v4387_v50 = vpop.eup %4386  ;;  %v3450_v17 = vsub.f32 %v3386_v32, %v3418_v49  ;;  %4400 = vrcp.f32 %v3360_v61  ;;  %v3362_v42 = vmax.f32 %v7531_v0, 1.0  ;;  %v3363_v35 = vmax.f32 %v7537_v34, 1.0  ;;  %v3169_v49 = vld [vmem:[#allocation2 + $0xd8] sm:$0xff] }
 0x4d9   : > { %v4389_v33 = vpop.eup %4388  ;;  %3545 = vst.msk [vmem:[%s4658_s8 + $0x98] sm:$0xff] %vm8366_vm5, %v3501_v13  ;;  %v3451_v45 = vsub.f32 %v3387_v25, %v3419_v48  ;;  %v3388_v6 = vmul.f32 %v7487_v44, %v3292_v56  ;;  %v3293_v16 = vadd.f32 %v3253_v53, %v3165_v31  ;;  %v3255_v3 = vmul.f32 0.6931472, %v4387_v50  ;;  %v3425_v13 = vld [vmem:[#allocation4 + $0xd8] sm:$0xff]  ;;  %v3170_v25 = vld [vmem:[#allocation2 + $0xe0] sm:$0xff] }
 0x4da   : > { %v3503_v18 = vmul.f32 %v4377_v12, %v3450_v17  ;;  %4402 = vlog2.f32 %v3202_v28  ;;  %v3364_v21 = vmax.f32 %v7542_v10, 1.0 }
 0x4db   : > { %v4391_v9 = vpop.eup %4390  ;;  %v3505_v27 = vmul.f32 %v4381_v20, %v3451_v45  ;;  %v3452_v40 = vsub.f32 %v3388_v6, %v3420_v30  ;;  %v3389_v37 = vmul.f32 %v7493_v58, %v3293_v16  ;;  %v3294_v55 = vadd.f32 %v3255_v3, %v3166_v62  ;;  %v3171_v62 = vld [vmem:[#allocation2 + $0xe8] sm:$0xff]  ;;  %v3172_v3 = vld [vmem:[#allocation2 + $0xf0] sm:$0xff] }
 0x4dc   : > { %3546 = vst.msk [vmem:[%s4658_s8 + $0xa0] sm:$0xff] %vm8367_vm6, %v3503_v18  ;;  %v3257_v44 = vmul.f32 0.6931472, %v4391_v9  ;;  %4404 = vrcp.f32 %v3361_v39  ;;  %v3426_v39 = vld [vmem:[#allocation4 + $0xe0] sm:$0xff] }
 0x4dd   : > { %v4393_v46 = vpop.eup %4392  ;;  %3547 = vst.msk [vmem:[%s4658_s8 + $0xa8] sm:$0xff] %vm8368_vm11, %v3505_v27  ;;  %v3507_v15 = vmul.f32 %v4385_v22, %v3452_v40  ;;  %v3453_v2 = vsub.f32 %v3389_v37, %v3421_v7  ;;  %v3390_v58 = vmul.f32 %v7500_v47, %v3294_v55  ;;  %4406 = vlog2.f32 %v3203_v41  ;;  %v3427_v27 = vld [vmem:[#allocation4 + $0xe8] sm:$0xff]  ;;  %v3173_v40 = vld [vmem:[#allocation2 + $0xf8] sm:$0xff] }
 0x4de   : > { %v3295_v26 = vadd.f32 %v3257_v44, %v3167_v24  ;;  %4408 = vlog2.f32 %v3204_v54 }
 0x4df   : > { %v4395_v4 = vpop.eup %4394  ;;  %3548 = vst.msk [vmem:[%s4658_s8 + $0xb0] sm:$0xff] %vm8369_vm7, %v3507_v15  ;;  %v3509_v11 = vmul.f32 %v4389_v33, %v3453_v2  ;;  %v3454_v12 = vsub.f32 %v3390_v58, %v3422_v1  ;;  %4410 = vrcp.f32 %v3362_v42  ;;  %v3429_v2 = vld [vmem:[#allocation4 + $0xf8] sm:$0xff] }
 0x4e0   : > { %v3391_v60 = vmul.f32 %v7506_v63, %v3295_v26  ;;  %v3259_v47 = vmul.f32 0.6931472, %v4395_v4  ;;  %4412 = vlog2.f32 %v3205_v43  ;;  %v3365_v63 = vmax.f32 %v7548_v19, 1.0 }
 0x4e1   : > { %v4397_v14 = vpop.eup %4396  ;;  %3549 = vst.msk [vmem:[%s4658_s8 + $0xb8] sm:$0xff] %vm8370_vm14, %v3509_v11  ;;  %v3511_v59 = vmul.f32 %v4393_v46, %v3454_v12  ;;  %4414 = vrcp.f32 %v3363_v35 }
 0x4e2   : > { %v3455_v61 = vsub.f32 %v3391_v60, %v3423_v36  ;;  %v3296_v20 = vadd.f32 %v3259_v47, %v3168_v5  ;;  %4416 = vrcp.f32 %v3364_v21 }
 0x4e3   : > { %v4399_v29 = vpop.eup %4398  ;;  %3550 = vst.msk [vmem:[%s4658_s8 + $0xc0] sm:$0xff] %vm8371_vm4, %v3511_v59  ;;  %4418 = vrcp.f32 %v3365_v63 }
 0x4e4   : > { %v3513_v38 = vmul.f32 %v4397_v14, %v3455_v61  ;;  %v3392_v51 = vmul.f32 %v7513_v52, %v3296_v20  ;;  %v3261_v8 = vmul.f32 0.6931472, %v4399_v29 }
 0x4e5   : > { %v4401_v32 = vpop.eup %4400 }
 0x4e6   : > { %3551 = vst.msk [vmem:[%s4658_s8 + $0xc8] sm:$0xff] %vm8372_vm10, %v3513_v38  ;;  %v3456_v48 = vsub.f32 %v3392_v51, %v3424_v23  ;;  %v3297_v31 = vadd.f32 %v3261_v8, %v3169_v49 }
 0x4e7   : > { %v4403_v22 = vpop.eup %4402 }
 0x4e8   : > { %v3515_v56 = vmul.f32 %v4401_v32, %v3456_v48  ;;  %v3393_v53 = vmul.f32 %v7521_v57, %v3297_v31  ;;  %v3263_v28 = vmul.f32 0.6931472, %v4403_v22 }
 0x4e9   : > { %v4405_v50 = vpop.eup %4404 }
 0x4ea   : > { %v4407_v17 = vpop.eup %4406  ;;  %3552 = vst.msk [vmem:[%s4658_s8 + $0xd0] sm:$0xff] %vm8373_vm1, %v3515_v56  ;;  %v3457_v52 = vsub.f32 %v3393_v53, %v3425_v13  ;;  %v3298_v30 = vadd.f32 %v3263_v28, %v3170_v25 }
 0x4eb   : > { %v3265_v33 = vmul.f32 0.6931472, %v4407_v17  ;;  %v4409_v45 = vpop.eup %4408 }
 0x4ec   : > { %v3517_v6 = vmul.f32 %v4405_v50, %v3457_v52  ;;  %v3394_v16 = vmul.f32 %v7531_v0, %v3298_v30  ;;  %v4411_v18 = vpop.eup %4410  ;;  %v3267_v41 = vmul.f32 0.6931472, %v4409_v45  ;;  %v3428_v0 = vld [vmem:[#allocation4 + $0xf0] sm:$0xff] }
 0x4ed   : > { %v3299_v7 = vadd.f32 %v3265_v33, %v3171_v62  ;;  %v4413_v57 = vpop.eup %4412 }
 0x4ee   : > { %3553 = vst.msk [vmem:[%s4658_s8 + $0xd8] sm:$0xff] %vm8374_vm3, %v3517_v6  ;;  %v3458_v9 = vsub.f32 %v3394_v16, %v3426_v39  ;;  %v3300_v55 = vadd.f32 %v3267_v41, %v3172_v3  ;;  %v3269_v24 = vmul.f32 0.6931472, %v4413_v57  ;;  %v4415_v1 = vpop.eup %4414 }
 0x4ef   : > { %v3395_v37 = vmul.f32 %v7537_v34, %v3299_v7  ;;  %v4417_v15 = vpop.eup %4416 }
 0x4f0   : > { %v3519_v44 = vmul.f32 %v4411_v18, %v3458_v9  ;;  %v3396_v54 = vmul.f32 %v7542_v10, %v3300_v55  ;;  %v3301_v46 = vadd.f32 %v3269_v24, %v3173_v40  ;;  %v4419_v43 = vpop.eup %4418 }
 0x4f1   : > { %v3459_v42 = vsub.f32 %v3395_v37, %v3427_v27 }
 0x4f2   : > { %3554 = vst.msk [vmem:[%s4658_s8 + $0xe0] sm:$0xff] %vm8375_vm13, %v3519_v44  ;;  %v3460_v26 = vsub.f32 %v3396_v54, %v3428_v0  ;;  %v3397_v34 = vmul.f32 %v7548_v19, %v3301_v46 }
 0x4f3   : > { %v3521_v58 = vmul.f32 %v4415_v1, %v3459_v42 }
 0x4f4   : > { %v3523_v4 = vmul.f32 %v4417_v15, %v3460_v26  ;;  %v3461_v11 = vsub.f32 %v3397_v34, %v3429_v2 }
 0x4f5   : > { %3555 = vst.msk [vmem:[%s4658_s8 + $0xe8] sm:$0xff] %vm8360_vm0, %v3521_v58 }
 0x4f6   : > { %3556 = vst.msk [vmem:[%s4658_s8 + $0xf0] sm:$0xff] %vm8376_vm8, %v3523_v4  ;;  %v3525_v12 = vmul.f32 %v4419_v43, %v3461_v11 }
 0x4f8   : > { %3557 = vst.msk [vmem:[%s4658_s8 + $0xf8] sm:$0xff] %vm8377_vm15, %v3525_v12 }
 0x4f9 PF: > { %s17_s22 = sadd.s32 1, %s4514_s22   ;;  %s8378_s15 = smov %s4490_s16 }
 0x4fa   : > { %p14_p12 = scmp.ge.s32.totalorder %s17_s22, 6   ;;  %s8379_s16 = smov %s4494_s17 }
 0x4fb   : > { %s8380_s17 = smov %s4606_s29  ;;  %s8381_s18 = smov %s4506_s20 }
 0x4fc   : > { %s8382_s19 = smov %s4510_s21  ;;  %s8383_s20 = smov %s8386_s24 }
 0x4fd   : > { %s8384_s21 = smov %s8390_s25  ;;  %16 = sbr.rel (!%p14_p12) target bundleno = 5 (0x5), region = 93 }
 0x502   :  { %3580 = vsyncpa [#allocation7], 1 }
 0x503   :  { %3582 = vsyncpa [#allocation7 + $0x1], 1 }

</bundles_post_ra>
